<compile_context>
chip_gen: v7x
topology: tpu7x:2x2x1
jax: 0.10.0
libtpu: 0.0.40
codegen_flags: <defaults>
</compile_context>

<pallas_src>
import math
from functools import partial

import jax
import jax.numpy as jnp
from jax.experimental import pallas as pl
from jax.experimental.pallas import tpu as pltpu


# ----------------------------------------------------------------------------
# Kernel 1: tiled dense linear  y = x @ W + b
#   x: [M, Din]   W: [Din, Dout]   b: [1, Dout]   y: [M, Dout]
# Grid (M/tm, Dout/tn, Din/tk); f32 accumulator in VMEM; bf16 MXU operands.
# ----------------------------------------------------------------------------
def _linear_kernel(x_ref, w_ref, b_ref, o_ref, acc_ref):
    k = pl.program_id(2)

    @pl.when(k == 0)
    def _init():
        acc_ref[...] = jnp.zeros_like(acc_ref)

    acc_ref[...] += jnp.dot(
        x_ref[...].astype(jnp.bfloat16),
        w_ref[...].astype(jnp.bfloat16),
        preferred_element_type=jnp.float32,
    )

    @pl.when(k == pl.num_programs(2) - 1)
    def _finalize():
        o_ref[...] = (acc_ref[...] + b_ref[...]).astype(o_ref.dtype)


def linear(x, w, b, *, tm=256, tn=512, tk=512):
    M, Din = x.shape
    Dout = w.shape[1]
    tm = min(tm, M)
    tn = min(tn, Dout)
    tk = min(tk, Din)
    grid = (pl.cdiv(M, tm), pl.cdiv(Dout, tn), pl.cdiv(Din, tk))

    cost = pl.CostEstimate(
        flops=2 * M * Din * Dout,
        transcendentals=0,
        bytes_accessed=4 * (M * Din + Din * Dout + Dout + M * Dout),
    )

    return pl.pallas_call(
        _linear_kernel,
        out_shape=jax.ShapeDtypeStruct((M, Dout), x.dtype),
        grid_spec=pltpu.PrefetchScalarGridSpec(
            num_scalar_prefetch=0,
            grid=grid,
            in_specs=[
                pl.BlockSpec((tm, tk), lambda i, j, k: (i, k)),
                pl.BlockSpec((tk, tn), lambda i, j, k: (k, j)),
                pl.BlockSpec((1, tn), lambda i, j, k: (0, j)),
            ],
            out_specs=pl.BlockSpec((tm, tn), lambda i, j, k: (i, j)),
            scratch_shapes=[pltpu.VMEM((tm, tn), jnp.float32)],
        ),
        compiler_params=pltpu.CompilerParams(
            dimension_semantics=("parallel", "parallel", "arbitrary"),
            vmem_limit_bytes=32 * 1024 * 1024,  # fits v7x's 64 MiB VMEM per TC
        ),
        cost_estimate=cost,
    )(x, w, b.reshape(1, Dout))


# ----------------------------------------------------------------------------
# Kernel 2: per-(batch, kv_group) attention over the fused QKV slab.
#   qkv: [B, S, E + 2*G*D]   (columns: [Q heads | K groups | V groups])
# Grid = (B, G). Each program gets:
#   q block (1, S, hpg*D)  -> all query heads of the group (lane-aligned slice)
#   k block (1, S, D)      -> the shared K of the group
#   v block (1, S, D)      -> the shared V of the group
# and writes (1, S, hpg*D) straight into the [B, S, E] output (lane-dense,
# no post-attention transpose needed).
# ----------------------------------------------------------------------------
def _gqa_attn_kernel(q_ref, k_ref, v_ref, o_ref, *, heads_per_group, head_dim):
    hpg = heads_per_group
    D = head_dim
    S = q_ref.shape[1]
    scale = 1.0 / math.sqrt(D)

    q_slab = q_ref[0]                              # (S, hpg*D), f32
    k = k_ref[0].astype(jnp.bfloat16)              # (S, D)
    v = v_ref[0].astype(jnp.bfloat16)              # (S, D)

    # Gather per-head query tiles into one (hpg*S, D) operand so the score
    # matmul is a single MXU-friendly GEMM. Slices are lane-tile aligned
    # (D is a multiple of 128) and sublane aligned (S is a multiple of 8).
    q_big = jnp.concatenate(
        [q_slab[:, h * D:(h + 1) * D] for h in range(hpg)], axis=0)
    q_big = (q_big * scale).astype(jnp.bfloat16)   # fold 1/sqrt(D) into q (SxD, not SxS)

    # scores[h*S + i, j] = sum_d q[h, i, d] * k[j, d]  -- contraction on D,
    # no explicit k.T materialization.
    scores = jax.lax.dot_general(
        q_big, k,
        dimension_numbers=(((1,), (1,)), ((), ())),
        preferred_element_type=jnp.float32,
    )                                              # (hpg*S, S)

    m = jnp.max(scores, axis=-1, keepdims=True)
    p = jnp.exp(scores - m)
    denom = jnp.sum(p, axis=-1, keepdims=True)
    weights = p * pl.reciprocal(denom, approx=True)

    out_big = jax.lax.dot_general(
        weights.astype(jnp.bfloat16), v,
        dimension_numbers=(((1,), (0,)), ((), ())),
        preferred_element_type=jnp.float32,
    )                                              # (hpg*S, D)

    # Scatter per-head results back to the lane-dense (S, hpg*D) layout so the
    # output lands directly in [B, S, E] (out_proj consumes it with no HBM
    # transpose).
    out = jnp.concatenate(
        [out_big[h * S:(h + 1) * S, :] for h in range(hpg)], axis=-1)
    o_ref[0, :, :] = out.astype(o_ref.dtype)


def gqa_attention(qkv, batch, seq, embed_dim, num_heads, num_kv_groups):
    D = embed_dim // num_heads
    G = num_kv_groups
    hpg = num_heads // G
    k_off = embed_dim // D          # block-index offset of K columns (in units of D)
    v_off = k_off + G               # block-index offset of V columns

    kernel = partial(_gqa_attn_kernel, heads_per_group=hpg, head_dim=D)

    cost = pl.CostEstimate(
        flops=4 * batch * num_heads * seq * seq * D,
        transcendentals=batch * num_heads * seq * seq,
        bytes_accessed=4 * (2 * batch * seq * embed_dim + 2 * batch * seq * G * D),
    )

    return pl.pallas_call(
        kernel,
        out_shape=jax.ShapeDtypeStruct((batch, seq, embed_dim), qkv.dtype),
        grid_spec=pltpu.PrefetchScalarGridSpec(
            num_scalar_prefetch=0,
            grid=(batch, G),
            in_specs=[
                # Q heads of group g: columns [g*hpg*D, (g+1)*hpg*D)
                pl.BlockSpec((1, seq, hpg * D), lambda b, g: (b, 0, g)),
                # K of group g: columns [E + g*D, E + (g+1)*D)
                pl.BlockSpec((1, seq, D), lambda b, g: (b, 0, k_off + g)),
                # V of group g: columns [E + G*D + g*D, ...)
                pl.BlockSpec((1, seq, D), lambda b, g: (b, 0, v_off + g)),
            ],
            out_specs=pl.BlockSpec((1, seq, hpg * D), lambda b, g: (b, 0, g)),
        ),
        compiler_params=pltpu.CompilerParams(
            dimension_semantics=("parallel", "parallel"),
            vmem_limit_bytes=32 * 1024 * 1024,
        ),
        cost_estimate=cost,
    )(qkv, qkv, qkv)   # same fused slab, three different BlockSpec windows


# ----------------------------------------------------------------------------
# Full forward pass (glue in plain JAX, hot paths in Pallas)
# ----------------------------------------------------------------------------
def gqa_forward(x, params, num_heads, num_kv_groups):
    B, S, E = x.shape
    D = E // num_heads
    G = num_kv_groups

    # Fused QKV projection: one lane-dense GEMM producing [B*S, E + 2*G*D].
    w_qkv = jnp.concatenate([params["wq"], params["wk"], params["wv"]], axis=1)
    b_qkv = jnp.concatenate([params["bq"], params["bk"], params["bv"]], axis=0)
    qkv = linear(x.reshape(B * S, E), w_qkv, b_qkv)          # [B*S, E + 2*G*D]
    qkv = qkv.reshape(B, S, E + 2 * G * D)                   # free reshape

    # Attention reads Q/K/V out of the fused slab via BlockSpec column windows
    # and writes [B, S, E] directly -> zero HBM-level head transposes.
    attn = gqa_attention(qkv, B, S, E, num_heads, G)         # [B, S, E]

    out = linear(attn.reshape(B * S, E), params["wo"], params["bo"])
    return out.reshape(B, S, E)


# ----------------------------------------------------------------------------
# Pure-JAX (f32) reference for correctness check
# ----------------------------------------------------------------------------
def gqa_reference(x, params, num_heads, num_kv_groups):
    B, S, E = x.shape
    head_dim = E // num_heads
    hpg = num_heads // num_kv_groups

    Q = x @ params["wq"] + params["bq"]
    K = x @ params["wk"] + params["bk"]
    V = x @ params["wv"] + params["bv"]

    Q = Q.reshape(B, S, num_heads, head_dim).transpose(0, 2, 1, 3)
    K = K.reshape(B, S, num_kv_groups, head_dim).transpose(0, 2, 1, 3)
    V = V.reshape(B, S, num_kv_groups, head_dim).transpose(0, 2, 1, 3)

    K = jnp.repeat(K, hpg, axis=1)
    V = jnp.repeat(V, hpg, axis=1)

    scores = jnp.einsum("bhqd,bhkd->bhqk", Q, K) / math.sqrt(head_dim)
    weights = jax.nn.softmax(scores, axis=-1)
    out = jnp.einsum("bhqk,bhkd->bhqd", weights, V)
    out = out.transpose(0, 2, 1, 3).reshape(B, S, E)
    return out @ params["wo"] + params["bo"]


if __name__ == "__main__":
    # Small but TPU-native shapes: head_dim = 128 keeps every BlockSpec window
    # lane-aligned (128 lanes) and sublane-aligned (S multiple of 8), while the
    # total problem stays tiny (x has 2*16*512 = 16K elements).
    BATCH, SEQ, EMBED = 2, 16, 512
    NUM_HEADS, NUM_KV_GROUPS = 4, 2
    HEAD_DIM = EMBED // NUM_HEADS        # 128
    KV_DIM = HEAD_DIM * NUM_KV_GROUPS    # 256

    key = jax.random.PRNGKey(0)
    ks = jax.random.split(key, 9)
    scale = 1.0 / math.sqrt(EMBED)

    # Deterministic parameter init (Linear weights stored as [Din, Dout]).
    params = {
        "wq": jax.random.uniform(ks[0], (EMBED, EMBED), jnp.float32, -scale, scale),
        "bq": jax.random.uniform(ks[1], (EMBED,), jnp.float32, -scale, scale),
        "wk": jax.random.uniform(ks[2], (EMBED, KV_DIM), jnp.float32, -scale, scale),
        "bk": jax.random.uniform(ks[3], (KV_DIM,), jnp.float32, -scale, scale),
        "wv": jax.random.uniform(ks[4], (EMBED, KV_DIM), jnp.float32, -scale, scale),
        "bv": jax.random.uniform(ks[5], (KV_DIM,), jnp.float32, -scale, scale),
        "wo": jax.random.uniform(ks[6], (EMBED, EMBED), jnp.float32, -scale, scale),
        "bo": jax.random.uniform(ks[7], (EMBED,), jnp.float32, -scale, scale),
    }

    x = jax.random.normal(ks[8], (BATCH, SEQ, EMBED), jnp.float32)

    fwd = jax.jit(partial(gqa_forward, num_heads=NUM_HEADS,
                          num_kv_groups=NUM_KV_GROUPS))
    out = jax.block_until_ready(fwd(x, params))

    ref = gqa_reference(x, params, NUM_HEADS, NUM_KV_GROUPS)
    assert out.shape == (BATCH, SEQ, EMBED)
    # Tolerance loosened vs the f32 reference because matmul operands are cast
    # to bf16 in-kernel (f32 accumulation); observed error is ~1e-3.
    assert jnp.allclose(out, ref, atol=2e-2, rtol=2e-2), \
        "Pallas output mismatch vs reference"

    print("KERNEL_OK")
</pallas_src>

<mosaic_0001>
module attributes {stable_mosaic.version = 11 : i64} {
  func.func @_gqa_attn_kernel(%arg0: i32, %arg1: i32, %arg2: memref<1x16x256xf32, #tpu.memory_space<vmem>>, %arg3: memref<1x16x128xf32, #tpu.memory_space<vmem>>, %arg4: memref<1x16x128xf32, #tpu.memory_space<vmem>>, %arg5: memref<1x16x256xf32, #tpu.memory_space<vmem>>) attributes {dimension_semantics = [#tpu.dimension_semantics<parallel>, #tpu.dimension_semantics<parallel>], iteration_bounds = array<i64: 2, 2>, scalar_prefetch = 0 : i64, scratch_operands = 0 : i64, tpu.core_type = #tpu.core_type<tc>, window_params = [{transform_indices = @transform_0, window_bounds = array<i64: 1, 16, 256>}, {transform_indices = @transform_1, window_bounds = array<i64: 1, 16, 128>}, {transform_indices = @transform_2, window_bounds = array<i64: 1, 16, 128>}, {transform_indices = @transform_3, window_bounds = array<i64: 1, 16, 256>}]} {
    %c0 = arith.constant 0 : index
    %c0_0 = arith.constant 0 : index
    %c0_1 = arith.constant 0 : index
    %0 = vector.load %arg2[%c0, %c0_0, %c0_1] : memref<1x16x256xf32, #tpu.memory_space<vmem>>, vector<1x16x256xf32>
    %1 = vector.shape_cast %0 : vector<1x16x256xf32> to vector<16x256xf32>
    %c0_2 = arith.constant 0 : index
    %c0_3 = arith.constant 0 : index
    %c0_4 = arith.constant 0 : index
    %2 = vector.load %arg3[%c0_2, %c0_3, %c0_4] : memref<1x16x128xf32, #tpu.memory_space<vmem>>, vector<1x16x128xf32>
    %3 = vector.shape_cast %2 : vector<1x16x128xf32> to vector<16x128xf32>
    %4 = arith.truncf %3 : vector<16x128xf32> to vector<16x128xbf16>
    %c0_5 = arith.constant 0 : index
    %c0_6 = arith.constant 0 : index
    %c0_7 = arith.constant 0 : index
    %5 = vector.load %arg4[%c0_5, %c0_6, %c0_7] : memref<1x16x128xf32, #tpu.memory_space<vmem>>, vector<1x16x128xf32>
    %6 = vector.shape_cast %5 : vector<1x16x128xf32> to vector<16x128xf32>
    %7 = arith.truncf %6 : vector<16x128xf32> to vector<16x128xbf16>
    %8 = vector.extract_strided_slice %1 {offsets = [0, 0], sizes = [16, 128], strides = [1, 1]} : vector<16x256xf32> to vector<16x128xf32>
    %9 = vector.extract_strided_slice %1 {offsets = [0, 128], sizes = [16, 128], strides = [1, 1]} : vector<16x256xf32> to vector<16x128xf32>
    %10 = tpu.concatenate %8, %9 in 0 : vector<16x128xf32>, vector<16x128xf32> -> vector<32x128xf32>
    %cst = arith.constant 0.0883883461 : f32
    %11 = vector.broadcast %cst : f32 to vector<32x128xf32>
    %12 = arith.mulf %10, %11 : vector<32x128xf32>
    %13 = arith.truncf %12 : vector<32x128xf32> to vector<32x128xbf16>
    %cst_8 = arith.constant dense<0.000000e+00> : vector<32x16xf32>
    %14 = tpu.matmul %13, %4, %cst_8 {dimension_numbers = #tpu.dot_dimension_numbers<[1], [1], [0], [0], [0, 0, 1, 0], [], []>} : vector<32x128xbf16>, vector<16x128xbf16>, vector<32x16xf32> -> vector<32x16xf32>
    %cst_9 = arith.constant dense<0xFF800000> : vector<32xf32>
    %15 = vector.multi_reduction <maximumf>, %14, %cst_9 [1] : vector<32x16xf32> to vector<32xf32>
    %16 = vector.shape_cast %15 : vector<32xf32> to vector<32x1xf32>
    %17 = vector.broadcast %16 : vector<32x1xf32> to vector<32x16xf32>
    %18 = arith.subf %14, %17 : vector<32x16xf32>
    %19 = math.exp %18 : vector<32x16xf32>
    %cst_10 = arith.constant dense<0.000000e+00> : vector<32xf32>
    %20 = vector.multi_reduction <add>, %19, %cst_10 [1] : vector<32x16xf32> to vector<32xf32>
    %21 = vector.shape_cast %20 : vector<32xf32> to vector<32x1xf32>
    %22 = tpu.reciprocal %21 {approx = true} : vector<32x1xf32> -> vector<32x1xf32>
    %23 = vector.broadcast %22 : vector<32x1xf32> to vector<32x16xf32>
    %24 = arith.mulf %19, %23 : vector<32x16xf32>
    %25 = arith.truncf %24 : vector<32x16xf32> to vector<32x16xbf16>
    %cst_11 = arith.constant dense<0.000000e+00> : vector<32x128xf32>
    %26 = tpu.matmul %25, %7, %cst_11 {dimension_numbers = #tpu.dot_dimension_numbers<[1], [0], [0], [1], [0, 0, 1, 1], [], []>} : vector<32x16xbf16>, vector<16x128xbf16>, vector<32x128xf32> -> vector<32x128xf32>
    %27 = vector.extract_strided_slice %26 {offsets = [0, 0], sizes = [16, 128], strides = [1, 1]} : vector<32x128xf32> to vector<16x128xf32>
    %28 = vector.extract_strided_slice %26 {offsets = [16, 0], sizes = [16, 128], strides = [1, 1]} : vector<32x128xf32> to vector<16x128xf32>
    %29 = tpu.concatenate %27, %28 in 1 : vector<16x128xf32>, vector<16x128xf32> -> vector<16x256xf32>
    %c0_12 = arith.constant 0 : index
    %c0_13 = arith.constant 0 : index
    %c0_14 = arith.constant 0 : index
    %30 = vector.load %arg5[%c0_12, %c0_13, %c0_14] : memref<1x16x256xf32, #tpu.memory_space<vmem>>, vector<1x16x256xf32>
    %31 = vector.shape_cast %30 : vector<1x16x256xf32> to vector<16x256xf32>
    %32 = vector.shape_cast %29 : vector<16x256xf32> to vector<1x16x256xf32>
    tpu.vector_store %arg5[%c0_12, %c0_13, %c0_14], %32 {strides = array<i32>} : memref<1x16x256xf32, #tpu.memory_space<vmem>>, vector<1x16x256xf32>,
    return
  }
  func.func @transform_0(%arg0: i32, %arg1: i32) -> (i32, i32, i32) {
    %c0_i32 = arith.constant 0 : i32
    %c0_i32_0 = arith.constant 0 : i32
    return %arg0, %c0_i32, %arg1 : i32, i32, i32
  }
  func.func @transform_1(%arg0: i32, %arg1: i32) -> (i32, i32, i32) {
    %c4_i32 = arith.constant 4 : i32
    %0 = arith.addi %c4_i32, %arg1 : i32
    %c0_i32 = arith.constant 0 : i32
    %c0_i32_0 = arith.constant 0 : i32
    return %arg0, %c0_i32, %0 : i32, i32, i32
  }
  func.func @transform_2(%arg0: i32, %arg1: i32) -> (i32, i32, i32) {
    %c6_i32 = arith.constant 6 : i32
    %0 = arith.addi %c6_i32, %arg1 : i32
    %c0_i32 = arith.constant 0 : i32
    %c0_i32_0 = arith.constant 0 : i32
    return %arg0, %c0_i32, %0 : i32, i32, i32
  }
  func.func @transform_3(%arg0: i32, %arg1: i32) -> (i32, i32, i32) {
    %c0_i32 = arith.constant 0 : i32
    %c0_i32_0 = arith.constant 0 : i32
    return %arg0, %c0_i32, %arg1 : i32, i32, i32
  }
}

module attributes {stable_mosaic.version = 11 : i64} {
  func.func @_linear_kernel(%arg0: i32, %arg1: i32, %arg2: i32, %arg3: memref<32x512xf32, #tpu.memory_space<vmem>>, %arg4: memref<512x512xf32, #tpu.memory_space<vmem>>, %arg5: memref<1x512xf32, #tpu.memory_space<vmem>>, %arg6: memref<32x512xf32, #tpu.memory_space<vmem>>, %arg7: memref<32x512xf32, #tpu.memory_space<vmem>>) attributes {dimension_semantics = [#tpu.dimension_semantics<parallel>, #tpu.dimension_semantics<parallel>, #tpu.dimension_semantics<arbitrary>], iteration_bounds = array<i64: 1, 2, 1>, scalar_prefetch = 0 : i64, scratch_operands = 1 : i64, tpu.core_type = #tpu.core_type<tc>, window_params = [{transform_indices = @transform_0, window_bounds = array<i64: 32, 512>}, {transform_indices = @transform_1, window_bounds = array<i64: 512, 512>}, {transform_indices = @transform_2, window_bounds = array<i64: 1, 512>}, {transform_indices = @transform_3, window_bounds = array<i64: 32, 512>}]} {
    %c0_i32 = arith.constant 0 : i32
    %0 = arith.cmpi eq, %arg2, %c0_i32 : i32
    %1 = arith.extui %0 : i1 to i32
    %c0_i32_0 = arith.constant 0 : i32
    %2 = arith.cmpi ne, %1, %c0_i32_0 : i32
    scf.if %2 {
      %cst_10 = arith.constant 0.000000e+00 : f32
      %14 = vector.broadcast %cst_10 : f32 to vector<32x512xf32>
      %c0_11 = arith.constant 0 : index
      %c0_12 = arith.constant 0 : index
      %15 = vector.load %arg7[%c0_11, %c0_12] : memref<32x512xf32, #tpu.memory_space<vmem>>, vector<32x512xf32>
      tpu.vector_store %arg7[%c0_11, %c0_12], %14 {strides = array<i32>} : memref<32x512xf32, #tpu.memory_space<vmem>>, vector<32x512xf32>,
    } else {
    }
    %c0 = arith.constant 0 : index
    %c0_1 = arith.constant 0 : index
    %3 = vector.load %arg7[%c0, %c0_1] : memref<32x512xf32, #tpu.memory_space<vmem>>, vector<32x512xf32>
    %c0_2 = arith.constant 0 : index
    %c0_3 = arith.constant 0 : index
    %4 = vector.load %arg3[%c0_2, %c0_3] : memref<32x512xf32, #tpu.memory_space<vmem>>, vector<32x512xf32>
    %5 = arith.truncf %4 : vector<32x512xf32> to vector<32x512xbf16>
    %c0_4 = arith.constant 0 : index
    %c0_5 = arith.constant 0 : index
    %6 = vector.load %arg4[%c0_4, %c0_5] : memref<512x512xf32, #tpu.memory_space<vmem>>, vector<512x512xf32>
    %7 = arith.truncf %6 : vector<512x512xf32> to vector<512x512xbf16>
    %cst = arith.constant dense<0.000000e+00> : vector<32x512xf32>
    %8 = tpu.matmul %5, %7, %cst {dimension_numbers = #tpu.dot_dimension_numbers<[1], [0], [0], [1], [0, 0, 1, 1], [], []>} : vector<32x512xbf16>, vector<512x512xbf16>, vector<32x512xf32> -> vector<32x512xf32>
    %9 = arith.addf %3, %8 : vector<32x512xf32>
    %c0_6 = arith.constant 0 : index
    %c0_7 = arith.constant 0 : index
    %10 = vector.load %arg7[%c0_6, %c0_7] : memref<32x512xf32, #tpu.memory_space<vmem>>, vector<32x512xf32>
    tpu.vector_store %arg7[%c0_6, %c0_7], %9 {strides = array<i32>} : memref<32x512xf32, #tpu.memory_space<vmem>>, vector<32x512xf32>,
    %c0_i32_8 = arith.constant 0 : i32
    %11 = arith.cmpi eq, %arg2, %c0_i32_8 : i32
    %12 = arith.extui %11 : i1 to i32
    %c0_i32_9 = arith.constant 0 : i32
    %13 = arith.cmpi ne, %12, %c0_i32_9 : i32
    scf.if %13 {
      %c0_10 = arith.constant 0 : index
      %c0_11 = arith.constant 0 : index
      %14 = vector.load %arg7[%c0_10, %c0_11] : memref<32x512xf32, #tpu.memory_space<vmem>>, vector<32x512xf32>
      %c0_12 = arith.constant 0 : index
      %c0_13 = arith.constant 0 : index
      %15 = vector.load %arg5[%c0_12, %c0_13] : memref<1x512xf32, #tpu.memory_space<vmem>>, vector<1x512xf32>
      %16 = vector.broadcast %15 : vector<1x512xf32> to vector<32x512xf32>
      %17 = arith.addf %14, %16 : vector<32x512xf32>
      %c0_14 = arith.constant 0 : index
      %c0_15 = arith.constant 0 : index
      %18 = vector.load %arg6[%c0_14, %c0_15] : memref<32x512xf32, #tpu.memory_space<vmem>>, vector<32x512xf32>
      tpu.vector_store %arg6[%c0_14, %c0_15], %17 {strides = array<i32>} : memref<32x512xf32, #tpu.memory_space<vmem>>, vector<32x512xf32>,
    } else {
    }
    return
  }
  func.func @transform_0(%arg0: i32, %arg1: i32, %arg2: i32) -> (i32, i32) {
    %c0_i32 = arith.constant 0 : i32
    return %arg0, %arg2 : i32, i32
  }
  func.func @transform_1(%arg0: i32, %arg1: i32, %arg2: i32) -> (i32, i32) {
    %c0_i32 = arith.constant 0 : i32
    return %arg2, %arg1 : i32, i32
  }
  func.func @transform_2(%arg0: i32, %arg1: i32, %arg2: i32) -> (i32, i32) {
    %c0_i32 = arith.constant 0 : i32
    %c0_i32_0 = arith.constant 0 : i32
    return %c0_i32, %arg1 : i32, i32
  }
  func.func @transform_3(%arg0: i32, %arg1: i32, %arg2: i32) -> (i32, i32) {
    %c0_i32 = arith.constant 0 : i32
    return %arg0, %arg1 : i32, i32
  }
}

module attributes {stable_mosaic.version = 11 : i64} {
  func.func @_linear_kernel(%arg0: i32, %arg1: i32, %arg2: i32, %arg3: memref<32x512xf32, #tpu.memory_space<vmem>>, %arg4: memref<512x512xf32, #tpu.memory_space<vmem>>, %arg5: memref<1x512xf32, #tpu.memory_space<vmem>>, %arg6: memref<32x512xf32, #tpu.memory_space<vmem>>, %arg7: memref<32x512xf32, #tpu.memory_space<vmem>>) attributes {dimension_semantics = [#tpu.dimension_semantics<parallel>, #tpu.dimension_semantics<parallel>, #tpu.dimension_semantics<arbitrary>], iteration_bounds = array<i64: 1, 1, 1>, scalar_prefetch = 0 : i64, scratch_operands = 1 : i64, tpu.core_type = #tpu.core_type<tc>, window_params = [{transform_indices = @transform_0, window_bounds = array<i64: 32, 512>}, {transform_indices = @transform_1, window_bounds = array<i64: 512, 512>}, {transform_indices = @transform_2, window_bounds = array<i64: 1, 512>}, {transform_indices = @transform_3, window_bounds = array<i64: 32, 512>}]} {
    %c0_i32 = arith.constant 0 : i32
    %0 = arith.cmpi eq, %arg2, %c0_i32 : i32
    %1 = arith.extui %0 : i1 to i32
    %c0_i32_0 = arith.constant 0 : i32
    %2 = arith.cmpi ne, %1, %c0_i32_0 : i32
    scf.if %2 {
      %cst_10 = arith.constant 0.000000e+00 : f32
      %14 = vector.broadcast %cst_10 : f32 to vector<32x512xf32>
      %c0_11 = arith.constant 0 : index
      %c0_12 = arith.constant 0 : index
      %15 = vector.load %arg7[%c0_11, %c0_12] : memref<32x512xf32, #tpu.memory_space<vmem>>, vector<32x512xf32>
      tpu.vector_store %arg7[%c0_11, %c0_12], %14 {strides = array<i32>} : memref<32x512xf32, #tpu.memory_space<vmem>>, vector<32x512xf32>,
    } else {
    }
    %c0 = arith.constant 0 : index
    %c0_1 = arith.constant 0 : index
    %3 = vector.load %arg7[%c0, %c0_1] : memref<32x512xf32, #tpu.memory_space<vmem>>, vector<32x512xf32>
    %c0_2 = arith.constant 0 : index
    %c0_3 = arith.constant 0 : index
    %4 = vector.load %arg3[%c0_2, %c0_3] : memref<32x512xf32, #tpu.memory_space<vmem>>, vector<32x512xf32>
    %5 = arith.truncf %4 : vector<32x512xf32> to vector<32x512xbf16>
    %c0_4 = arith.constant 0 : index
    %c0_5 = arith.constant 0 : index
    %6 = vector.load %arg4[%c0_4, %c0_5] : memref<512x512xf32, #tpu.memory_space<vmem>>, vector<512x512xf32>
    %7 = arith.truncf %6 : vector<512x512xf32> to vector<512x512xbf16>
    %cst = arith.constant dense<0.000000e+00> : vector<32x512xf32>
    %8 = tpu.matmul %5, %7, %cst {dimension_numbers = #tpu.dot_dimension_numbers<[1], [0], [0], [1], [0, 0, 1, 1], [], []>} : vector<32x512xbf16>, vector<512x512xbf16>, vector<32x512xf32> -> vector<32x512xf32>
    %9 = arith.addf %3, %8 : vector<32x512xf32>
    %c0_6 = arith.constant 0 : index
    %c0_7 = arith.constant 0 : index
    %10 = vector.load %arg7[%c0_6, %c0_7] : memref<32x512xf32, #tpu.memory_space<vmem>>, vector<32x512xf32>
    tpu.vector_store %arg7[%c0_6, %c0_7], %9 {strides = array<i32>} : memref<32x512xf32, #tpu.memory_space<vmem>>, vector<32x512xf32>,
    %c0_i32_8 = arith.constant 0 : i32
    %11 = arith.cmpi eq, %arg2, %c0_i32_8 : i32
    %12 = arith.extui %11 : i1 to i32
    %c0_i32_9 = arith.constant 0 : i32
    %13 = arith.cmpi ne, %12, %c0_i32_9 : i32
    scf.if %13 {
      %c0_10 = arith.constant 0 : index
      %c0_11 = arith.constant 0 : index
      %14 = vector.load %arg7[%c0_10, %c0_11] : memref<32x512xf32, #tpu.memory_space<vmem>>, vector<32x512xf32>
      %c0_12 = arith.constant 0 : index
      %c0_13 = arith.constant 0 : index
      %15 = vector.load %arg5[%c0_12, %c0_13] : memref<1x512xf32, #tpu.memory_space<vmem>>, vector<1x512xf32>
      %16 = vector.broadcast %15 : vector<1x512xf32> to vector<32x512xf32>
      %17 = arith.addf %14, %16 : vector<32x512xf32>
      %c0_14 = arith.constant 0 : index
      %c0_15 = arith.constant 0 : index
      %18 = vector.load %arg6[%c0_14, %c0_15] : memref<32x512xf32, #tpu.memory_space<vmem>>, vector<32x512xf32>
      tpu.vector_store %arg6[%c0_14, %c0_15], %17 {strides = array<i32>} : memref<32x512xf32, #tpu.memory_space<vmem>>, vector<32x512xf32>,
    } else {
    }
    return
  }
  func.func @transform_0(%arg0: i32, %arg1: i32, %arg2: i32) -> (i32, i32) {
    %c0_i32 = arith.constant 0 : i32
    return %arg0, %arg2 : i32, i32
  }
  func.func @transform_1(%arg0: i32, %arg1: i32, %arg2: i32) -> (i32, i32) {
    %c0_i32 = arith.constant 0 : i32
    return %arg2, %arg1 : i32, i32
  }
  func.func @transform_2(%arg0: i32, %arg1: i32, %arg2: i32) -> (i32, i32) {
    %c0_i32 = arith.constant 0 : i32
    %c0_i32_0 = arith.constant 0 : i32
    return %c0_i32, %arg1 : i32, i32
  }
  func.func @transform_3(%arg0: i32, %arg1: i32, %arg2: i32) -> (i32, i32) {
    %c0_i32 = arith.constant 0 : i32
    return %arg0, %arg1 : i32, i32
  }
}

</mosaic_0001>

<bundles_post_ra>
// kernel: gqa_forward.4
= control target key start
LH: loop header
LB: loop body
LE: loop exit
PB: predicated region body
PF: predicated region fallthrough
CT: control target
= control target key end

     0   :  { %s1131_s0 = inlined_call_operand.vmem [shape: f32[2,16,1024], index: 0, kind: input, shape index: {}, may-alias: {0,1,2}]   ;;  %s1132_s1 = inlined_call_operand.vmem [shape: f32[2,16,1024], index: 1, kind: input, shape index: {}, may-alias: {0,1,2}]   ;;  %s1133_s2 = inlined_call_operand.vmem [shape: f32[2,16,1024], index: 2, kind: input, shape index: {}, may-alias: {0,1,2}]   ;;  %s1134_s3 = inlined_call_operand.vmem [shape: f32[2,16,512], index: 3, kind: output, shape index: {}]  }
   0x1   :  { %1137 = sst [smem:[#allocation8_spill]] %s1134_s3 }
   0x2   :  { %s927_s12 = smov 0   ;;  %s929_s13 = smov 0  }
   0x3   :  { %s931_s14 = smov 0   ;;  %s933_s15 = smov 0  }
   0x4   :  { %s935_s16 = smov 0   ;;  %s937_s17 = smov 0  }
   0x5   :  { %s939_s18 = smov 0   ;;  %s941_s19 = smov 0  }
   0x6   :  { %s943_s20 = smov 0   ;;  %s945_s21 = smov 0  }
   0x7   :  { %s947_s22 = smov 0  }
   0x8 LB: > { %s22_s24 = sadd.s32 1, %s897_s20  ;;  %s25_s25 = sadd.s32 1, %s901_s21  ;;  %s905_s22 = sphi %s947_s22, %s13_s22   ;;  %s901_s21 = sphi %s945_s21, %s1157_s21   ;;  %s897_s20 = sphi %s943_s20, %s1156_s20   ;;  %s893_s19 = sphi %s941_s19, %s1155_s19   ;;  %s889_s18 = sphi %s939_s18, %s1154_s18   ;;  %s885_s17 = sphi %s937_s17, %s1153_s17   ;;  %s881_s16 = sphi %s935_s16, %s1152_s16   ;;  %s877_s15 = sphi %s933_s15, %s1151_s15   ;;  %s873_s14 = sphi %s931_s14, %s1150_s14   ;;  %s869_s13 = sphi %s929_s13, %s1149_s13   ;;  %s865_s12 = sphi %s927_s12, %s1148_s12  }
   0x9   : > { %p23_p0 = scmp.ge.s32.totalorder %s22_s24, 2  ;;  %s34_s26 = sadd.s32 1, %s885_s17 }
   0xa   : > { %p41_p1 = scmp.ne.s32.totalorder %s885_s17, %s881_s16  ;;  %p42_p2 = scmp.eq.s32.totalorder %s905_s22, 0 }
   0xb   : > { %s1159_s24 = smov (%p23_p0, %s22_s24), 0  ;;  %s1161_s25 = smov (!%p23_p0, %s25_s25), %s901_s21 }
   0xc   : > { %1138 = sst [smem:[#allocation6_spill]] %s1159_s24  ;;  %s30_s27 = ssub.s32 %s897_s20, %s1159_s24 }
   0xd   : > { %p27_p3 = scmp.ge.s32.totalorder %s1161_s25, 2  ;;  %s57_s28 = sadd.s32 4, %s897_s20 }
   0xe   : > { %p1000_p4 = por %p42_p2, %p41_p1  ;;  %s58_s30 = sadd.s32 4, %s1159_s24 }
   0xf   : > { %s1163_s25 = smov (%p27_p3, %s1161_s25), 0  ;;  %s60_s4 = ssub.s32 %s57_s28, %s58_s30 }
  0x10   : > { %1140 = sst [smem:[#allocation7_spill]] %s1163_s25  ;;  %s64_s5 = sadd.s32 1, %s877_s15 }
  0x11   : > { %s29_s6 = ssub.s32 %s901_s21, %s1163_s25  ;;  %p71_p5 = scmp.ne.s32.totalorder %s877_s15, %s873_s14 }
  0x12   : > { %s31_s7 = sor.u32 %s30_s27, %s29_s6  ;;  %s61_s8 = sor.u32 %s60_s4, %s29_s6 }
  0x13   : > { %p32_p6 = scmp.eq.s32.totalorder %s31_s7, 0  ;;  %p62_p7 = scmp.eq.s32.totalorder %s61_s8, 0 }
  0x14   : > { %p1014_p8 = por %p71_p5, %p42_p2  ;;  %s87_s10 = sadd.s32 6, %s897_s20 }
  0x15   : > { %s1020_s11 = scalar_select %p32_p6, %s885_s17, %s34_s26  }
  0x16   : > { %s1023_s28 = scalar_select %p62_p7, %s877_s15, %s64_s5  }
  0x17   : > { %s88_s30 = sadd.s32 6, %s1159_s24  ;;  %s94_s23 = sadd.s32 1, %s869_s13 }
  0x18   : > { %s90_s25 = ssub.s32 %s87_s10, %s88_s30  ;;  %p101_p9 = scmp.ne.s32.totalorder %s869_s13, %s865_s12 }
  0x19   : > { %s91_s27 = sor.u32 %s90_s25, %s29_s6  ;;  %s1142_s3 = sadd.s32 4294967295, %s905_s22  }
  0x1a   : > { %p133_p10 = scmp.eq.s32.totalorder %s1142_s3, 3  ;;  %p92_p11 = scmp.eq.s32.totalorder %s91_s27, 0 }
  0x1b   : > { %p1033_p12 = por %p101_p9, %p42_p2  ;;  %p669_p0 = scmp.ge.s32.totalorder %s905_s22, 4 }
  0x1c   : > { %p1040_p13 = por %p133_p10, %p41_p1 }
  0x1d   : > { %s1045_s26 = scalar_select %p92_p11, %s869_s13, %s94_s23  }
  0x1e   : > { %155 = sbr.rel (%p669_p0) target bundleno = 62 (0x3e), region = 16 }
  0x25   : > { %158 = sbr.rel (!%p1000_p4) target bundleno = 46 (0x2e), region = 20  ;;  %s160_s3 = sand.u32 (%p1000_p4), 1, %s885_s17  }
  0x26   : > { %s671_s25 = sshll.u32 (%p1000_p4), %s897_s20, 1  ;;  %s670_s5 = sshll.u32 (%p1000_p4), %s160_s3, 5 }
  0x27   : > { %s672_s6 = sshll.u32 (%p1000_p4), %s901_s21, 4  ;;  %s162_s24 = scalar_lea.vmem (%p1000_p4), [#allocation2], %s670_s5 }
  0x28   : > { %s165_s8 = sadd.s32 (%p1000_p4), %s672_s6, %s671_s25 }
  0x29   : > { %s673_s10 = sshll.u32 (%p1000_p4), %s165_s8, 3 }
  0x2a   : > { %s167_s23 = scalar_lea.vmem (%p1000_p4), %s1131_s0, %s673_s10 }
  0x2b   : > { %v180_v0 = vld [vmem:[%s167_s23] sm:$0xff] (%p1000_p4)  ;;  %v182_v1 = vld [vmem:[%s167_s23 + $0x8] sm:$0xff] (%p1000_p4) }
  0x2c   : > { %v184_v2 = vld [vmem:[%s167_s23 + $0x40] sm:$0xff]  ;;  %181 = vst [vmem:[%s162_s24] sm:$0xff] %v180_v0  ;;  %183 = vst [vmem:[%s162_s24 + $0x8] sm:$0xff] %v182_v1  ;;  %v186_v3 = vld [vmem:[%s167_s23 + $0x48] sm:$0xff] }
  0x2d   : > { %185 = vst [vmem:[%s162_s24 + $0x10] sm:$0xff] %v184_v2  ;;  %187 = vst [vmem:[%s162_s24 + $0x18] sm:$0xff] %v186_v3 }
  0x2e PF: > { %193 = sbr.rel (!%p1014_p8) target bundleno = 54 (0x36), region = 43  ;;  %s195_s29 = sand.u32 (%p1014_p8), 1, %s877_s15  }
  0x2f   : > { %s675_s3 = sshll.u32 (%p1014_p8), %s901_s21, 4  ;;  %s674_s25 = sshll.u32 (%p1014_p8), %s195_s29, 4 }
  0x30   : > { %s572_s6 = sadd.s32 (%p1014_p8), %s897_s20, %s675_s3  ;;  %s197_s27 = scalar_lea.vmem (%p1014_p8), [#allocation3], %s674_s25 }
  0x31   : > { %s676_s8 = sshll.u32 (%p1014_p8), %s572_s6, 3 }
  0x32   : > { %s574_s5 = scalar_lea.vmem (%p1014_p8), %s1132_s1, %s676_s8 }
  0x33   : > { %v677_v4 = vld [vmem:[%s574_s5 + $0x20] sm:$0xff] (%p1014_p8) }
  0x34   : > { %v678_v5 = vld [vmem:[%s574_s5 + $0x60] sm:$0xff] (%p1014_p8)  ;;  %233 = vst [vmem:[%s197_s27] sm:$0xff] (%p1014_p8), %v677_v4 }
  0x35   : > { %235 = vst [vmem:[%s197_s27 + $0x8] sm:$0xff] %v678_v5 }
  0x36 PF: > { %241 = sbr.rel (!%p1033_p12) target bundleno = 62 (0x3e), region = 81  ;;  %s243_s24 = sand.u32 (%p1033_p12), 1, %s869_s13  }
  0x37   : > { %s680_s9 = sshll.u32 (%p1033_p12), %s901_s21, 4  ;;  %s679_s23 = sshll.u32 (%p1033_p12), %s243_s24, 4 }
  0x38   : > { %s579_s29 = sadd.s32 (%p1033_p12), %s897_s20, %s680_s9  ;;  %s245_s25 = scalar_lea.vmem (%p1033_p12), [#allocation4], %s679_s23 }
  0x39   : > { %s681_s3 = sshll.u32 (%p1033_p12), %s579_s29, 3 }
  0x3a   : > { %s581_s8 = scalar_lea.vmem (%p1033_p12), %s1133_s2, %s681_s3 }
  0x3b   : > { %v682_v6 = vld [vmem:[%s581_s8 + $0x30] sm:$0xff] (%p1033_p12) }
  0x3c   : > { %v683_v7 = vld [vmem:[%s581_s8 + $0x70] sm:$0xff] (%p1033_p12)  ;;  %281 = vst [vmem:[%s245_s25] sm:$0xff] (%p1033_p12), %v682_v6 }
  0x3d   : > { %283 = vst [vmem:[%s245_s25 + $0x8] sm:$0xff] %v683_v7 }
  0x3e PF: > { %p684_p1 = scmp.ge.s32.totalorder %s905_s22, 1  ;;  %p288_p2 = scmp.lt.s32.totalorder %s905_s22, 5 }
  0x40   : > { %p289_p3 = pnand %p684_p1, %p288_p2 }
  0x41   : > { %s302_s4 = sand.u32 (!%p289_p3), 1, %s873_s14   ;;  %s295_s30 = sand.u32 (!%p289_p3), 1, %s881_s16   ;;  %vm409_vm0 = vcmask (!%p289_p3), 130048  }
  0x42   : > { %292 = sbr.rel (%p289_p3) target bundleno = 840 (0x348), region = 119  ;;  %s686_s5 = sshll.u32 (!%p289_p3), %s302_s4, 4 }
  0x43   : > { %s1076_s27 = sshll.u32 (!%p289_p3), %s295_s30, 5  ;;  %s304_s24 = scalar_lea.vmem (!%p289_p3), [#allocation3], %s686_s5 }
  0x44   : > { %v348_v8 = vld [vmem:[%s304_s24] sm:$0xff] (!%p289_p3)  ;;  %v349_v9 = vld [vmem:[%s304_s24 + $0x8] sm:$0xff] (!%p289_p3)  ;;  %s297_s9 = scalar_lea.vmem (!%p289_p3), [#allocation2], %s1076_s27  ;;  %s309_s14 = sand.u32 (!%p289_p3), 1, %s865_s12  }
  0x45   : > { %v344_v10 = vld [vmem:[%s297_s9] sm:$0xff] (!%p289_p3)  ;;  %v350_v11 = vpack.c.bf16 (!%p289_p3), %v349_v9, %v348_v8  ;;  %v346_v12 = vld [vmem:[%s297_s9 + $0x10] sm:$0xff] (!%p289_p3)  ;;  %v345_v14 = vld [vmem:[%s297_s9 + $0x8] sm:$0xff] (!%p289_p3)  ;;  %s687_s16 = sshll.u32 (!%p289_p3), %s309_s14, 4  ;;  %s338_s12 = scalar_lea.vmem (!%p289_p3), [#allocation5], %s1076_s27 }
  0x46   : > { %v354_v13 = vmul.f32 (!%p289_p3), 0.088388346, %v344_v10  ;;  %v347_v15 = vld [vmem:[%s297_s9 + $0x18] sm:$0xff] (!%p289_p3)  ;;  %v355_v16 = vmul.f32 (!%p289_p3), 0.088388346, %v346_v12  ;;  %s311_s23 = scalar_lea.vmem (!%p289_p3), [#allocation4], %s687_s16 }
  0x47   : > { %703 = vmatprep.subr.bf16.mxu0 (!%p289_p3), %v350_v11  ;;  %v356_v17 = vmul.f32 (!%p289_p3), 0.088388346, %v345_v14  ;;  %v357_v18 = vmul.f32 (!%p289_p3), 0.088388346, %v347_v15  ;;  %v351_v49 = vld [vmem:[%s311_s23] sm:$0xff] (!%p289_p3)  ;;  %v352_v50 = vld [vmem:[%s311_s23 + $0x8] sm:$0xff] (!%p289_p3) }
  0x48   : > { %704 = vmatpush3.bf16.xpose.msra.mxu0 (!%p289_p3), %v350_v11  ;;  %v358_v19 = vpack.c.bf16 (!%p289_p3), %v355_v16, %v354_v13  ;;  %v353_v51 = vpack.c.bf16 (!%p289_p3), %v352_v50, %v351_v49 }
  0x49   : > { %v359_v20 = vpack.c.bf16 %v357_v18, %v356_v17  ;;  %s692_s29 = sshll.u32 (%p1040_p13), %s889_s18, 1  ;;  %s693_s3 = sshll.u32 (%p1040_p13), %s893_s19, 3 }
  0x4a   : > { %705 = vmatprep.mubr.bf16.mxu0 %v358_v19  ;;  %709 = vmatprep.subr.bf16.mxu1 %v353_v51  ;;  %s524_s6 = sadd.s32 (%p1040_p13), %s693_s3, %s692_s29  ;;  %s1145_s4 = sld [smem:[#allocation8_spill]] (%p1040_p13) }
  0x4b   : > { %710 = vmatpush3.bf16.msra.mxu1 %v353_v51  ;;  %s694_s10 = sshll.u32 (%p1040_p13), %s524_s6, 3 }
  0x4f   : > { %706 = vmatmul.mubr.bf16.vlgmr.msra.gmra.mrb[0].mxu0 %v359_v20 }
  0x50   : > { %s526_s30 = scalar_lea.vmem (%p1040_p13), %s1145_s4, %s694_s10 }
 0x122   : > { %v707_v21 = vpop.f32.mrb[0].mxu0 }
 0x123   : > { %v394_v22 = vpop.f32.mrb[1].mxu0  ;;  %v416_v23 = vsel %vm409_vm0, %v707_v21, -inf }
 0x124   : > { %417 = vmax.xlane.f32.xlu1 %v416_v23  ;;  %v708_v24 = vpop.f32.mrb[2].mxu0  ;;  %v410_v25 = vsel %vm409_vm0, %v394_v22, -inf }
 0x125   : > { %411 = vmax.xlane.f32.xlu0 %v410_v25  ;;  %v397_v26 = vpop.f32.mrb[3].mxu0  ;;  %v419_v27 = vsel %vm409_vm0, %v708_v24, -inf }
 0x126   : > { %v413_v28 = vsel %vm409_vm0, %v397_v26, -inf }
 0x128   : > { %420 = vmax.xlane.f32.xlu1 %v419_v27 }
 0x129   : > { %414 = vmax.xlane.f32.xlu0 %v413_v28 }
 0x1b1   : > { %v418_v29 = vpop.xlane.xlu1 %417 }
 0x1b2   : > { %v424_v30 = vsub.f32 %v707_v21, %v418_v29  ;;  %v412_v31 = vpop.xlane.xlu0 %411 }
 0x1b3   : > { %v422_v32 = vsub.f32 %v394_v22, %v412_v31 }
 0x1b4   : > { %v430_v33 = vmul.f32 1.442695, %v424_v30 }
 0x1b5   : > { %v426_v34 = vmul.f32 1.442695, %v422_v32  ;;  %v421_v35 = vpop.xlane.xlu1 %420 }
 0x1b6   : > { %v425_v36 = vsub.f32 %v708_v24, %v421_v35  ;;  %v415_v37 = vpop.xlane.xlu0 %414 }
 0x1b7   : > { %803 = vpow2.f32 %v426_v34  ;;  %v423_v38 = vsub.f32 %v397_v26, %v415_v37 }
 0x1b8   : > { %805 = vpow2.f32 %v430_v33  ;;  %v432_v39 = vmul.f32 1.442695, %v425_v36 }
 0x1b9   : > { %v428_v40 = vmul.f32 1.442695, %v423_v38 }
 0x1bb   : > { %807 = vpow2.f32 %v428_v40 }
 0x1bc   : > { %809 = vpow2.f32 %v432_v39 }
 0x1c1   : > { %v804_v41 = vpop.eup %803 }
 0x1c2   : > { %v434_v42 = vsel %vm409_vm0, %v804_v41, 0.0  ;;  %v806_v43 = vpop.eup %805 }
 0x1c3   : > { %435 = vadd.xlane.f32.xlu0 %v434_v42  ;;  %v440_v45 = vsel %vm409_vm0, %v806_v43, 0.0 }
 0x1c5   : > { %v808_v44 = vpop.eup %807 }
 0x1c6   : > { %v437_v46 = vsel %vm409_vm0, %v808_v44, 0.0  ;;  %v810_v47 = vpop.eup %809 }
 0x1c7   : > { %441 = vadd.xlane.f32.xlu0 %v440_v45  ;;  %438 = vadd.xlane.f32.xlu1 %v437_v46  ;;  %v443_v48 = vsel %vm409_vm0, %v810_v47, 0.0 }
 0x1cb   : > { %444 = vadd.xlane.f32.xlu1 %v443_v48 }
 0x250   : > { %v436_v52 = vpop.xlane.xlu0 %435 }
 0x251   : > { %811 = vrcp.f32 %v436_v52 }
 0x254   : > { %v439_v53 = vpop.xlane.xlu1 %438  ;;  %v442_v54 = vpop.xlane.xlu0 %441 }
 0x255   : > { %813 = vrcp.f32 %v439_v53 }
 0x256   : > { %815 = vrcp.f32 %v442_v54 }
 0x258   : > { %v445_v55 = vpop.xlane.xlu1 %444 }
 0x259   : > { %817 = vrcp.f32 %v445_v55 }
 0x25b   : > { %v812_v56 = vpop.eup %811 }
 0x25c   : > { %v450_v58 = vmul.f32 %v812_v56, %v804_v41 }
 0x25f   : > { %v814_v57 = vpop.eup %813 }
 0x260   : > { %v451_v59 = vmul.f32 %v814_v57, %v808_v44  ;;  %v816_v60 = vpop.eup %815 }
 0x261   : > { %v452_v63 = vmul.f32 %v816_v60, %v806_v43 }
 0x262   : > { %v454_v61 = vpack.c.bf16 %v451_v59, %v450_v58 }
 0x263   : > { %v818_v62 = vpop.eup %817 }
 0x264   : > { %711 = vmatprep.mubr.msk.bf16.mxu1 %vm409_vm0, %v454_v61  ;;  %v453_v0 = vmul.f32 %v818_v62, %v810_v47 }
 0x266   : > { %v455_v1 = vpack.c.bf16 %v453_v0, %v452_v63 }
 0x268   : > { %712 = vmatmul.mubr.msk.bf16.vlgmr.msra.gmra.mrb[0].mxu1 %vm409_vm0, %v455_v1 }
 0x339   : > { %521 = sbr.rel (!%p1040_p13) target bundleno = 840 (0x348), region = 135 }
 0x33b   : > { %v713_v2 = vpop.f32.mrb[0].mxu1 }
 0x33c   : > { %512 = vst [vmem:[%s338_s12 + $0x8] sm:$0xff] %v713_v2  ;;  %v496_v3 = vpop.f32.mrb[1].mxu1 }
 0x33d   : > { %511 = vst [vmem:[%s338_s12] sm:$0xff] %v496_v3  ;;  %v714_v4 = vpop.f32.mrb[2].mxu1 }
 0x33e   : > { %514 = vst [vmem:[%s338_s12 + $0x18] sm:$0xff] %v714_v4  ;;  %v499_v5 = vpop.f32.mrb[3].mxu1 }
 0x33f   : > { %513 = vst [vmem:[%s338_s12 + $0x10] sm:$0xff] %v499_v5 }
 0x343   : > { %v541_v7 = vld [vmem:[%s338_s12 + $0x8] sm:$0xff] }
 0x344   : > { %v539_v6 = vld [vmem:[%s338_s12] sm:$0xff]  ;;  %542 = vst [vmem:[%s526_s30 + $0x8] sm:$0xff] %v541_v7 }
 0x345   : > { %v545_v9 = vld [vmem:[%s338_s12 + $0x18] sm:$0xff]  ;;  %540 = vst [vmem:[%s526_s30] sm:$0xff] %v539_v6 }
 0x346   : > { %v543_v8 = vld [vmem:[%s338_s12 + $0x10] sm:$0xff]  ;;  %546 = vst [vmem:[%s526_s30 + $0x28] sm:$0xff] %v545_v9 }
 0x347   : > { %544 = vst [vmem:[%s526_s30 + $0x20] sm:$0xff] %v543_v8 }
 0x348 PF: > { %s13_s22 = sadd.s32 1, %s905_s22   ;;  %s1146_s7 = sld [smem:[#allocation6_spill]] }
 0x349   : > { %p10_p4 = scmp.ge.s32.totalorder %s13_s22, 6   ;;  %s1147_s5 = sld [smem:[#allocation7_spill]] }
 0x34a   : > { %s1148_s12 = smov %s869_s13  ;;  %s1149_s13 = smov %s1045_s26 }
 0x34b   : > { %s1150_s14 = smov %s877_s15  ;;  %s1151_s15 = smov %s1023_s28 }
 0x34c   : > { %s1152_s16 = smov %s885_s17  ;;  %s1153_s17 = smov %s1020_s11 }
 0x34d   : > { %s1154_s18 = smov %s897_s20  ;;  %s1155_s19 = smov %s901_s21 }
 0x34e   : > { %s1156_s20 = smov %s1146_s7  ;;  %12 = sbr.rel (!%p10_p4) target bundleno = 8 (0x8), region = 205 }
 0x34f   : > { %s1157_s21 = smov %s1147_s5 }

// kernel: gqa_forward.3
= control target key start
LH: loop header
LB: loop body
LE: loop exit
PB: predicated region body
PF: predicated region fallthrough
CT: control target
= control target key end

     0   :  { %s1845_s12 = smov 0   ;;  %s1847_s13 = smov 0   ;;  %s2781_s0 = inlined_call_operand.vmem [shape: f32[32,512], index: 0, kind: input, shape index: {}]   ;;  %s2782_s1 = inlined_call_operand.vmem [shape: f32[512,1024], index: 1, kind: input, shape index: {}]   ;;  %s2783_s2 = inlined_call_operand.vmem [shape: f32[1,1024], index: 2, kind: input, shape index: {}]   ;;  %s2784_s3 = inlined_call_operand.vmem [shape: f32[32,1024], index: 3, kind: output, shape index: {}]  }
   0x1   :  { %s1849_s14 = smov 0   ;;  %s1851_s15 = smov 0  }
   0x2   :  { %s1853_s16 = smov 0  }
   0x3 LB: > { %s28_s17 = sadd.s32 1, %s1819_s15  ;;  %s1710_s18 = sadd.s32 4294967295, %s1823_s16   ;;  %s1823_s16 = sphi %s1853_s16, %s13_s16   ;;  %s1819_s15 = sphi %s1851_s15, %s2789_s15   ;;  %s1815_s14 = sphi %s1849_s14, %s2788_s14   ;;  %s1811_s13 = sphi %s1847_s13, %s2787_s13   ;;  %s1807_s12 = sphi %s1845_s12, %s2786_s12  }
   0x4   : > { %p30_p0 = scmp.ge.s32.totalorder %s28_s17, 2  ;;  %p76_p1 = scmp.ne.s32.totalorder %s1811_s13, %s1807_s12 }
   0x5   : > { %p77_p2 = scmp.eq.s32.totalorder %s1823_s16, 0  ;;  %p134_p4 = scmp.eq.s32.totalorder %s1710_s18, 1 }
   0x6   : > { %s2791_s17 = smov (%p30_p0, %s28_s17), 0  ;;  %s69_s20 = sadd.s32 1, %s1811_s13 }
   0x7   : > { %p78_p3 = por %p77_p2, %p76_p1  ;;  %s65_s19 = ssub.s32 %s1819_s15, %s2791_s17 }
   0x8   : > { %p67_p5 = scmp.eq.s32.totalorder %s65_s19, 0  ;;  %p1880_p6 = por %p134_p4, %p76_p1 }
   0x9   : > { %p1714_p7 = scmp.ge.s32.totalorder %s1823_s16, 2 }
   0xa   : > { %s1885_s22 = scalar_select %p67_p5, %s1811_s13, %s69_s20  }
   0xb   : > { %171 = sbr.rel (%p1714_p7) target bundleno = 150 (0x96), region = 20 }
  0x12   : > { %174 = sbr.rel (!%p78_p3) target bundleno = 150 (0x96), region = 24  ;;  %s176_s23 = sand.u32 (%p78_p3), 1, %s1811_s13  }
  0x13   : > { %s1727_s24 = sshll.u32 (%p78_p3), %s1819_s15, 5  ;;  %s1715_s25 = sshll.u32 (%p78_p3), %s176_s23, 11 }
  0x14   : > { %s1893_s28 = scalar_lea.vmem (%p78_p3), %s2782_s1, %s1727_s24  ;;  %s1898_s29 = scalar_lea.vmem (%p78_p3), [#allocation3], %s1715_s25 }
  0x15   : > { %v197_v0 = vld [vmem:[%s1893_s28] sm:$0xff] (%p78_p3)  ;;  %v199_v1 = vld [vmem:[%s1893_s28 + $0x8] sm:$0xff] (%p78_p3)  ;;  %v201_v2 = vld [vmem:[%s1893_s28 + $0x10] sm:$0xff] (%p78_p3) }
  0x16   : > { %198 = vst [vmem:[%s1898_s29] sm:$0xff] (%p78_p3), %v197_v0  ;;  %200 = vst [vmem:[%s1898_s29 + $0x8] sm:$0xff] (%p78_p3), %v199_v1  ;;  %v203_v3 = vld [vmem:[%s1893_s28 + $0x18] sm:$0xff] (%p78_p3)  ;;  %v205_v4 = vld [vmem:[%s1893_s28 + $0x40] sm:$0xff] (%p78_p3) }
  0x17   : > { %202 = vst [vmem:[%s1898_s29 + $0x10] sm:$0xff] (%p78_p3), %v201_v2  ;;  %v207_v5 = vld [vmem:[%s1893_s28 + $0x48] sm:$0xff] (%p78_p3)  ;;  %204 = vst [vmem:[%s1898_s29 + $0x18] sm:$0xff] (%p78_p3), %v203_v3  ;;  %v209_v6 = vld [vmem:[%s1893_s28 + $0x50] sm:$0xff] (%p78_p3) }
  0x18   : > { %206 = vst [vmem:[%s1898_s29 + $0x20] sm:$0xff] (%p78_p3), %v205_v4  ;;  %208 = vst [vmem:[%s1898_s29 + $0x28] sm:$0xff] (%p78_p3), %v207_v5  ;;  %v211_v7 = vld [vmem:[%s1893_s28 + $0x58] sm:$0xff] (%p78_p3)  ;;  %v213_v8 = vld [vmem:[%s1893_s28 + $0x80] sm:$0xff] (%p78_p3) }
  0x19   : > { %210 = vst [vmem:[%s1898_s29 + $0x30] sm:$0xff] %v209_v6  ;;  %212 = vst [vmem:[%s1898_s29 + $0x38] sm:$0xff] %v211_v7  ;;  %v215_v9 = vld [vmem:[%s1893_s28 + $0x88] sm:$0xff]  ;;  %v217_v10 = vld [vmem:[%s1893_s28 + $0x90] sm:$0xff] }
  0x1a   : > { %214 = vst [vmem:[%s1898_s29 + $0x40] sm:$0xff] %v213_v8  ;;  %v219_v11 = vld [vmem:[%s1893_s28 + $0x98] sm:$0xff]  ;;  %216 = vst [vmem:[%s1898_s29 + $0x48] sm:$0xff] %v215_v9  ;;  %v221_v12 = vld [vmem:[%s1893_s28 + $0xc0] sm:$0xff] }
  0x1b   : > { %218 = vst [vmem:[%s1898_s29 + $0x50] sm:$0xff] %v217_v10  ;;  %220 = vst [vmem:[%s1898_s29 + $0x58] sm:$0xff] %v219_v11  ;;  %v223_v13 = vld [vmem:[%s1893_s28 + $0xc8] sm:$0xff]  ;;  %v225_v14 = vld [vmem:[%s1893_s28 + $0xd0] sm:$0xff] }
  0x1c   : > { %222 = vst [vmem:[%s1898_s29 + $0x60] sm:$0xff] %v221_v12  ;;  %224 = vst [vmem:[%s1898_s29 + $0x68] sm:$0xff] %v223_v13  ;;  %v227_v15 = vld [vmem:[%s1893_s28 + $0xd8] sm:$0xff]  ;;  %v229_v16 = vld [vmem:[%s1893_s28 + $0x100] sm:$0xff] }
  0x1d   : > { %226 = vst [vmem:[%s1898_s29 + $0x70] sm:$0xff] %v225_v14  ;;  %v231_v17 = vld [vmem:[%s1893_s28 + $0x108] sm:$0xff]  ;;  %228 = vst [vmem:[%s1898_s29 + $0x78] sm:$0xff] %v227_v15  ;;  %v233_v18 = vld [vmem:[%s1893_s28 + $0x110] sm:$0xff] }
  0x1e   : > { %230 = vst [vmem:[%s1898_s29 + $0x80] sm:$0xff] %v229_v16  ;;  %232 = vst [vmem:[%s1898_s29 + $0x88] sm:$0xff] %v231_v17  ;;  %v235_v19 = vld [vmem:[%s1893_s28 + $0x118] sm:$0xff]  ;;  %v237_v20 = vld [vmem:[%s1893_s28 + $0x140] sm:$0xff] }
  0x1f   : > { %234 = vst [vmem:[%s1898_s29 + $0x90] sm:$0xff] %v233_v18  ;;  %236 = vst [vmem:[%s1898_s29 + $0x98] sm:$0xff] %v235_v19  ;;  %v239_v21 = vld [vmem:[%s1893_s28 + $0x148] sm:$0xff]  ;;  %v241_v22 = vld [vmem:[%s1893_s28 + $0x150] sm:$0xff] }
  0x20   : > { %238 = vst [vmem:[%s1898_s29 + $0xa0] sm:$0xff] %v237_v20  ;;  %v243_v23 = vld [vmem:[%s1893_s28 + $0x158] sm:$0xff]  ;;  %240 = vst [vmem:[%s1898_s29 + $0xa8] sm:$0xff] %v239_v21  ;;  %v245_v24 = vld [vmem:[%s1893_s28 + $0x180] sm:$0xff] }
  0x21   : > { %242 = vst [vmem:[%s1898_s29 + $0xb0] sm:$0xff] %v241_v22  ;;  %244 = vst [vmem:[%s1898_s29 + $0xb8] sm:$0xff] %v243_v23  ;;  %v247_v25 = vld [vmem:[%s1893_s28 + $0x188] sm:$0xff]  ;;  %v249_v26 = vld [vmem:[%s1893_s28 + $0x190] sm:$0xff] }
  0x22   : > { %246 = vst [vmem:[%s1898_s29 + $0xc0] sm:$0xff] %v245_v24  ;;  %248 = vst [vmem:[%s1898_s29 + $0xc8] sm:$0xff] %v247_v25  ;;  %v251_v27 = vld [vmem:[%s1893_s28 + $0x198] sm:$0xff]  ;;  %v253_v28 = vld [vmem:[%s1893_s28 + $0x1c0] sm:$0xff] }
  0x23   : > { %250 = vst [vmem:[%s1898_s29 + $0xd0] sm:$0xff] %v249_v26  ;;  %v255_v29 = vld [vmem:[%s1893_s28 + $0x1c8] sm:$0xff]  ;;  %252 = vst [vmem:[%s1898_s29 + $0xd8] sm:$0xff] %v251_v27  ;;  %v257_v30 = vld [vmem:[%s1893_s28 + $0x1d0] sm:$0xff] }
  0x24   : > { %254 = vst [vmem:[%s1898_s29 + $0xe0] sm:$0xff] %v253_v28  ;;  %256 = vst [vmem:[%s1898_s29 + $0xe8] sm:$0xff] %v255_v29  ;;  %v259_v31 = vld [vmem:[%s1893_s28 + $0x1d8] sm:$0xff]  ;;  %v261_v32 = vld [vmem:[%s1893_s28 + $0x200] sm:$0xff] }
  0x25   : > { %258 = vst [vmem:[%s1898_s29 + $0xf0] sm:$0xff] %v257_v30  ;;  %260 = vst [vmem:[%s1898_s29 + $0xf8] sm:$0xff] %v259_v31  ;;  %v263_v33 = vld [vmem:[%s1893_s28 + $0x208] sm:$0xff]  ;;  %v265_v34 = vld [vmem:[%s1893_s28 + $0x210] sm:$0xff] }
  0x26   : > { %262 = vst [vmem:[%s1898_s29 + $0x100] sm:$0xff] %v261_v32  ;;  %v267_v35 = vld [vmem:[%s1893_s28 + $0x218] sm:$0xff]  ;;  %264 = vst [vmem:[%s1898_s29 + $0x108] sm:$0xff] %v263_v33  ;;  %v269_v36 = vld [vmem:[%s1893_s28 + $0x240] sm:$0xff] }
  0x27   : > { %266 = vst [vmem:[%s1898_s29 + $0x110] sm:$0xff] %v265_v34  ;;  %268 = vst [vmem:[%s1898_s29 + $0x118] sm:$0xff] %v267_v35  ;;  %v271_v37 = vld [vmem:[%s1893_s28 + $0x248] sm:$0xff]  ;;  %v273_v38 = vld [vmem:[%s1893_s28 + $0x250] sm:$0xff] }
  0x28   : > { %270 = vst [vmem:[%s1898_s29 + $0x120] sm:$0xff] %v269_v36  ;;  %272 = vst [vmem:[%s1898_s29 + $0x128] sm:$0xff] %v271_v37  ;;  %v275_v39 = vld [vmem:[%s1893_s28 + $0x258] sm:$0xff]  ;;  %v277_v40 = vld [vmem:[%s1893_s28 + $0x280] sm:$0xff] }
  0x29   : > { %274 = vst [vmem:[%s1898_s29 + $0x130] sm:$0xff] %v273_v38  ;;  %v279_v41 = vld [vmem:[%s1893_s28 + $0x288] sm:$0xff]  ;;  %276 = vst [vmem:[%s1898_s29 + $0x138] sm:$0xff] %v275_v39  ;;  %v281_v42 = vld [vmem:[%s1893_s28 + $0x290] sm:$0xff] }
  0x2a   : > { %278 = vst [vmem:[%s1898_s29 + $0x140] sm:$0xff] %v277_v40  ;;  %280 = vst [vmem:[%s1898_s29 + $0x148] sm:$0xff] %v279_v41  ;;  %v283_v43 = vld [vmem:[%s1893_s28 + $0x298] sm:$0xff]  ;;  %v285_v44 = vld [vmem:[%s1893_s28 + $0x2c0] sm:$0xff] }
  0x2b   : > { %282 = vst [vmem:[%s1898_s29 + $0x150] sm:$0xff] %v281_v42  ;;  %284 = vst [vmem:[%s1898_s29 + $0x158] sm:$0xff] %v283_v43  ;;  %v287_v45 = vld [vmem:[%s1893_s28 + $0x2c8] sm:$0xff]  ;;  %v289_v46 = vld [vmem:[%s1893_s28 + $0x2d0] sm:$0xff] }
  0x2c   : > { %286 = vst [vmem:[%s1898_s29 + $0x160] sm:$0xff] %v285_v44  ;;  %v291_v47 = vld [vmem:[%s1893_s28 + $0x2d8] sm:$0xff]  ;;  %288 = vst [vmem:[%s1898_s29 + $0x168] sm:$0xff] %v287_v45  ;;  %v293_v48 = vld [vmem:[%s1893_s28 + $0x300] sm:$0xff] }
  0x2d   : > { %290 = vst [vmem:[%s1898_s29 + $0x170] sm:$0xff] %v289_v46  ;;  %292 = vst [vmem:[%s1898_s29 + $0x178] sm:$0xff] %v291_v47  ;;  %v295_v49 = vld [vmem:[%s1893_s28 + $0x308] sm:$0xff]  ;;  %v297_v50 = vld [vmem:[%s1893_s28 + $0x310] sm:$0xff] }
  0x2e   : > { %294 = vst [vmem:[%s1898_s29 + $0x180] sm:$0xff] %v293_v48  ;;  %296 = vst [vmem:[%s1898_s29 + $0x188] sm:$0xff] %v295_v49  ;;  %v299_v51 = vld [vmem:[%s1893_s28 + $0x318] sm:$0xff]  ;;  %v301_v52 = vld [vmem:[%s1893_s28 + $0x340] sm:$0xff] }
  0x2f   : > { %298 = vst [vmem:[%s1898_s29 + $0x190] sm:$0xff] %v297_v50  ;;  %v303_v53 = vld [vmem:[%s1893_s28 + $0x348] sm:$0xff]  ;;  %300 = vst [vmem:[%s1898_s29 + $0x198] sm:$0xff] %v299_v51  ;;  %v305_v54 = vld [vmem:[%s1893_s28 + $0x350] sm:$0xff] }
  0x30   : > { %302 = vst [vmem:[%s1898_s29 + $0x1a0] sm:$0xff] %v301_v52  ;;  %304 = vst [vmem:[%s1898_s29 + $0x1a8] sm:$0xff] %v303_v53  ;;  %v307_v55 = vld [vmem:[%s1893_s28 + $0x358] sm:$0xff]  ;;  %v309_v56 = vld [vmem:[%s1893_s28 + $0x380] sm:$0xff] }
  0x31   : > { %306 = vst [vmem:[%s1898_s29 + $0x1b0] sm:$0xff] %v305_v54  ;;  %308 = vst [vmem:[%s1898_s29 + $0x1b8] sm:$0xff] %v307_v55  ;;  %v311_v57 = vld [vmem:[%s1893_s28 + $0x388] sm:$0xff]  ;;  %v313_v58 = vld [vmem:[%s1893_s28 + $0x390] sm:$0xff] }
  0x32   : > { %310 = vst [vmem:[%s1898_s29 + $0x1c0] sm:$0xff] %v309_v56  ;;  %v315_v59 = vld [vmem:[%s1893_s28 + $0x398] sm:$0xff]  ;;  %312 = vst [vmem:[%s1898_s29 + $0x1c8] sm:$0xff] %v311_v57  ;;  %v317_v60 = vld [vmem:[%s1893_s28 + $0x3c0] sm:$0xff] }
  0x33   : > { %314 = vst [vmem:[%s1898_s29 + $0x1d0] sm:$0xff] %v313_v58  ;;  %316 = vst [vmem:[%s1898_s29 + $0x1d8] sm:$0xff] %v315_v59  ;;  %v319_v61 = vld [vmem:[%s1893_s28 + $0x3c8] sm:$0xff]  ;;  %v321_v62 = vld [vmem:[%s1893_s28 + $0x3d0] sm:$0xff] }
  0x34   : > { %318 = vst [vmem:[%s1898_s29 + $0x1e0] sm:$0xff] %v317_v60  ;;  %320 = vst [vmem:[%s1898_s29 + $0x1e8] sm:$0xff] %v319_v61  ;;  %v323_v63 = vld [vmem:[%s1893_s28 + $0x3d8] sm:$0xff]  ;;  %v325_v0 = vld [vmem:[%s1893_s28 + $0x400] sm:$0xff] }
  0x35   : > { %322 = vst [vmem:[%s1898_s29 + $0x1f0] sm:$0xff] %v321_v62  ;;  %v327_v1 = vld [vmem:[%s1893_s28 + $0x408] sm:$0xff]  ;;  %324 = vst [vmem:[%s1898_s29 + $0x1f8] sm:$0xff] %v323_v63  ;;  %v329_v2 = vld [vmem:[%s1893_s28 + $0x410] sm:$0xff] }
  0x36   : > { %326 = vst [vmem:[%s1898_s29 + $0x200] sm:$0xff] %v325_v0  ;;  %328 = vst [vmem:[%s1898_s29 + $0x208] sm:$0xff] %v327_v1  ;;  %v331_v3 = vld [vmem:[%s1893_s28 + $0x418] sm:$0xff]  ;;  %v333_v4 = vld [vmem:[%s1893_s28 + $0x440] sm:$0xff] }
  0x37   : > { %330 = vst [vmem:[%s1898_s29 + $0x210] sm:$0xff] %v329_v2  ;;  %332 = vst [vmem:[%s1898_s29 + $0x218] sm:$0xff] %v331_v3  ;;  %v335_v5 = vld [vmem:[%s1893_s28 + $0x448] sm:$0xff]  ;;  %v337_v6 = vld [vmem:[%s1893_s28 + $0x450] sm:$0xff] }
  0x38   : > { %334 = vst [vmem:[%s1898_s29 + $0x220] sm:$0xff] %v333_v4  ;;  %v339_v7 = vld [vmem:[%s1893_s28 + $0x458] sm:$0xff]  ;;  %336 = vst [vmem:[%s1898_s29 + $0x228] sm:$0xff] %v335_v5  ;;  %v341_v8 = vld [vmem:[%s1893_s28 + $0x480] sm:$0xff] }
  0x39   : > { %338 = vst [vmem:[%s1898_s29 + $0x230] sm:$0xff] %v337_v6  ;;  %340 = vst [vmem:[%s1898_s29 + $0x238] sm:$0xff] %v339_v7  ;;  %v343_v9 = vld [vmem:[%s1893_s28 + $0x488] sm:$0xff]  ;;  %v345_v10 = vld [vmem:[%s1893_s28 + $0x490] sm:$0xff] }
  0x3a   : > { %342 = vst [vmem:[%s1898_s29 + $0x240] sm:$0xff] %v341_v8  ;;  %344 = vst [vmem:[%s1898_s29 + $0x248] sm:$0xff] %v343_v9  ;;  %v347_v11 = vld [vmem:[%s1893_s28 + $0x498] sm:$0xff]  ;;  %v349_v12 = vld [vmem:[%s1893_s28 + $0x4c0] sm:$0xff] }
  0x3b   : > { %346 = vst [vmem:[%s1898_s29 + $0x250] sm:$0xff] %v345_v10  ;;  %v351_v13 = vld [vmem:[%s1893_s28 + $0x4c8] sm:$0xff]  ;;  %348 = vst [vmem:[%s1898_s29 + $0x258] sm:$0xff] %v347_v11  ;;  %v353_v14 = vld [vmem:[%s1893_s28 + $0x4d0] sm:$0xff] }
  0x3c   : > { %350 = vst [vmem:[%s1898_s29 + $0x260] sm:$0xff] %v349_v12  ;;  %352 = vst [vmem:[%s1898_s29 + $0x268] sm:$0xff] %v351_v13  ;;  %v355_v15 = vld [vmem:[%s1893_s28 + $0x4d8] sm:$0xff]  ;;  %v357_v16 = vld [vmem:[%s1893_s28 + $0x500] sm:$0xff] }
  0x3d   : > { %354 = vst [vmem:[%s1898_s29 + $0x270] sm:$0xff] %v353_v14  ;;  %356 = vst [vmem:[%s1898_s29 + $0x278] sm:$0xff] %v355_v15  ;;  %v359_v17 = vld [vmem:[%s1893_s28 + $0x508] sm:$0xff]  ;;  %v361_v18 = vld [vmem:[%s1893_s28 + $0x510] sm:$0xff] }
  0x3e   : > { %358 = vst [vmem:[%s1898_s29 + $0x280] sm:$0xff] %v357_v16  ;;  %v363_v19 = vld [vmem:[%s1893_s28 + $0x518] sm:$0xff]  ;;  %360 = vst [vmem:[%s1898_s29 + $0x288] sm:$0xff] %v359_v17  ;;  %v365_v20 = vld [vmem:[%s1893_s28 + $0x540] sm:$0xff] }
  0x3f   : > { %362 = vst [vmem:[%s1898_s29 + $0x290] sm:$0xff] %v361_v18  ;;  %364 = vst [vmem:[%s1898_s29 + $0x298] sm:$0xff] %v363_v19  ;;  %v367_v21 = vld [vmem:[%s1893_s28 + $0x548] sm:$0xff]  ;;  %v369_v22 = vld [vmem:[%s1893_s28 + $0x550] sm:$0xff] }
  0x40   : > { %366 = vst [vmem:[%s1898_s29 + $0x2a0] sm:$0xff] %v365_v20  ;;  %368 = vst [vmem:[%s1898_s29 + $0x2a8] sm:$0xff] %v367_v21  ;;  %v371_v23 = vld [vmem:[%s1893_s28 + $0x558] sm:$0xff]  ;;  %v373_v24 = vld [vmem:[%s1893_s28 + $0x580] sm:$0xff] }
  0x41   : > { %370 = vst [vmem:[%s1898_s29 + $0x2b0] sm:$0xff] %v369_v22  ;;  %v375_v25 = vld [vmem:[%s1893_s28 + $0x588] sm:$0xff]  ;;  %372 = vst [vmem:[%s1898_s29 + $0x2b8] sm:$0xff] %v371_v23  ;;  %v377_v26 = vld [vmem:[%s1893_s28 + $0x590] sm:$0xff] }
  0x42   : > { %374 = vst [vmem:[%s1898_s29 + $0x2c0] sm:$0xff] %v373_v24  ;;  %376 = vst [vmem:[%s1898_s29 + $0x2c8] sm:$0xff] %v375_v25  ;;  %v379_v27 = vld [vmem:[%s1893_s28 + $0x598] sm:$0xff]  ;;  %v381_v28 = vld [vmem:[%s1893_s28 + $0x5c0] sm:$0xff] }
  0x43   : > { %378 = vst [vmem:[%s1898_s29 + $0x2d0] sm:$0xff] %v377_v26  ;;  %380 = vst [vmem:[%s1898_s29 + $0x2d8] sm:$0xff] %v379_v27  ;;  %v383_v29 = vld [vmem:[%s1893_s28 + $0x5c8] sm:$0xff]  ;;  %v385_v30 = vld [vmem:[%s1893_s28 + $0x5d0] sm:$0xff] }
  0x44   : > { %382 = vst [vmem:[%s1898_s29 + $0x2e0] sm:$0xff] %v381_v28  ;;  %v387_v31 = vld [vmem:[%s1893_s28 + $0x5d8] sm:$0xff]  ;;  %384 = vst [vmem:[%s1898_s29 + $0x2e8] sm:$0xff] %v383_v29  ;;  %v389_v32 = vld [vmem:[%s1893_s28 + $0x600] sm:$0xff] }
  0x45   : > { %386 = vst [vmem:[%s1898_s29 + $0x2f0] sm:$0xff] %v385_v30  ;;  %388 = vst [vmem:[%s1898_s29 + $0x2f8] sm:$0xff] %v387_v31  ;;  %v391_v33 = vld [vmem:[%s1893_s28 + $0x608] sm:$0xff]  ;;  %v393_v34 = vld [vmem:[%s1893_s28 + $0x610] sm:$0xff] }
  0x46   : > { %390 = vst [vmem:[%s1898_s29 + $0x300] sm:$0xff] %v389_v32  ;;  %392 = vst [vmem:[%s1898_s29 + $0x308] sm:$0xff] %v391_v33  ;;  %v395_v35 = vld [vmem:[%s1893_s28 + $0x618] sm:$0xff]  ;;  %v397_v36 = vld [vmem:[%s1893_s28 + $0x640] sm:$0xff] }
  0x47   : > { %394 = vst [vmem:[%s1898_s29 + $0x310] sm:$0xff] %v393_v34  ;;  %v399_v37 = vld [vmem:[%s1893_s28 + $0x648] sm:$0xff]  ;;  %396 = vst [vmem:[%s1898_s29 + $0x318] sm:$0xff] %v395_v35  ;;  %v401_v38 = vld [vmem:[%s1893_s28 + $0x650] sm:$0xff] }
  0x48   : > { %398 = vst [vmem:[%s1898_s29 + $0x320] sm:$0xff] %v397_v36  ;;  %400 = vst [vmem:[%s1898_s29 + $0x328] sm:$0xff] %v399_v37  ;;  %v403_v39 = vld [vmem:[%s1893_s28 + $0x658] sm:$0xff]  ;;  %v405_v40 = vld [vmem:[%s1893_s28 + $0x680] sm:$0xff] }
  0x49   : > { %402 = vst [vmem:[%s1898_s29 + $0x330] sm:$0xff] %v401_v38  ;;  %404 = vst [vmem:[%s1898_s29 + $0x338] sm:$0xff] %v403_v39  ;;  %v407_v41 = vld [vmem:[%s1893_s28 + $0x688] sm:$0xff]  ;;  %v409_v42 = vld [vmem:[%s1893_s28 + $0x690] sm:$0xff] }
  0x4a   : > { %406 = vst [vmem:[%s1898_s29 + $0x340] sm:$0xff] %v405_v40  ;;  %v411_v43 = vld [vmem:[%s1893_s28 + $0x698] sm:$0xff]  ;;  %408 = vst [vmem:[%s1898_s29 + $0x348] sm:$0xff] %v407_v41  ;;  %v413_v44 = vld [vmem:[%s1893_s28 + $0x6c0] sm:$0xff] }
  0x4b   : > { %410 = vst [vmem:[%s1898_s29 + $0x350] sm:$0xff] %v409_v42  ;;  %412 = vst [vmem:[%s1898_s29 + $0x358] sm:$0xff] %v411_v43  ;;  %v415_v45 = vld [vmem:[%s1893_s28 + $0x6c8] sm:$0xff]  ;;  %v417_v46 = vld [vmem:[%s1893_s28 + $0x6d0] sm:$0xff] }
  0x4c   : > { %414 = vst [vmem:[%s1898_s29 + $0x360] sm:$0xff] %v413_v44  ;;  %416 = vst [vmem:[%s1898_s29 + $0x368] sm:$0xff] %v415_v45  ;;  %v419_v47 = vld [vmem:[%s1893_s28 + $0x6d8] sm:$0xff]  ;;  %v421_v48 = vld [vmem:[%s1893_s28 + $0x700] sm:$0xff] }
  0x4d   : > { %418 = vst [vmem:[%s1898_s29 + $0x370] sm:$0xff] %v417_v46  ;;  %v423_v49 = vld [vmem:[%s1893_s28 + $0x708] sm:$0xff]  ;;  %420 = vst [vmem:[%s1898_s29 + $0x378] sm:$0xff] %v419_v47  ;;  %v425_v50 = vld [vmem:[%s1893_s28 + $0x710] sm:$0xff] }
  0x4e   : > { %422 = vst [vmem:[%s1898_s29 + $0x380] sm:$0xff] %v421_v48  ;;  %424 = vst [vmem:[%s1898_s29 + $0x388] sm:$0xff] %v423_v49  ;;  %v427_v51 = vld [vmem:[%s1893_s28 + $0x718] sm:$0xff]  ;;  %v429_v52 = vld [vmem:[%s1893_s28 + $0x740] sm:$0xff] }
  0x4f   : > { %426 = vst [vmem:[%s1898_s29 + $0x390] sm:$0xff] %v425_v50  ;;  %428 = vst [vmem:[%s1898_s29 + $0x398] sm:$0xff] %v427_v51  ;;  %v431_v53 = vld [vmem:[%s1893_s28 + $0x748] sm:$0xff]  ;;  %v433_v54 = vld [vmem:[%s1893_s28 + $0x750] sm:$0xff] }
  0x50   : > { %430 = vst [vmem:[%s1898_s29 + $0x3a0] sm:$0xff] %v429_v52  ;;  %v435_v55 = vld [vmem:[%s1893_s28 + $0x758] sm:$0xff]  ;;  %432 = vst [vmem:[%s1898_s29 + $0x3a8] sm:$0xff] %v431_v53  ;;  %v437_v56 = vld [vmem:[%s1893_s28 + $0x780] sm:$0xff] }
  0x51   : > { %434 = vst [vmem:[%s1898_s29 + $0x3b0] sm:$0xff] %v433_v54  ;;  %436 = vst [vmem:[%s1898_s29 + $0x3b8] sm:$0xff] %v435_v55  ;;  %v439_v57 = vld [vmem:[%s1893_s28 + $0x788] sm:$0xff]  ;;  %v441_v58 = vld [vmem:[%s1893_s28 + $0x790] sm:$0xff] }
  0x52   : > { %438 = vst [vmem:[%s1898_s29 + $0x3c0] sm:$0xff] %v437_v56  ;;  %440 = vst [vmem:[%s1898_s29 + $0x3c8] sm:$0xff] %v439_v57  ;;  %v443_v59 = vld [vmem:[%s1893_s28 + $0x798] sm:$0xff]  ;;  %v445_v60 = vld [vmem:[%s1893_s28 + $0x7c0] sm:$0xff] }
  0x53   : > { %442 = vst [vmem:[%s1898_s29 + $0x3d0] sm:$0xff] %v441_v58  ;;  %v447_v61 = vld [vmem:[%s1893_s28 + $0x7c8] sm:$0xff]  ;;  %444 = vst [vmem:[%s1898_s29 + $0x3d8] sm:$0xff] %v443_v59  ;;  %v449_v62 = vld [vmem:[%s1893_s28 + $0x7d0] sm:$0xff] }
  0x54   : > { %446 = vst [vmem:[%s1898_s29 + $0x3e0] sm:$0xff] %v445_v60  ;;  %448 = vst [vmem:[%s1898_s29 + $0x3e8] sm:$0xff] %v447_v61  ;;  %v451_v63 = vld [vmem:[%s1893_s28 + $0x7d8] sm:$0xff]  ;;  %v453_v0 = vld [vmem:[%s1893_s28 + $0x800] sm:$0xff] }
  0x55   : > { %450 = vst [vmem:[%s1898_s29 + $0x3f0] sm:$0xff] %v449_v62  ;;  %452 = vst [vmem:[%s1898_s29 + $0x3f8] sm:$0xff] %v451_v63  ;;  %v455_v1 = vld [vmem:[%s1893_s28 + $0x808] sm:$0xff]  ;;  %v457_v2 = vld [vmem:[%s1893_s28 + $0x810] sm:$0xff] }
  0x56   : > { %454 = vst [vmem:[%s1898_s29 + $0x400] sm:$0xff] %v453_v0  ;;  %v459_v3 = vld [vmem:[%s1893_s28 + $0x818] sm:$0xff]  ;;  %456 = vst [vmem:[%s1898_s29 + $0x408] sm:$0xff] %v455_v1  ;;  %v461_v4 = vld [vmem:[%s1893_s28 + $0x840] sm:$0xff] }
  0x57   : > { %458 = vst [vmem:[%s1898_s29 + $0x410] sm:$0xff] %v457_v2  ;;  %460 = vst [vmem:[%s1898_s29 + $0x418] sm:$0xff] %v459_v3  ;;  %v463_v5 = vld [vmem:[%s1893_s28 + $0x848] sm:$0xff]  ;;  %v465_v6 = vld [vmem:[%s1893_s28 + $0x850] sm:$0xff] }
  0x58   : > { %462 = vst [vmem:[%s1898_s29 + $0x420] sm:$0xff] %v461_v4  ;;  %464 = vst [vmem:[%s1898_s29 + $0x428] sm:$0xff] %v463_v5  ;;  %v467_v7 = vld [vmem:[%s1893_s28 + $0x858] sm:$0xff]  ;;  %v469_v8 = vld [vmem:[%s1893_s28 + $0x880] sm:$0xff] }
  0x59   : > { %466 = vst [vmem:[%s1898_s29 + $0x430] sm:$0xff] %v465_v6  ;;  %v471_v9 = vld [vmem:[%s1893_s28 + $0x888] sm:$0xff]  ;;  %468 = vst [vmem:[%s1898_s29 + $0x438] sm:$0xff] %v467_v7  ;;  %v473_v10 = vld [vmem:[%s1893_s28 + $0x890] sm:$0xff] }
  0x5a   : > { %470 = vst [vmem:[%s1898_s29 + $0x440] sm:$0xff] %v469_v8  ;;  %472 = vst [vmem:[%s1898_s29 + $0x448] sm:$0xff] %v471_v9  ;;  %v475_v11 = vld [vmem:[%s1893_s28 + $0x898] sm:$0xff]  ;;  %v477_v12 = vld [vmem:[%s1893_s28 + $0x8c0] sm:$0xff] }
  0x5b   : > { %474 = vst [vmem:[%s1898_s29 + $0x450] sm:$0xff] %v473_v10  ;;  %476 = vst [vmem:[%s1898_s29 + $0x458] sm:$0xff] %v475_v11  ;;  %v479_v13 = vld [vmem:[%s1893_s28 + $0x8c8] sm:$0xff]  ;;  %v481_v14 = vld [vmem:[%s1893_s28 + $0x8d0] sm:$0xff] }
  0x5c   : > { %478 = vst [vmem:[%s1898_s29 + $0x460] sm:$0xff] %v477_v12  ;;  %v483_v15 = vld [vmem:[%s1893_s28 + $0x8d8] sm:$0xff]  ;;  %480 = vst [vmem:[%s1898_s29 + $0x468] sm:$0xff] %v479_v13  ;;  %v485_v16 = vld [vmem:[%s1893_s28 + $0x900] sm:$0xff] }
  0x5d   : > { %482 = vst [vmem:[%s1898_s29 + $0x470] sm:$0xff] %v481_v14  ;;  %484 = vst [vmem:[%s1898_s29 + $0x478] sm:$0xff] %v483_v15  ;;  %v487_v17 = vld [vmem:[%s1893_s28 + $0x908] sm:$0xff]  ;;  %v489_v18 = vld [vmem:[%s1893_s28 + $0x910] sm:$0xff] }
  0x5e   : > { %486 = vst [vmem:[%s1898_s29 + $0x480] sm:$0xff] %v485_v16  ;;  %488 = vst [vmem:[%s1898_s29 + $0x488] sm:$0xff] %v487_v17  ;;  %v491_v19 = vld [vmem:[%s1893_s28 + $0x918] sm:$0xff]  ;;  %v493_v20 = vld [vmem:[%s1893_s28 + $0x940] sm:$0xff] }
  0x5f   : > { %490 = vst [vmem:[%s1898_s29 + $0x490] sm:$0xff] %v489_v18  ;;  %v495_v21 = vld [vmem:[%s1893_s28 + $0x948] sm:$0xff]  ;;  %492 = vst [vmem:[%s1898_s29 + $0x498] sm:$0xff] %v491_v19  ;;  %v497_v22 = vld [vmem:[%s1893_s28 + $0x950] sm:$0xff] }
  0x60   : > { %494 = vst [vmem:[%s1898_s29 + $0x4a0] sm:$0xff] %v493_v20  ;;  %496 = vst [vmem:[%s1898_s29 + $0x4a8] sm:$0xff] %v495_v21  ;;  %v499_v23 = vld [vmem:[%s1893_s28 + $0x958] sm:$0xff]  ;;  %v501_v24 = vld [vmem:[%s1893_s28 + $0x980] sm:$0xff] }
  0x61   : > { %498 = vst [vmem:[%s1898_s29 + $0x4b0] sm:$0xff] %v497_v22  ;;  %500 = vst [vmem:[%s1898_s29 + $0x4b8] sm:$0xff] %v499_v23  ;;  %v503_v25 = vld [vmem:[%s1893_s28 + $0x988] sm:$0xff]  ;;  %v505_v26 = vld [vmem:[%s1893_s28 + $0x990] sm:$0xff] }
  0x62   : > { %502 = vst [vmem:[%s1898_s29 + $0x4c0] sm:$0xff] %v501_v24  ;;  %v507_v27 = vld [vmem:[%s1893_s28 + $0x998] sm:$0xff]  ;;  %504 = vst [vmem:[%s1898_s29 + $0x4c8] sm:$0xff] %v503_v25  ;;  %v509_v28 = vld [vmem:[%s1893_s28 + $0x9c0] sm:$0xff] }
  0x63   : > { %506 = vst [vmem:[%s1898_s29 + $0x4d0] sm:$0xff] %v505_v26  ;;  %508 = vst [vmem:[%s1898_s29 + $0x4d8] sm:$0xff] %v507_v27  ;;  %v511_v29 = vld [vmem:[%s1893_s28 + $0x9c8] sm:$0xff]  ;;  %v513_v30 = vld [vmem:[%s1893_s28 + $0x9d0] sm:$0xff] }
  0x64   : > { %510 = vst [vmem:[%s1898_s29 + $0x4e0] sm:$0xff] %v509_v28  ;;  %512 = vst [vmem:[%s1898_s29 + $0x4e8] sm:$0xff] %v511_v29  ;;  %v515_v31 = vld [vmem:[%s1893_s28 + $0x9d8] sm:$0xff]  ;;  %v517_v32 = vld [vmem:[%s1893_s28 + $0xa00] sm:$0xff] }
  0x65   : > { %514 = vst [vmem:[%s1898_s29 + $0x4f0] sm:$0xff] %v513_v30  ;;  %v519_v33 = vld [vmem:[%s1893_s28 + $0xa08] sm:$0xff]  ;;  %516 = vst [vmem:[%s1898_s29 + $0x4f8] sm:$0xff] %v515_v31  ;;  %v521_v34 = vld [vmem:[%s1893_s28 + $0xa10] sm:$0xff] }
  0x66   : > { %518 = vst [vmem:[%s1898_s29 + $0x500] sm:$0xff] %v517_v32  ;;  %520 = vst [vmem:[%s1898_s29 + $0x508] sm:$0xff] %v519_v33  ;;  %v523_v35 = vld [vmem:[%s1893_s28 + $0xa18] sm:$0xff]  ;;  %v525_v36 = vld [vmem:[%s1893_s28 + $0xa40] sm:$0xff] }
  0x67   : > { %522 = vst [vmem:[%s1898_s29 + $0x510] sm:$0xff] %v521_v34  ;;  %524 = vst [vmem:[%s1898_s29 + $0x518] sm:$0xff] %v523_v35  ;;  %v527_v37 = vld [vmem:[%s1893_s28 + $0xa48] sm:$0xff]  ;;  %v529_v38 = vld [vmem:[%s1893_s28 + $0xa50] sm:$0xff] }
  0x68   : > { %526 = vst [vmem:[%s1898_s29 + $0x520] sm:$0xff] %v525_v36  ;;  %v531_v39 = vld [vmem:[%s1893_s28 + $0xa58] sm:$0xff]  ;;  %528 = vst [vmem:[%s1898_s29 + $0x528] sm:$0xff] %v527_v37  ;;  %v533_v40 = vld [vmem:[%s1893_s28 + $0xa80] sm:$0xff] }
  0x69   : > { %530 = vst [vmem:[%s1898_s29 + $0x530] sm:$0xff] %v529_v38  ;;  %532 = vst [vmem:[%s1898_s29 + $0x538] sm:$0xff] %v531_v39  ;;  %v535_v41 = vld [vmem:[%s1893_s28 + $0xa88] sm:$0xff]  ;;  %v537_v42 = vld [vmem:[%s1893_s28 + $0xa90] sm:$0xff] }
  0x6a   : > { %534 = vst [vmem:[%s1898_s29 + $0x540] sm:$0xff] %v533_v40  ;;  %536 = vst [vmem:[%s1898_s29 + $0x548] sm:$0xff] %v535_v41  ;;  %v539_v43 = vld [vmem:[%s1893_s28 + $0xa98] sm:$0xff]  ;;  %v541_v44 = vld [vmem:[%s1893_s28 + $0xac0] sm:$0xff] }
  0x6b   : > { %538 = vst [vmem:[%s1898_s29 + $0x550] sm:$0xff] %v537_v42  ;;  %v543_v45 = vld [vmem:[%s1893_s28 + $0xac8] sm:$0xff]  ;;  %540 = vst [vmem:[%s1898_s29 + $0x558] sm:$0xff] %v539_v43  ;;  %v545_v46 = vld [vmem:[%s1893_s28 + $0xad0] sm:$0xff] }
  0x6c   : > { %542 = vst [vmem:[%s1898_s29 + $0x560] sm:$0xff] %v541_v44  ;;  %544 = vst [vmem:[%s1898_s29 + $0x568] sm:$0xff] %v543_v45  ;;  %v547_v47 = vld [vmem:[%s1893_s28 + $0xad8] sm:$0xff]  ;;  %v549_v48 = vld [vmem:[%s1893_s28 + $0xb00] sm:$0xff] }
  0x6d   : > { %546 = vst [vmem:[%s1898_s29 + $0x570] sm:$0xff] %v545_v46  ;;  %548 = vst [vmem:[%s1898_s29 + $0x578] sm:$0xff] %v547_v47  ;;  %v551_v49 = vld [vmem:[%s1893_s28 + $0xb08] sm:$0xff]  ;;  %v553_v50 = vld [vmem:[%s1893_s28 + $0xb10] sm:$0xff] }
  0x6e   : > { %550 = vst [vmem:[%s1898_s29 + $0x580] sm:$0xff] %v549_v48  ;;  %v555_v51 = vld [vmem:[%s1893_s28 + $0xb18] sm:$0xff]  ;;  %552 = vst [vmem:[%s1898_s29 + $0x588] sm:$0xff] %v551_v49  ;;  %v557_v52 = vld [vmem:[%s1893_s28 + $0xb40] sm:$0xff] }
  0x6f   : > { %554 = vst [vmem:[%s1898_s29 + $0x590] sm:$0xff] %v553_v50  ;;  %556 = vst [vmem:[%s1898_s29 + $0x598] sm:$0xff] %v555_v51  ;;  %v559_v53 = vld [vmem:[%s1893_s28 + $0xb48] sm:$0xff]  ;;  %v561_v54 = vld [vmem:[%s1893_s28 + $0xb50] sm:$0xff] }
  0x70   : > { %558 = vst [vmem:[%s1898_s29 + $0x5a0] sm:$0xff] %v557_v52  ;;  %560 = vst [vmem:[%s1898_s29 + $0x5a8] sm:$0xff] %v559_v53  ;;  %v563_v55 = vld [vmem:[%s1893_s28 + $0xb58] sm:$0xff]  ;;  %v565_v56 = vld [vmem:[%s1893_s28 + $0xb80] sm:$0xff] }
  0x71   : > { %562 = vst [vmem:[%s1898_s29 + $0x5b0] sm:$0xff] %v561_v54  ;;  %v567_v57 = vld [vmem:[%s1893_s28 + $0xb88] sm:$0xff]  ;;  %564 = vst [vmem:[%s1898_s29 + $0x5b8] sm:$0xff] %v563_v55  ;;  %v569_v58 = vld [vmem:[%s1893_s28 + $0xb90] sm:$0xff] }
  0x72   : > { %566 = vst [vmem:[%s1898_s29 + $0x5c0] sm:$0xff] %v565_v56  ;;  %568 = vst [vmem:[%s1898_s29 + $0x5c8] sm:$0xff] %v567_v57  ;;  %v571_v59 = vld [vmem:[%s1893_s28 + $0xb98] sm:$0xff]  ;;  %v573_v60 = vld [vmem:[%s1893_s28 + $0xbc0] sm:$0xff] }
  0x73   : > { %570 = vst [vmem:[%s1898_s29 + $0x5d0] sm:$0xff] %v569_v58  ;;  %572 = vst [vmem:[%s1898_s29 + $0x5d8] sm:$0xff] %v571_v59  ;;  %v575_v61 = vld [vmem:[%s1893_s28 + $0xbc8] sm:$0xff]  ;;  %v577_v62 = vld [vmem:[%s1893_s28 + $0xbd0] sm:$0xff] }
  0x74   : > { %574 = vst [vmem:[%s1898_s29 + $0x5e0] sm:$0xff] %v573_v60  ;;  %v579_v63 = vld [vmem:[%s1893_s28 + $0xbd8] sm:$0xff]  ;;  %576 = vst [vmem:[%s1898_s29 + $0x5e8] sm:$0xff] %v575_v61  ;;  %v581_v0 = vld [vmem:[%s1893_s28 + $0xc00] sm:$0xff] }
  0x75   : > { %578 = vst [vmem:[%s1898_s29 + $0x5f0] sm:$0xff] %v577_v62  ;;  %580 = vst [vmem:[%s1898_s29 + $0x5f8] sm:$0xff] %v579_v63  ;;  %v583_v1 = vld [vmem:[%s1893_s28 + $0xc08] sm:$0xff]  ;;  %v585_v2 = vld [vmem:[%s1893_s28 + $0xc10] sm:$0xff] }
  0x76   : > { %582 = vst [vmem:[%s1898_s29 + $0x600] sm:$0xff] %v581_v0  ;;  %584 = vst [vmem:[%s1898_s29 + $0x608] sm:$0xff] %v583_v1  ;;  %v587_v3 = vld [vmem:[%s1893_s28 + $0xc18] sm:$0xff]  ;;  %v589_v4 = vld [vmem:[%s1893_s28 + $0xc40] sm:$0xff] }
  0x77   : > { %586 = vst [vmem:[%s1898_s29 + $0x610] sm:$0xff] %v585_v2  ;;  %v591_v5 = vld [vmem:[%s1893_s28 + $0xc48] sm:$0xff]  ;;  %588 = vst [vmem:[%s1898_s29 + $0x618] sm:$0xff] %v587_v3  ;;  %v593_v6 = vld [vmem:[%s1893_s28 + $0xc50] sm:$0xff] }
  0x78   : > { %590 = vst [vmem:[%s1898_s29 + $0x620] sm:$0xff] %v589_v4  ;;  %592 = vst [vmem:[%s1898_s29 + $0x628] sm:$0xff] %v591_v5  ;;  %v595_v7 = vld [vmem:[%s1893_s28 + $0xc58] sm:$0xff]  ;;  %v597_v8 = vld [vmem:[%s1893_s28 + $0xc80] sm:$0xff] }
  0x79   : > { %594 = vst [vmem:[%s1898_s29 + $0x630] sm:$0xff] %v593_v6  ;;  %596 = vst [vmem:[%s1898_s29 + $0x638] sm:$0xff] %v595_v7  ;;  %v599_v9 = vld [vmem:[%s1893_s28 + $0xc88] sm:$0xff]  ;;  %v601_v10 = vld [vmem:[%s1893_s28 + $0xc90] sm:$0xff] }
  0x7a   : > { %598 = vst [vmem:[%s1898_s29 + $0x640] sm:$0xff] %v597_v8  ;;  %v603_v11 = vld [vmem:[%s1893_s28 + $0xc98] sm:$0xff]  ;;  %600 = vst [vmem:[%s1898_s29 + $0x648] sm:$0xff] %v599_v9  ;;  %v605_v12 = vld [vmem:[%s1893_s28 + $0xcc0] sm:$0xff] }
  0x7b   : > { %602 = vst [vmem:[%s1898_s29 + $0x650] sm:$0xff] %v601_v10  ;;  %604 = vst [vmem:[%s1898_s29 + $0x658] sm:$0xff] %v603_v11  ;;  %v607_v13 = vld [vmem:[%s1893_s28 + $0xcc8] sm:$0xff]  ;;  %v609_v14 = vld [vmem:[%s1893_s28 + $0xcd0] sm:$0xff] }
  0x7c   : > { %606 = vst [vmem:[%s1898_s29 + $0x660] sm:$0xff] %v605_v12  ;;  %608 = vst [vmem:[%s1898_s29 + $0x668] sm:$0xff] %v607_v13  ;;  %v611_v15 = vld [vmem:[%s1893_s28 + $0xcd8] sm:$0xff]  ;;  %v613_v16 = vld [vmem:[%s1893_s28 + $0xd00] sm:$0xff] }
  0x7d   : > { %610 = vst [vmem:[%s1898_s29 + $0x670] sm:$0xff] %v609_v14  ;;  %v615_v17 = vld [vmem:[%s1893_s28 + $0xd08] sm:$0xff]  ;;  %612 = vst [vmem:[%s1898_s29 + $0x678] sm:$0xff] %v611_v15  ;;  %v617_v18 = vld [vmem:[%s1893_s28 + $0xd10] sm:$0xff] }
  0x7e   : > { %614 = vst [vmem:[%s1898_s29 + $0x680] sm:$0xff] %v613_v16  ;;  %616 = vst [vmem:[%s1898_s29 + $0x688] sm:$0xff] %v615_v17  ;;  %v619_v19 = vld [vmem:[%s1893_s28 + $0xd18] sm:$0xff]  ;;  %v621_v20 = vld [vmem:[%s1893_s28 + $0xd40] sm:$0xff] }
  0x7f   : > { %618 = vst [vmem:[%s1898_s29 + $0x690] sm:$0xff] %v617_v18  ;;  %620 = vst [vmem:[%s1898_s29 + $0x698] sm:$0xff] %v619_v19  ;;  %v623_v21 = vld [vmem:[%s1893_s28 + $0xd48] sm:$0xff]  ;;  %v625_v22 = vld [vmem:[%s1893_s28 + $0xd50] sm:$0xff] }
  0x80   : > { %622 = vst [vmem:[%s1898_s29 + $0x6a0] sm:$0xff] %v621_v20  ;;  %v627_v23 = vld [vmem:[%s1893_s28 + $0xd58] sm:$0xff]  ;;  %624 = vst [vmem:[%s1898_s29 + $0x6a8] sm:$0xff] %v623_v21  ;;  %v629_v24 = vld [vmem:[%s1893_s28 + $0xd80] sm:$0xff] }
  0x81   : > { %626 = vst [vmem:[%s1898_s29 + $0x6b0] sm:$0xff] %v625_v22  ;;  %628 = vst [vmem:[%s1898_s29 + $0x6b8] sm:$0xff] %v627_v23  ;;  %v631_v25 = vld [vmem:[%s1893_s28 + $0xd88] sm:$0xff]  ;;  %v633_v26 = vld [vmem:[%s1893_s28 + $0xd90] sm:$0xff] }
  0x82   : > { %630 = vst [vmem:[%s1898_s29 + $0x6c0] sm:$0xff] %v629_v24  ;;  %632 = vst [vmem:[%s1898_s29 + $0x6c8] sm:$0xff] %v631_v25  ;;  %v635_v27 = vld [vmem:[%s1893_s28 + $0xd98] sm:$0xff]  ;;  %v637_v28 = vld [vmem:[%s1893_s28 + $0xdc0] sm:$0xff] }
  0x83   : > { %634 = vst [vmem:[%s1898_s29 + $0x6d0] sm:$0xff] %v633_v26  ;;  %v639_v29 = vld [vmem:[%s1893_s28 + $0xdc8] sm:$0xff]  ;;  %636 = vst [vmem:[%s1898_s29 + $0x6d8] sm:$0xff] %v635_v27  ;;  %v641_v30 = vld [vmem:[%s1893_s28 + $0xdd0] sm:$0xff] }
  0x84   : > { %638 = vst [vmem:[%s1898_s29 + $0x6e0] sm:$0xff] %v637_v28  ;;  %640 = vst [vmem:[%s1898_s29 + $0x6e8] sm:$0xff] %v639_v29  ;;  %v643_v31 = vld [vmem:[%s1893_s28 + $0xdd8] sm:$0xff]  ;;  %v645_v32 = vld [vmem:[%s1893_s28 + $0xe00] sm:$0xff] }
  0x85   : > { %642 = vst [vmem:[%s1898_s29 + $0x6f0] sm:$0xff] %v641_v30  ;;  %644 = vst [vmem:[%s1898_s29 + $0x6f8] sm:$0xff] %v643_v31  ;;  %v647_v33 = vld [vmem:[%s1893_s28 + $0xe08] sm:$0xff]  ;;  %v649_v34 = vld [vmem:[%s1893_s28 + $0xe10] sm:$0xff] }
  0x86   : > { %646 = vst [vmem:[%s1898_s29 + $0x700] sm:$0xff] %v645_v32  ;;  %v651_v35 = vld [vmem:[%s1893_s28 + $0xe18] sm:$0xff]  ;;  %648 = vst [vmem:[%s1898_s29 + $0x708] sm:$0xff] %v647_v33  ;;  %v653_v36 = vld [vmem:[%s1893_s28 + $0xe40] sm:$0xff] }
  0x87   : > { %650 = vst [vmem:[%s1898_s29 + $0x710] sm:$0xff] %v649_v34  ;;  %652 = vst [vmem:[%s1898_s29 + $0x718] sm:$0xff] %v651_v35  ;;  %v655_v37 = vld [vmem:[%s1893_s28 + $0xe48] sm:$0xff]  ;;  %v657_v38 = vld [vmem:[%s1893_s28 + $0xe50] sm:$0xff] }
  0x88   : > { %654 = vst [vmem:[%s1898_s29 + $0x720] sm:$0xff] %v653_v36  ;;  %656 = vst [vmem:[%s1898_s29 + $0x728] sm:$0xff] %v655_v37  ;;  %v659_v39 = vld [vmem:[%s1893_s28 + $0xe58] sm:$0xff]  ;;  %v661_v40 = vld [vmem:[%s1893_s28 + $0xe80] sm:$0xff] }
  0x89   : > { %658 = vst [vmem:[%s1898_s29 + $0x730] sm:$0xff] %v657_v38  ;;  %v663_v41 = vld [vmem:[%s1893_s28 + $0xe88] sm:$0xff]  ;;  %660 = vst [vmem:[%s1898_s29 + $0x738] sm:$0xff] %v659_v39  ;;  %v665_v42 = vld [vmem:[%s1893_s28 + $0xe90] sm:$0xff] }
  0x8a   : > { %662 = vst [vmem:[%s1898_s29 + $0x740] sm:$0xff] %v661_v40  ;;  %664 = vst [vmem:[%s1898_s29 + $0x748] sm:$0xff] %v663_v41  ;;  %v667_v43 = vld [vmem:[%s1893_s28 + $0xe98] sm:$0xff]  ;;  %v669_v44 = vld [vmem:[%s1893_s28 + $0xec0] sm:$0xff] }
  0x8b   : > { %666 = vst [vmem:[%s1898_s29 + $0x750] sm:$0xff] %v665_v42  ;;  %668 = vst [vmem:[%s1898_s29 + $0x758] sm:$0xff] %v667_v43  ;;  %v671_v45 = vld [vmem:[%s1893_s28 + $0xec8] sm:$0xff]  ;;  %v673_v46 = vld [vmem:[%s1893_s28 + $0xed0] sm:$0xff] }
  0x8c   : > { %670 = vst [vmem:[%s1898_s29 + $0x760] sm:$0xff] %v669_v44  ;;  %v675_v47 = vld [vmem:[%s1893_s28 + $0xed8] sm:$0xff]  ;;  %672 = vst [vmem:[%s1898_s29 + $0x768] sm:$0xff] %v671_v45  ;;  %v677_v48 = vld [vmem:[%s1893_s28 + $0xf00] sm:$0xff] }
  0x8d   : > { %674 = vst [vmem:[%s1898_s29 + $0x770] sm:$0xff] %v673_v46  ;;  %676 = vst [vmem:[%s1898_s29 + $0x778] sm:$0xff] %v675_v47  ;;  %v679_v49 = vld [vmem:[%s1893_s28 + $0xf08] sm:$0xff]  ;;  %v681_v50 = vld [vmem:[%s1893_s28 + $0xf10] sm:$0xff] }
  0x8e   : > { %678 = vst [vmem:[%s1898_s29 + $0x780] sm:$0xff] %v677_v48  ;;  %680 = vst [vmem:[%s1898_s29 + $0x788] sm:$0xff] %v679_v49  ;;  %v683_v51 = vld [vmem:[%s1893_s28 + $0xf18] sm:$0xff]  ;;  %v685_v52 = vld [vmem:[%s1893_s28 + $0xf40] sm:$0xff] }
  0x8f   : > { %682 = vst [vmem:[%s1898_s29 + $0x790] sm:$0xff] %v681_v50  ;;  %v687_v53 = vld [vmem:[%s1893_s28 + $0xf48] sm:$0xff]  ;;  %684 = vst [vmem:[%s1898_s29 + $0x798] sm:$0xff] %v683_v51  ;;  %v689_v54 = vld [vmem:[%s1893_s28 + $0xf50] sm:$0xff] }
  0x90   : > { %686 = vst [vmem:[%s1898_s29 + $0x7a0] sm:$0xff] %v685_v52  ;;  %688 = vst [vmem:[%s1898_s29 + $0x7a8] sm:$0xff] %v687_v53  ;;  %v691_v55 = vld [vmem:[%s1893_s28 + $0xf58] sm:$0xff]  ;;  %v693_v56 = vld [vmem:[%s1893_s28 + $0xf80] sm:$0xff] }
  0x91   : > { %690 = vst [vmem:[%s1898_s29 + $0x7b0] sm:$0xff] %v689_v54  ;;  %692 = vst [vmem:[%s1898_s29 + $0x7b8] sm:$0xff] %v691_v55  ;;  %v695_v57 = vld [vmem:[%s1893_s28 + $0xf88] sm:$0xff]  ;;  %v697_v58 = vld [vmem:[%s1893_s28 + $0xf90] sm:$0xff] }
  0x92   : > { %694 = vst [vmem:[%s1898_s29 + $0x7c0] sm:$0xff] %v693_v56  ;;  %v699_v59 = vld [vmem:[%s1893_s28 + $0xf98] sm:$0xff]  ;;  %696 = vst [vmem:[%s1898_s29 + $0x7c8] sm:$0xff] %v695_v57  ;;  %v701_v60 = vld [vmem:[%s1893_s28 + $0xfc0] sm:$0xff] }
  0x93   : > { %698 = vst [vmem:[%s1898_s29 + $0x7d0] sm:$0xff] %v697_v58  ;;  %700 = vst [vmem:[%s1898_s29 + $0x7d8] sm:$0xff] %v699_v59  ;;  %v703_v61 = vld [vmem:[%s1893_s28 + $0xfc8] sm:$0xff]  ;;  %v705_v62 = vld [vmem:[%s1893_s28 + $0xfd0] sm:$0xff] }
  0x94   : > { %702 = vst [vmem:[%s1898_s29 + $0x7e0] sm:$0xff] %v701_v60  ;;  %704 = vst [vmem:[%s1898_s29 + $0x7e8] sm:$0xff] %v703_v61  ;;  %v707_v63 = vld [vmem:[%s1893_s28 + $0xfd8] sm:$0xff] }
  0x95   : > { %706 = vst [vmem:[%s1898_s29 + $0x7f0] sm:$0xff] %v705_v62  ;;  %708 = vst [vmem:[%s1898_s29 + $0x7f8] sm:$0xff] %v707_v63 }
  0x96 PF: > { %p1718_p8 = scmp.ge.s32.totalorder %s1823_s16, 1  ;;  %p721_p9 = scmp.lt.s32.totalorder %s1823_s16, 3 }
  0x98   : > { %p722_p10 = pnand %p1718_p8, %p721_p9 }
  0x99   : > { %s728_s30 = sand.u32 (!%p722_p10), 1, %s1807_s12   ;;  %v822_v0 = vld [vmem:[%s2781_s0 + $0x8] sm:$0xff] (!%p722_p10)  ;;  %s1721_s28 = sshll.u32 (!%p722_p10), %s1815_s14, 2 }
  0x9a   : > { %725 = sbr.rel (%p722_p10) target bundleno = 523 (0x20b), region = 51  ;;  %v826_v1 = vld [vmem:[%s2781_s0 + $0x28] sm:$0xff] (!%p722_p10)  ;;  %s1719_s8 = sshll.u32 (!%p722_p10), %s728_s30, 11 }
  0x9b   : > { %v838_v2 = vpack.c.bf16 (!%p722_p10), %v826_v1, %v822_v0  ;;  %s2420_s9 = scalar_lea.vmem (!%p722_p10), [#allocation3], %s1719_s8  ;;  %p779_p11 = scmp.lt.s32.totalorder (!%p722_p10), %s1721_s28, 7 }
  0x9c   : > { %v846_v3 = vld [vmem:[%s2420_s9 + $0x8] sm:$0xff] (!%p722_p10)  ;;  %v848_v5 = vld [vmem:[%s2420_s9 + $0x18] sm:$0xff] (!%p722_p10)  ;;  %v845_v8 = vld [vmem:[%s2420_s9] sm:$0xff] (!%p722_p10)  ;;  %s1720_s6 = sshll.u32 (!%p722_p10), %s728_s30, 7 }
  0x9d   : > { %v850_v4 = vld [vmem:[%s2420_s9 + $0x28] sm:$0xff] (!%p722_p10)  ;;  %1261 = vmatprep.mubr.bf16.mxu0 (!%p722_p10), %v838_v2  ;;  %1367 = vmatprep.mubr.bf16.mxu1 (!%p722_p10), %v838_v2  ;;  %v852_v7 = vld [vmem:[%s2420_s9 + $0x38] sm:$0xff] (!%p722_p10)  ;;  %v849_v9 = vld [vmem:[%s2420_s9 + $0x20] sm:$0xff] (!%p722_p10)  ;;  %s2726_s7 = scalar_lea.vmem (!%p722_p10), [#allocation4], %s1720_s6 }
  0x9e   : > { %v1102_v6 = vpack.c.bf16 (!%p722_p10), %v850_v4, %v846_v3  ;;  %v1104_v10 = vpack.c.bf16 (!%p722_p10), %v852_v7, %v848_v5  ;;  %v1101_v11 = vpack.c.bf16 (!%p722_p10), %v849_v9, %v845_v8  ;;  %v847_v12 = vld [vmem:[%s2420_s9 + $0x10] sm:$0xff] (!%p722_p10)  ;;  %v854_v14 = vld [vmem:[%s2420_s9 + $0x48] sm:$0xff] (!%p722_p10)  ;;  %v856_v17 = vld [vmem:[%s2420_s9 + $0x58] sm:$0xff] (!%p722_p10) }
  0x9f   : > { %v851_v13 = vld [vmem:[%s2420_s9 + $0x30] sm:$0xff] (!%p722_p10)  ;;  %v858_v16 = vld [vmem:[%s2420_s9 + $0x68] sm:$0xff] (!%p722_p10)  ;;  %v860_v18 = vld [vmem:[%s2420_s9 + $0x78] sm:$0xff] (!%p722_p10) }
  0xa0   : > { %1229 = vmatprep.subr.bf16.mxu0 (!%p722_p10), %v1102_v6  ;;  %v1103_v15 = vpack.c.bf16 (!%p722_p10), %v851_v13, %v847_v12  ;;  %1335 = vmatprep.subr.bf16.mxu1 (!%p722_p10), %v1104_v10  ;;  %v1106_v19 = vpack.c.bf16 (!%p722_p10), %v858_v16, %v854_v14  ;;  %v1108_v20 = vpack.c.bf16 (!%p722_p10), %v860_v18, %v856_v17  ;;  %v853_v21 = vld [vmem:[%s2420_s9 + $0x40] sm:$0xff] (!%p722_p10)  ;;  %v855_v23 = vld [vmem:[%s2420_s9 + $0x50] sm:$0xff] (!%p722_p10)  ;;  %v862_v26 = vld [vmem:[%s2420_s9 + $0x88] sm:$0xff] (!%p722_p10) }
  0xa1   : > { %1230 = vmatpush1.bf16.msra.mxu0 %v1101_v11  ;;  %v857_v22 = vld [vmem:[%s2420_s9 + $0x60] sm:$0xff]  ;;  %v859_v25 = vld [vmem:[%s2420_s9 + $0x70] sm:$0xff]  ;;  %v866_v27 = vld [vmem:[%s2420_s9 + $0xa8] sm:$0xff]  ;;  %s2793_s28 = smov (!%p779_p11, %s1721_s28), 7  ;;  %s1728_s12 = sshll.u32 (%p1880_p6), %s1815_s14, 5 }
  0xa2   : > { %1336 = vmatpush1.bf16.msra.mxu1 %v1103_v15  ;;  %v1105_v24 = vpack.c.bf16 %v857_v22, %v853_v21  ;;  %1231 = vmatprep.subr.bf16.mxu0 %v1106_v19  ;;  %v1107_v28 = vpack.c.bf16 %v859_v25, %v855_v23  ;;  %v1110_v29 = vpack.c.bf16 %v866_v27, %v862_v26  ;;  %v864_v30 = vld [vmem:[%s2420_s9 + $0x98] sm:$0xff]  ;;  %v861_v32 = vld [vmem:[%s2420_s9 + $0x80] sm:$0xff]  ;;  %v863_v35 = vld [vmem:[%s2420_s9 + $0x90] sm:$0xff]  ;;  %s781_s5 = scalar_lea.vmem %s2783_s2, %s2793_s28  ;;  %s1558_s10 = scalar_lea.vmem (%p1880_p6), %s2784_s3, %s1728_s12 }
  0xa3   : > { %1337 = vmatprep.subr.bf16.mxu1 %v1108_v20  ;;  %v868_v31 = vld [vmem:[%s2420_s9 + $0xb8] sm:$0xff]  ;;  %v865_v34 = vld [vmem:[%s2420_s9 + $0xa0] sm:$0xff]  ;;  %v867_v36 = vld [vmem:[%s2420_s9 + $0xb0] sm:$0xff] }
  0xa4   : > { %v1112_v33 = vpack.c.bf16 %v868_v31, %v864_v30  ;;  %v1109_v37 = vpack.c.bf16 %v865_v34, %v861_v32  ;;  %v870_v38 = vld [vmem:[%s2420_s9 + $0xc8] sm:$0xff]  ;;  %v872_v40 = vld [vmem:[%s2420_s9 + $0xd8] sm:$0xff]  ;;  %v1111_v41 = vpack.c.bf16 %v867_v36, %v863_v35  ;;  %v869_v44 = vld [vmem:[%s2420_s9 + $0xc0] sm:$0xff] }
  0xa5   : > { %1232 = vmatpush1.bf16.msra.mxu0 %v1105_v24  ;;  %v874_v39 = vld [vmem:[%s2420_s9 + $0xe8] sm:$0xff]  ;;  %v876_v43 = vld [vmem:[%s2420_s9 + $0xf8] sm:$0xff]  ;;  %v873_v45 = vld [vmem:[%s2420_s9 + $0xe0] sm:$0xff] }
  0xa6   : > { %1338 = vmatpush1.bf16.msra.mxu1 %v1107_v28  ;;  %1233 = vmatprep.subr.bf16.mxu0 %v1110_v29  ;;  %v1114_v42 = vpack.c.bf16 %v874_v39, %v870_v38  ;;  %v1116_v46 = vpack.c.bf16 %v876_v43, %v872_v40  ;;  %v871_v47 = vld [vmem:[%s2420_s9 + $0xd0] sm:$0xff]  ;;  %v878_v49 = vld [vmem:[%s2420_s9 + $0x108] sm:$0xff]  ;;  %v880_v51 = vld [vmem:[%s2420_s9 + $0x118] sm:$0xff]  ;;  %v1113_v53 = vpack.c.bf16 %v873_v45, %v869_v44 }
  0xa7   : > { %1339 = vmatprep.subr.bf16.mxu1 %v1112_v33  ;;  %v875_v48 = vld [vmem:[%s2420_s9 + $0xf0] sm:$0xff]  ;;  %v882_v50 = vld [vmem:[%s2420_s9 + $0x128] sm:$0xff]  ;;  %v884_v52 = vld [vmem:[%s2420_s9 + $0x138] sm:$0xff] }
  0xa8   : > { %v1115_v54 = vpack.c.bf16 %v875_v48, %v871_v47  ;;  %v1118_v55 = vpack.c.bf16 %v882_v50, %v878_v49  ;;  %v877_v56 = vld [vmem:[%s2420_s9 + $0x100] sm:$0xff]  ;;  %v879_v58 = vld [vmem:[%s2420_s9 + $0x110] sm:$0xff]  ;;  %v1120_v59 = vpack.c.bf16 %v884_v52, %v880_v51  ;;  %v886_v61 = vld [vmem:[%s2420_s9 + $0x148] sm:$0xff] }
  0xa9   : > { %1234 = vmatpush1.bf16.msra.mxu0 %v1109_v37  ;;  %v881_v57 = vld [vmem:[%s2420_s9 + $0x120] sm:$0xff]  ;;  %v883_v60 = vld [vmem:[%s2420_s9 + $0x130] sm:$0xff]  ;;  %v890_v62 = vld [vmem:[%s2420_s9 + $0x168] sm:$0xff] }
  0xaa   : > { %1340 = vmatpush1.bf16.msra.mxu1 %v1111_v41  ;;  %1235 = vmatprep.subr.bf16.mxu0 %v1114_v42  ;;  %v888_v63 = vld [vmem:[%s2420_s9 + $0x158] sm:$0xff]  ;;  %v1117_v1 = vpack.c.bf16 %v881_v57, %v877_v56  ;;  %v1119_v2 = vpack.c.bf16 %v883_v60, %v879_v58  ;;  %v1122_v3 = vpack.c.bf16 %v890_v62, %v886_v61  ;;  %v885_v4 = vld [vmem:[%s2420_s9 + $0x140] sm:$0xff]  ;;  %v887_v6 = vld [vmem:[%s2420_s9 + $0x150] sm:$0xff] }
  0xab   : > { %1341 = vmatprep.subr.bf16.mxu1 %v1116_v46  ;;  %v892_v0 = vld [vmem:[%s2420_s9 + $0x178] sm:$0xff]  ;;  %v889_v5 = vld [vmem:[%s2420_s9 + $0x160] sm:$0xff]  ;;  %v891_v8 = vld [vmem:[%s2420_s9 + $0x170] sm:$0xff] }
  0xac   : > { %v1124_v7 = vpack.c.bf16 %v892_v0, %v888_v63  ;;  %v894_v9 = vld [vmem:[%s2420_s9 + $0x188] sm:$0xff]  ;;  %v896_v11 = vld [vmem:[%s2420_s9 + $0x198] sm:$0xff]  ;;  %v1121_v13 = vpack.c.bf16 %v889_v5, %v885_v4  ;;  %v1123_v14 = vpack.c.bf16 %v891_v8, %v887_v6  ;;  %v893_v16 = vld [vmem:[%s2420_s9 + $0x180] sm:$0xff] }
  0xad   : > { %1236 = vmatpush1.bf16.msra.mxu0 %v1113_v53  ;;  %v898_v10 = vld [vmem:[%s2420_s9 + $0x1a8] sm:$0xff]  ;;  %v900_v12 = vld [vmem:[%s2420_s9 + $0x1b8] sm:$0xff]  ;;  %v897_v17 = vld [vmem:[%s2420_s9 + $0x1a0] sm:$0xff] }
  0xae   : > { %1342 = vmatpush1.bf16.msra.mxu1 %v1115_v54  ;;  %1237 = vmatprep.subr.bf16.mxu0 %v1118_v55  ;;  %v1126_v15 = vpack.c.bf16 %v898_v10, %v894_v9  ;;  %v895_v18 = vld [vmem:[%s2420_s9 + $0x190] sm:$0xff]  ;;  %v1128_v19 = vpack.c.bf16 %v900_v12, %v896_v11  ;;  %v902_v21 = vld [vmem:[%s2420_s9 + $0x1c8] sm:$0xff]  ;;  %v904_v23 = vld [vmem:[%s2420_s9 + $0x1d8] sm:$0xff]  ;;  %v1125_v25 = vpack.c.bf16 %v897_v17, %v893_v16 }
  0xaf   : > { %1343 = vmatprep.subr.bf16.mxu1 %v1120_v59  ;;  %v899_v20 = vld [vmem:[%s2420_s9 + $0x1b0] sm:$0xff]  ;;  %v906_v22 = vld [vmem:[%s2420_s9 + $0x1e8] sm:$0xff]  ;;  %v908_v24 = vld [vmem:[%s2420_s9 + $0x1f8] sm:$0xff] }
  0xb0   : > { %v1127_v26 = vpack.c.bf16 %v899_v20, %v895_v18  ;;  %v1130_v27 = vpack.c.bf16 %v906_v22, %v902_v21  ;;  %v901_v28 = vld [vmem:[%s2420_s9 + $0x1c0] sm:$0xff]  ;;  %v903_v30 = vld [vmem:[%s2420_s9 + $0x1d0] sm:$0xff]  ;;  %v1132_v31 = vpack.c.bf16 %v908_v24, %v904_v23  ;;  %v910_v33 = vld [vmem:[%s2420_s9 + $0x208] sm:$0xff] }
  0xb1   : > { %1238 = vmatpush1.bf16.msra.mxu0 %v1117_v1  ;;  %v905_v29 = vld [vmem:[%s2420_s9 + $0x1e0] sm:$0xff]  ;;  %v907_v32 = vld [vmem:[%s2420_s9 + $0x1f0] sm:$0xff]  ;;  %v914_v34 = vld [vmem:[%s2420_s9 + $0x228] sm:$0xff] }
  0xb2   : > { %1344 = vmatpush1.bf16.msra.mxu1 %v1119_v2  ;;  %1239 = vmatprep.subr.bf16.mxu0 %v1122_v3  ;;  %v912_v35 = vld [vmem:[%s2420_s9 + $0x218] sm:$0xff]  ;;  %v1129_v37 = vpack.c.bf16 %v905_v29, %v901_v28  ;;  %v1131_v38 = vpack.c.bf16 %v907_v32, %v903_v30  ;;  %v1134_v39 = vpack.c.bf16 %v914_v34, %v910_v33  ;;  %v909_v40 = vld [vmem:[%s2420_s9 + $0x200] sm:$0xff]  ;;  %v911_v42 = vld [vmem:[%s2420_s9 + $0x210] sm:$0xff] }
  0xb3   : > { %1345 = vmatprep.subr.bf16.mxu1 %v1124_v7  ;;  %v916_v36 = vld [vmem:[%s2420_s9 + $0x238] sm:$0xff]  ;;  %v913_v41 = vld [vmem:[%s2420_s9 + $0x220] sm:$0xff]  ;;  %v915_v44 = vld [vmem:[%s2420_s9 + $0x230] sm:$0xff] }
  0xb4   : > { %v1136_v43 = vpack.c.bf16 %v916_v36, %v912_v35  ;;  %v918_v45 = vld [vmem:[%s2420_s9 + $0x248] sm:$0xff]  ;;  %v920_v47 = vld [vmem:[%s2420_s9 + $0x258] sm:$0xff]  ;;  %v1133_v49 = vpack.c.bf16 %v913_v41, %v909_v40  ;;  %v1135_v50 = vpack.c.bf16 %v915_v44, %v911_v42  ;;  %v917_v52 = vld [vmem:[%s2420_s9 + $0x240] sm:$0xff] }
  0xb5   : > { %1240 = vmatpush1.bf16.msra.mxu0 %v1121_v13  ;;  %v922_v46 = vld [vmem:[%s2420_s9 + $0x268] sm:$0xff]  ;;  %v924_v48 = vld [vmem:[%s2420_s9 + $0x278] sm:$0xff]  ;;  %v921_v53 = vld [vmem:[%s2420_s9 + $0x260] sm:$0xff] }
  0xb6   : > { %1346 = vmatpush1.bf16.msra.mxu1 %v1123_v14  ;;  %1241 = vmatprep.subr.bf16.mxu0 %v1126_v15  ;;  %v1138_v51 = vpack.c.bf16 %v922_v46, %v918_v45  ;;  %v919_v54 = vld [vmem:[%s2420_s9 + $0x250] sm:$0xff]  ;;  %v1140_v55 = vpack.c.bf16 %v924_v48, %v920_v47  ;;  %v926_v57 = vld [vmem:[%s2420_s9 + $0x288] sm:$0xff]  ;;  %v928_v59 = vld [vmem:[%s2420_s9 + $0x298] sm:$0xff]  ;;  %v1137_v61 = vpack.c.bf16 %v921_v53, %v917_v52 }
  0xb7   : > { %1347 = vmatprep.subr.bf16.mxu1 %v1128_v19  ;;  %v923_v56 = vld [vmem:[%s2420_s9 + $0x270] sm:$0xff]  ;;  %v930_v58 = vld [vmem:[%s2420_s9 + $0x2a8] sm:$0xff]  ;;  %v932_v60 = vld [vmem:[%s2420_s9 + $0x2b8] sm:$0xff] }
  0xb8   : > { %v1139_v62 = vpack.c.bf16 %v923_v56, %v919_v54  ;;  %v1142_v63 = vpack.c.bf16 %v930_v58, %v926_v57  ;;  %v925_v0 = vld [vmem:[%s2420_s9 + $0x280] sm:$0xff]  ;;  %v927_v2 = vld [vmem:[%s2420_s9 + $0x290] sm:$0xff]  ;;  %v1144_v3 = vpack.c.bf16 %v932_v60, %v928_v59  ;;  %v934_v5 = vld [vmem:[%s2420_s9 + $0x2c8] sm:$0xff] }
  0xb9   : > { %1242 = vmatpush1.bf16.msra.mxu0 %v1125_v25  ;;  %v929_v1 = vld [vmem:[%s2420_s9 + $0x2a0] sm:$0xff]  ;;  %v931_v4 = vld [vmem:[%s2420_s9 + $0x2b0] sm:$0xff]  ;;  %v938_v6 = vld [vmem:[%s2420_s9 + $0x2e8] sm:$0xff] }
  0xba   : > { %1348 = vmatpush1.bf16.msra.mxu1 %v1127_v26  ;;  %1243 = vmatprep.subr.bf16.mxu0 %v1130_v27  ;;  %v936_v7 = vld [vmem:[%s2420_s9 + $0x2d8] sm:$0xff]  ;;  %v1141_v9 = vpack.c.bf16 %v929_v1, %v925_v0  ;;  %v1143_v10 = vpack.c.bf16 %v931_v4, %v927_v2  ;;  %v1146_v11 = vpack.c.bf16 %v938_v6, %v934_v5  ;;  %v933_v12 = vld [vmem:[%s2420_s9 + $0x2c0] sm:$0xff]  ;;  %v935_v14 = vld [vmem:[%s2420_s9 + $0x2d0] sm:$0xff] }
  0xbb   : > { %1349 = vmatprep.subr.bf16.mxu1 %v1132_v31  ;;  %v940_v8 = vld [vmem:[%s2420_s9 + $0x2f8] sm:$0xff]  ;;  %v937_v13 = vld [vmem:[%s2420_s9 + $0x2e0] sm:$0xff]  ;;  %v939_v16 = vld [vmem:[%s2420_s9 + $0x2f0] sm:$0xff] }
  0xbc   : > { %v1148_v15 = vpack.c.bf16 %v940_v8, %v936_v7  ;;  %v942_v17 = vld [vmem:[%s2420_s9 + $0x308] sm:$0xff]  ;;  %v944_v19 = vld [vmem:[%s2420_s9 + $0x318] sm:$0xff]  ;;  %v1145_v21 = vpack.c.bf16 %v937_v13, %v933_v12  ;;  %v1147_v22 = vpack.c.bf16 %v939_v16, %v935_v14  ;;  %v941_v24 = vld [vmem:[%s2420_s9 + $0x300] sm:$0xff] }
  0xbd   : > { %1244 = vmatpush1.bf16.msra.mxu0 %v1129_v37  ;;  %v946_v18 = vld [vmem:[%s2420_s9 + $0x328] sm:$0xff]  ;;  %v948_v20 = vld [vmem:[%s2420_s9 + $0x338] sm:$0xff]  ;;  %v945_v25 = vld [vmem:[%s2420_s9 + $0x320] sm:$0xff] }
  0xbe   : > { %1350 = vmatpush1.bf16.msra.mxu1 %v1131_v38  ;;  %1245 = vmatprep.subr.bf16.mxu0 %v1134_v39  ;;  %v1150_v23 = vpack.c.bf16 %v946_v18, %v942_v17  ;;  %v943_v26 = vld [vmem:[%s2420_s9 + $0x310] sm:$0xff]  ;;  %v1152_v27 = vpack.c.bf16 %v948_v20, %v944_v19  ;;  %v950_v29 = vld [vmem:[%s2420_s9 + $0x348] sm:$0xff]  ;;  %v952_v31 = vld [vmem:[%s2420_s9 + $0x358] sm:$0xff]  ;;  %v1149_v33 = vpack.c.bf16 %v945_v25, %v941_v24 }
  0xbf   : > { %1351 = vmatprep.subr.bf16.mxu1 %v1136_v43  ;;  %v947_v28 = vld [vmem:[%s2420_s9 + $0x330] sm:$0xff]  ;;  %v954_v30 = vld [vmem:[%s2420_s9 + $0x368] sm:$0xff]  ;;  %v956_v32 = vld [vmem:[%s2420_s9 + $0x378] sm:$0xff] }
  0xc0   : > { %v1151_v34 = vpack.c.bf16 %v947_v28, %v943_v26  ;;  %v1154_v35 = vpack.c.bf16 %v954_v30, %v950_v29  ;;  %v949_v36 = vld [vmem:[%s2420_s9 + $0x340] sm:$0xff]  ;;  %v951_v38 = vld [vmem:[%s2420_s9 + $0x350] sm:$0xff]  ;;  %v1156_v39 = vpack.c.bf16 %v956_v32, %v952_v31  ;;  %v958_v41 = vld [vmem:[%s2420_s9 + $0x388] sm:$0xff] }
  0xc1   : > { %1246 = vmatpush1.bf16.msra.mxu0 %v1133_v49  ;;  %v953_v37 = vld [vmem:[%s2420_s9 + $0x360] sm:$0xff]  ;;  %v955_v40 = vld [vmem:[%s2420_s9 + $0x370] sm:$0xff]  ;;  %v962_v42 = vld [vmem:[%s2420_s9 + $0x3a8] sm:$0xff] }
  0xc2   : > { %1352 = vmatpush1.bf16.msra.mxu1 %v1135_v50  ;;  %1247 = vmatprep.subr.bf16.mxu0 %v1138_v51  ;;  %v960_v43 = vld [vmem:[%s2420_s9 + $0x398] sm:$0xff]  ;;  %v1153_v45 = vpack.c.bf16 %v953_v37, %v949_v36  ;;  %v1155_v46 = vpack.c.bf16 %v955_v40, %v951_v38  ;;  %v1158_v47 = vpack.c.bf16 %v962_v42, %v958_v41  ;;  %v957_v48 = vld [vmem:[%s2420_s9 + $0x380] sm:$0xff]  ;;  %v959_v50 = vld [vmem:[%s2420_s9 + $0x390] sm:$0xff] }
  0xc3   : > { %1353 = vmatprep.subr.bf16.mxu1 %v1140_v55  ;;  %v964_v44 = vld [vmem:[%s2420_s9 + $0x3b8] sm:$0xff]  ;;  %v961_v49 = vld [vmem:[%s2420_s9 + $0x3a0] sm:$0xff]  ;;  %v963_v52 = vld [vmem:[%s2420_s9 + $0x3b0] sm:$0xff] }
  0xc4   : > { %v1160_v51 = vpack.c.bf16 %v964_v44, %v960_v43  ;;  %v966_v53 = vld [vmem:[%s2420_s9 + $0x3c8] sm:$0xff]  ;;  %v968_v55 = vld [vmem:[%s2420_s9 + $0x3d8] sm:$0xff]  ;;  %v1157_v57 = vpack.c.bf16 %v961_v49, %v957_v48  ;;  %v1159_v58 = vpack.c.bf16 %v963_v52, %v959_v50  ;;  %v965_v60 = vld [vmem:[%s2420_s9 + $0x3c0] sm:$0xff] }
  0xc5   : > { %1248 = vmatpush1.bf16.msra.mxu0 %v1137_v61  ;;  %v970_v54 = vld [vmem:[%s2420_s9 + $0x3e8] sm:$0xff]  ;;  %v972_v56 = vld [vmem:[%s2420_s9 + $0x3f8] sm:$0xff]  ;;  %v969_v61 = vld [vmem:[%s2420_s9 + $0x3e0] sm:$0xff] }
  0xc6   : > { %1354 = vmatpush1.bf16.msra.mxu1 %v1139_v62  ;;  %1249 = vmatprep.subr.bf16.mxu0 %v1142_v63  ;;  %v1162_v59 = vpack.c.bf16 %v970_v54, %v966_v53  ;;  %v967_v62 = vld [vmem:[%s2420_s9 + $0x3d0] sm:$0xff]  ;;  %v1164_v63 = vpack.c.bf16 %v972_v56, %v968_v55  ;;  %v974_v1 = vld [vmem:[%s2420_s9 + $0x408] sm:$0xff]  ;;  %v980_v4 = vld [vmem:[%s2420_s9 + $0x438] sm:$0xff]  ;;  %v1161_v5 = vpack.c.bf16 %v969_v61, %v965_v60 }
  0xc7   : > { %1355 = vmatprep.subr.bf16.mxu1 %v1144_v3  ;;  %v971_v0 = vld [vmem:[%s2420_s9 + $0x3f0] sm:$0xff]  ;;  %v978_v2 = vld [vmem:[%s2420_s9 + $0x428] sm:$0xff]  ;;  %v976_v3 = vld [vmem:[%s2420_s9 + $0x418] sm:$0xff] }
  0xc8   : > { %v821_v6 = vld [vmem:[%s2781_s0] sm:$0xff]  ;;  %v1163_v8 = vpack.c.bf16 %v971_v0, %v967_v62  ;;  %v975_v12 = vld [vmem:[%s2420_s9 + $0x410] sm:$0xff]  ;;  %v830_v13 = vld [vmem:[%s2781_s0 + $0x48] sm:$0xff]  ;;  %v1168_v14 = vpack.c.bf16 %v980_v4, %v976_v3 }
  0xc9   : > { %1250 = vmatpush1.bf16.msra.mxu0 %v1141_v9  ;;  %v825_v7 = vld [vmem:[%s2781_s0 + $0x20] sm:$0xff]  ;;  %v1166_v9 = vpack.c.bf16 %v978_v2, %v974_v1  ;;  %v982_v16 = vld [vmem:[%s2420_s9 + $0x448] sm:$0xff]  ;;  %v984_v19 = vld [vmem:[%s2420_s9 + $0x458] sm:$0xff] }
  0xca   : > { %1356 = vmatpush1.bf16.msra.mxu1 %v1143_v10  ;;  %1251 = vmatprep.subr.bf16.mxu0 %v1146_v11  ;;  %v973_v10 = vld [vmem:[%s2420_s9 + $0x400] sm:$0xff]  ;;  %v986_v17 = vld [vmem:[%s2420_s9 + $0x468] sm:$0xff]  ;;  %v837_v18 = vpack.c.bf16 %v825_v7, %v821_v6  ;;  %v988_v20 = vld [vmem:[%s2420_s9 + $0x478] sm:$0xff] }
  0xcb   : > { %1357 = vmatprep.subr.bf16.mxu1 %v1148_v15  ;;  %v977_v11 = vld [vmem:[%s2420_s9 + $0x420] sm:$0xff]  ;;  %v979_v15 = vld [vmem:[%s2420_s9 + $0x430] sm:$0xff]  ;;  %v1170_v24 = vpack.c.bf16 %v986_v17, %v982_v16  ;;  %v1172_v28 = vpack.c.bf16 %v988_v20, %v984_v19  ;;  %v990_v30 = vld [vmem:[%s2420_s9 + $0x488] sm:$0xff] }
  0xcc   : > { %v981_v25 = vld [vmem:[%s2420_s9 + $0x440] sm:$0xff]  ;;  %v987_v29 = vld [vmem:[%s2420_s9 + $0x470] sm:$0xff]  ;;  %v994_v31 = vld [vmem:[%s2420_s9 + $0x4a8] sm:$0xff] }
  0xcd   : > { %1252 = vmatpush1.bf16.msra.mxu0 %v1145_v21  ;;  %v834_v21 = vld [vmem:[%s2781_s0 + $0x68] sm:$0xff]  ;;  %v985_v26 = vld [vmem:[%s2420_s9 + $0x460] sm:$0xff]  ;;  %v991_v42 = vld [vmem:[%s2420_s9 + $0x490] sm:$0xff] }
  0xce   : > { %1358 = vmatpush1.bf16.msra.mxu1 %v1147_v22  ;;  %1253 = vmatprep.subr.bf16.mxu0 %v1150_v23  ;;  %v1165_v22 = vpack.c.bf16 %v977_v11, %v973_v10  ;;  %v1167_v23 = vpack.c.bf16 %v979_v15, %v975_v12  ;;  %v842_v32 = vpack.c.bf16 %v834_v21, %v830_v13  ;;  %v829_v36 = vld [vmem:[%s2781_s0 + $0x40] sm:$0xff]  ;;  %v995_v44 = vld [vmem:[%s2420_s9 + $0x4b0] sm:$0xff]  ;;  %v1004_v48 = vld [vmem:[%s2420_s9 + $0x4f8] sm:$0xff] }
  0xcf   : > { %1359 = vmatprep.subr.bf16.mxu1 %v1152_v27  ;;  %v983_v27 = vld [vmem:[%s2420_s9 + $0x450] sm:$0xff]  ;;  %v833_v37 = vld [vmem:[%s2781_s0 + $0x60] sm:$0xff]  ;;  %v1008_v60 = vld [vmem:[%s2420_s9 + $0x518] sm:$0xff] }
  0xd0   : > { %v1171_v38 = vpack.c.bf16 %v987_v29, %v983_v27  ;;  %v989_v40 = vld [vmem:[%s2420_s9 + $0x480] sm:$0xff]  ;;  %v841_v49 = vpack.c.bf16 %v833_v37, %v829_v36  ;;  %v999_v55 = vld [vmem:[%s2420_s9 + $0x4d0] sm:$0xff]  ;;  %v1012_v61 = vld [vmem:[%s2420_s9 + $0x538] sm:$0xff] }
  0xd1   : > { %1254 = vmatpush1.bf16.msra.mxu0 %v1149_v33  ;;  %v992_v33 = vld [vmem:[%s2420_s9 + $0x498] sm:$0xff]  ;;  %v993_v41 = vld [vmem:[%s2420_s9 + $0x4a0] sm:$0xff]  ;;  %v1007_v3 = vld [vmem:[%s2420_s9 + $0x510] sm:$0xff]  ;;  %v1184_v4 = vpack.c.bf16 %v1012_v61, %v1008_v60 }
  0xd2   : > { %1360 = vmatpush1.bf16.msra.mxu1 %v1151_v34  ;;  %1255 = vmatprep.subr.bf16.mxu0 %v1154_v35  ;;  %v996_v34 = vld [vmem:[%s2420_s9 + $0x4b8] sm:$0xff]  ;;  %v1169_v35 = vpack.c.bf16 %v985_v26, %v981_v25  ;;  %v1173_v50 = vpack.c.bf16 %v993_v41, %v989_v40  ;;  %v997_v53 = vld [vmem:[%s2420_s9 + $0x4c0] sm:$0xff]  ;;  %v1014_v6 = vld [vmem:[%s2420_s9 + $0x548] sm:$0xff] }
  0xd3   : > { %1361 = vmatprep.subr.bf16.mxu1 %v1156_v39  ;;  %v1174_v39 = vpack.c.bf16 %v994_v31, %v990_v30  ;;  %v1176_v43 = vpack.c.bf16 %v996_v34, %v992_v33  ;;  %v1001_v54 = vld [vmem:[%s2420_s9 + $0x4e0] sm:$0xff]  ;;  %v1018_v7 = vld [vmem:[%s2420_s9 + $0x568] sm:$0xff]  ;;  %v1015_v15 = vld [vmem:[%s2420_s9 + $0x550] sm:$0xff] }
  0xd4   : > { %v1177_v62 = vpack.c.bf16 %v1001_v54, %v997_v53  ;;  %v1005_v1 = vld [vmem:[%s2420_s9 + $0x500] sm:$0xff]  ;;  %v1186_v12 = vpack.c.bf16 %v1018_v7, %v1014_v6  ;;  %v1019_v17 = vld [vmem:[%s2420_s9 + $0x570] sm:$0xff]  ;;  %v1026_v19 = vld [vmem:[%s2420_s9 + $0x5a8] sm:$0xff] }
  0xd5   : > { %1256 = vmatpush1.bf16.msra.mxu0 %v1153_v45  ;;  %v998_v45 = vld [vmem:[%s2420_s9 + $0x4c8] sm:$0xff]  ;;  %v1009_v2 = vld [vmem:[%s2420_s9 + $0x520] sm:$0xff]  ;;  %v1024_v20 = vld [vmem:[%s2420_s9 + $0x598] sm:$0xff]  ;;  %v1187_v25 = vpack.c.bf16 %v1019_v17, %v1015_v15 }
  0xd6   : > { %1362 = vmatpush1.bf16.msra.mxu1 %v1155_v46  ;;  %1257 = vmatprep.subr.bf16.mxu0 %v1158_v47  ;;  %v1002_v46 = vld [vmem:[%s2420_s9 + $0x4e8] sm:$0xff]  ;;  %v1000_v47 = vld [vmem:[%s2420_s9 + $0x4d8] sm:$0xff]  ;;  %v1181_v10 = vpack.c.bf16 %v1009_v2, %v1005_v1  ;;  %v1013_v13 = vld [vmem:[%s2420_s9 + $0x540] sm:$0xff] }
  0xd7   : > { %1363 = vmatprep.subr.bf16.mxu1 %v1160_v51  ;;  %v1175_v51 = vpack.c.bf16 %v995_v44, %v991_v42  ;;  %v1178_v52 = vpack.c.bf16 %v1002_v46, %v998_v45  ;;  %v1180_v56 = vpack.c.bf16 %v1004_v48, %v1000_v47  ;;  %v1028_v21 = vld [vmem:[%s2420_s9 + $0x5b8] sm:$0xff]  ;;  %v1023_v27 = vld [vmem:[%s2420_s9 + $0x590] sm:$0xff]  ;;  %v1034_v33 = vld [vmem:[%s2420_s9 + $0x5e8] sm:$0xff] }
  0xd8   : > { %v828_v29 = vld [vmem:[%s2781_s0 + $0x38] sm:$0xff]  ;;  %v1192_v30 = vpack.c.bf16 %v1028_v21, %v1024_v20  ;;  %v1027_v31 = vld [vmem:[%s2420_s9 + $0x5b0] sm:$0xff]  ;;  %v1029_v40 = vld [vmem:[%s2420_s9 + $0x5c0] sm:$0xff] }
  0xd9   : > { %1258 = vmatpush1.bf16.msra.mxu0 %v1157_v57  ;;  %v1003_v57 = vld [vmem:[%s2420_s9 + $0x4f0] sm:$0xff]  ;;  %v1036_v36 = vld [vmem:[%s2420_s9 + $0x5f8] sm:$0xff]  ;;  %v1033_v41 = vld [vmem:[%s2420_s9 + $0x5e0] sm:$0xff] }
  0xda   : > { %1364 = vmatpush1.bf16.msra.mxu1 %v1159_v58  ;;  %1259 = vmatprep.subr.bf16.mxu0 %v1162_v59  ;;  %v1006_v58 = vld [vmem:[%s2420_s9 + $0x508] sm:$0xff]  ;;  %v1031_v42 = vld [vmem:[%s2420_s9 + $0x5d0] sm:$0xff]  ;;  %v1040_v47 = vld [vmem:[%s2420_s9 + $0x618] sm:$0xff] }
  0xdb   : > { %1365 = vmatprep.subr.bf16.mxu1 %v1164_v63  ;;  %v1010_v59 = vld [vmem:[%s2420_s9 + $0x528] sm:$0xff]  ;;  %v1179_v63 = vpack.c.bf16 %v1003_v57, %v999_v55  ;;  %v1035_v44 = vld [vmem:[%s2420_s9 + $0x5f0] sm:$0xff]  ;;  %v1044_v48 = vld [vmem:[%s2420_s9 + $0x638] sm:$0xff] }
  0xdc   : > { %v1182_v0 = vpack.c.bf16 %v1010_v59, %v1006_v58  ;;  %v1038_v45 = vld [vmem:[%s2420_s9 + $0x608] sm:$0xff]  ;;  %v1041_v53 = vld [vmem:[%s2420_s9 + $0x620] sm:$0xff]  ;;  %v1039_v54 = vld [vmem:[%s2420_s9 + $0x610] sm:$0xff]  ;;  %v1200_v55 = vpack.c.bf16 %v1044_v48, %v1040_v47 }
  0xdd   : > { %1260 = vmatpush1.bf16.msra.mxu0 %v1161_v5  ;;  %v1011_v5 = vld [vmem:[%s2420_s9 + $0x530] sm:$0xff]  ;;  %v1042_v46 = vld [vmem:[%s2420_s9 + $0x628] sm:$0xff]  ;;  %v1048_v59 = vld [vmem:[%s2420_s9 + $0x658] sm:$0xff] }
  0xde   : > { %1366 = vmatpush1.bf16.msra.mxu1 %v1163_v8  ;;  %1282 = vmatprep.subr.bf16.mxu0 %v1166_v9  ;;  %v1016_v8 = vld [vmem:[%s2420_s9 + $0x558] sm:$0xff]  ;;  %v1183_v11 = vpack.c.bf16 %v1011_v5, %v1007_v3  ;;  %v1046_v57 = vld [vmem:[%s2420_s9 + $0x648] sm:$0xff]  ;;  %v1049_v1 = vld [vmem:[%s2420_s9 + $0x660] sm:$0xff] }
  0xdf   : > { %1388 = vmatprep.subr.bf16.mxu1 %v1168_v14  ;;  %v1020_v9 = vld [vmem:[%s2420_s9 + $0x578] sm:$0xff]  ;;  %v1017_v14 = vld [vmem:[%s2420_s9 + $0x560] sm:$0xff]  ;;  %v1050_v58 = vld [vmem:[%s2420_s9 + $0x668] sm:$0xff] }
  0xe0   : > { %1262 = vmatmul.mubr.bf16.vlgmr.msra.gmra.mrb[0].mxu0 %v837_v18  ;;  %v1188_v16 = vpack.c.bf16 %v1020_v9, %v1016_v8  ;;  %v1052_v60 = vld [vmem:[%s2420_s9 + $0x678] sm:$0xff]  ;;  %v1047_v2 = vld [vmem:[%s2420_s9 + $0x650] sm:$0xff]  ;;  %v1054_v5 = vld [vmem:[%s2420_s9 + $0x688] sm:$0xff] }
  0xe1   : > { %1283 = vmatpush1.bf16.msra.mxu0 %v1165_v22  ;;  %1368 = vmatmul.mubr.bf16.vlgmr.msra.gmra.mrb[0].mxu1 %v837_v18  ;;  %v1022_v18 = vld [vmem:[%s2420_s9 + $0x588] sm:$0xff]  ;;  %v1185_v22 = vpack.c.bf16 %v1017_v14, %v1013_v13  ;;  %v1204_v3 = vpack.c.bf16 %v1052_v60, %v1048_v59  ;;  %v1056_v7 = vld [vmem:[%s2420_s9 + $0x698] sm:$0xff]  ;;  %v1057_v13 = vld [vmem:[%s2420_s9 + $0x6a0] sm:$0xff] }
  0xe2   : > { %1389 = vmatpush1.bf16.msra.mxu1 %v1167_v23  ;;  %1284 = vmatprep.subr.bf16.mxu0 %v1170_v24  ;;  %v1021_v23 = vld [vmem:[%s2420_s9 + $0x580] sm:$0xff]  ;;  %v1190_v26 = vpack.c.bf16 %v1026_v19, %v1022_v18  ;;  %v1058_v6 = vld [vmem:[%s2420_s9 + $0x6a8] sm:$0xff]  ;;  %v1060_v8 = vld [vmem:[%s2420_s9 + $0x6b8] sm:$0xff] }
  0xe3   : > { %1390 = vmatprep.subr.bf16.mxu1 %v1172_v28  ;;  %1271 = vmatprep.mubr.bf16.mxu0 %v842_v32  ;;  %v1025_v24 = vld [vmem:[%s2420_s9 + $0x5a0] sm:$0xff]  ;;  %v824_v28 = vld [vmem:[%s2781_s0 + $0x18] sm:$0xff]  ;;  %v1055_v14 = vld [vmem:[%s2420_s9 + $0x690] sm:$0xff]  ;;  %v1208_v15 = vpack.c.bf16 %v1060_v8, %v1056_v7 }
  0xe4   : > { %1377 = vmatprep.mubr.bf16.mxu1 %v842_v32  ;;  %v1030_v32 = vld [vmem:[%s2420_s9 + $0x5c8] sm:$0xff]  ;;  %v840_v34 = vpack.c.bf16 %v828_v29, %v824_v28  ;;  %v1189_v37 = vpack.c.bf16 %v1025_v24, %v1021_v23  ;;  %v1064_v19 = vld [vmem:[%s2420_s9 + $0x6d8] sm:$0xff]  ;;  %v1061_v24 = vld [vmem:[%s2420_s9 + $0x6c0] sm:$0xff] }
  0xe5   : > { %1285 = vmatpush1.bf16.msra.mxu0 %v1169_v35  ;;  %v1032_v35 = vld [vmem:[%s2420_s9 + $0x5d8] sm:$0xff]  ;;  %v1062_v17 = vld [vmem:[%s2420_s9 + $0x6c8] sm:$0xff]  ;;  %v1067_v28 = vld [vmem:[%s2420_s9 + $0x6f0] sm:$0xff] }
  0xe6   : > { %1391 = vmatpush1.bf16.msra.mxu1 %v1171_v38  ;;  %1286 = vmatprep.subr.bf16.mxu0 %v1174_v39  ;;  %v1191_v38 = vpack.c.bf16 %v1027_v31, %v1023_v27  ;;  %v1194_v39 = vpack.c.bf16 %v1034_v33, %v1030_v32  ;;  %v1066_v18 = vld [vmem:[%s2420_s9 + $0x6e8] sm:$0xff]  ;;  %v1068_v20 = vld [vmem:[%s2420_s9 + $0x6f8] sm:$0xff]  ;;  %v1077_v48 = vld [vmem:[%s2420_s9 + $0x740] sm:$0xff] }
  0xe7   : > { %1392 = vmatprep.subr.bf16.mxu1 %v1176_v43  ;;  %v1196_v43 = vpack.c.bf16 %v1036_v36, %v1032_v35  ;;  %v1210_v23 = vpack.c.bf16 %v1066_v18, %v1062_v17  ;;  %v1212_v27 = vpack.c.bf16 %v1068_v20, %v1064_v19  ;;  %v1070_v29 = vld [vmem:[%s2420_s9 + $0x708] sm:$0xff]  ;;  %v1072_v31 = vld [vmem:[%s2420_s9 + $0x718] sm:$0xff]  ;;  %v1069_v36 = vld [vmem:[%s2420_s9 + $0x700] sm:$0xff] }
  0xe8   : > { %1272 = vmatmul.mubr.bf16.gmra.mrb[4].mxu0 %v841_v49  ;;  %v1076_v32 = vld [vmem:[%s2420_s9 + $0x738] sm:$0xff]  ;;  %v1085_v60 = vld [vmem:[%s2420_s9 + $0x780] sm:$0xff] }
  0xe9   : > { %1287 = vmatpush1.bf16.msra.mxu0 %v1173_v50  ;;  %1378 = vmatmul.mubr.bf16.gmra.mrb[4].mxu1 %v841_v49  ;;  %v1193_v49 = vpack.c.bf16 %v1033_v41, %v1029_v40  ;;  %v1195_v50 = vpack.c.bf16 %v1035_v44, %v1031_v42  ;;  %v1075_v40 = vld [vmem:[%s2420_s9 + $0x730] sm:$0xff]  ;;  %v1078_v41 = vld [vmem:[%s2420_s9 + $0x748] sm:$0xff]  ;;  %v1084_v44 = vld [vmem:[%s2420_s9 + $0x778] sm:$0xff] }
  0xea   : > { %1393 = vmatpush1.bf16.msra.mxu1 %v1175_v51  ;;  %1288 = vmatprep.subr.bf16.mxu0 %v1178_v52  ;;  %v1198_v51 = vpack.c.bf16 %v1042_v46, %v1038_v45  ;;  %v1037_v52 = vld [vmem:[%s2420_s9 + $0x600] sm:$0xff]  ;;  %v1082_v42 = vld [vmem:[%s2420_s9 + $0x768] sm:$0xff]  ;;  %v832_v17 = vld [vmem:[%s2781_s0 + $0x58] sm:$0xff] }
  0xeb   : > { %1394 = vmatprep.subr.bf16.mxu1 %v1180_v56  ;;  %1314 = vmatprep.mubr.bf16.mxu0 %v840_v34  ;;  %v1043_v56 = vld [vmem:[%s2420_s9 + $0x630] sm:$0xff]  ;;  %v1197_v61 = vpack.c.bf16 %v1041_v53, %v1037_v52  ;;  %v1218_v47 = vpack.c.bf16 %v1082_v42, %v1078_v41  ;;  %v1086_v53 = vld [vmem:[%s2420_s9 + $0x788] sm:$0xff]  ;;  %v1093_v8 = vld [vmem:[%s2420_s9 + $0x7c0] sm:$0xff] }
  0xec   : > { %1420 = vmatprep.mubr.bf16.mxu1 %v840_v34  ;;  %v1083_v52 = vld [vmem:[%s2420_s9 + $0x770] sm:$0xff]  ;;  %v836_v18 = vld [vmem:[%s2781_s0 + $0x78] sm:$0xff] }
  0xed   : > { %1289 = vmatpush1.bf16.msra.mxu0 %v1177_v62  ;;  %v1199_v62 = vpack.c.bf16 %v1043_v56, %v1039_v54  ;;  %v1090_v54 = vld [vmem:[%s2420_s9 + $0x7a8] sm:$0xff]  ;;  %v1092_v56 = vld [vmem:[%s2420_s9 + $0x7b8] sm:$0xff]  ;;  %v844_v20 = vpack.c.bf16 %v836_v18, %v832_v17 }
  0xee   : > { %1395 = vmatpush1.bf16.msra.mxu1 %v1179_v63  ;;  %1290 = vmatprep.subr.bf16.mxu0 %v1182_v0  ;;  %v1202_v63 = vpack.c.bf16 %v1050_v58, %v1046_v57  ;;  %v1045_v0 = vld [vmem:[%s2420_s9 + $0x640] sm:$0xff]  ;;  %v1222_v59 = vpack.c.bf16 %v1090_v54, %v1086_v53 }
  0xef   : > { %1396 = vmatprep.subr.bf16.mxu1 %v1184_v4  ;;  %v1051_v4 = vld [vmem:[%s2420_s9 + $0x670] sm:$0xff]  ;;  %v1201_v9 = vpack.c.bf16 %v1049_v1, %v1045_v0  ;;  %v1094_v1 = vld [vmem:[%s2420_s9 + $0x7c8] sm:$0xff] }
  0xf0   : > { %v1091_v0 = vld [vmem:[%s2420_s9 + $0x7b0] sm:$0xff] }
  0xf1   : > { %1291 = vmatpush1.bf16.msra.mxu0 %v1181_v10  ;;  %v1203_v10 = vpack.c.bf16 %v1051_v4, %v1047_v2  ;;  %v1098_v2 = vld [vmem:[%s2420_s9 + $0x7e8] sm:$0xff]  ;;  %v1100_v4 = vld [vmem:[%s2420_s9 + $0x7f8] sm:$0xff] }
  0xf2   : > { %1397 = vmatpush1.bf16.msra.mxu1 %v1183_v11  ;;  %1292 = vmatprep.subr.bf16.mxu0 %v1186_v12  ;;  %v1206_v11 = vpack.c.bf16 %v1058_v6, %v1054_v5  ;;  %v1053_v12 = vld [vmem:[%s2420_s9 + $0x680] sm:$0xff]  ;;  %v1226_v7 = vpack.c.bf16 %v1098_v2, %v1094_v1 }
  0xf3   : > { %1398 = vmatprep.subr.bf16.mxu1 %v1188_v16  ;;  %v1059_v16 = vld [vmem:[%s2420_s9 + $0x6b0] sm:$0xff]  ;;  %v1205_v21 = vpack.c.bf16 %v1057_v13, %v1053_v12 }
  0xf4   : > { %v1099_v12 = vld [vmem:[%s2420_s9 + $0x7f0] sm:$0xff] }
  0xf5   : > { %1293 = vmatpush1.bf16.msra.mxu0 %v1185_v22  ;;  %v1207_v22 = vpack.c.bf16 %v1059_v16, %v1055_v14  ;;  %v823_v14 = vld [vmem:[%s2781_s0 + $0x10] sm:$0xff] }
  0xf6   : > { %1399 = vmatpush1.bf16.msra.mxu1 %v1187_v25  ;;  %1294 = vmatprep.subr.bf16.mxu0 %v1190_v26  ;;  %v1065_v25 = vld [vmem:[%s2420_s9 + $0x6e0] sm:$0xff]  ;;  %v1063_v26 = vld [vmem:[%s2420_s9 + $0x6d0] sm:$0xff] }
  0xf7   : > { %1400 = vmatprep.subr.bf16.mxu1 %v1192_v30  ;;  %v1074_v30 = vld [vmem:[%s2420_s9 + $0x728] sm:$0xff]  ;;  %v1209_v33 = vpack.c.bf16 %v1065_v25, %v1061_v24  ;;  %v1211_v34 = vpack.c.bf16 %v1067_v28, %v1063_v26  ;;  %v1494_v24 = vlaneseq }
  0xf8   : > { %v1214_v35 = vpack.c.bf16 %v1074_v30, %v1070_v29 }
  0xf9   : > { %1295 = vmatpush1.bf16.msra.mxu0 %v1189_v37  ;;  %v1073_v37 = vld [vmem:[%s2420_s9 + $0x720] sm:$0xff]  ;;  %v1495_v25 = vshrl.u32 %v1494_v24, 7 }
  0xfa   : > { %1401 = vmatpush1.bf16.msra.mxu1 %v1191_v38  ;;  %1296 = vmatprep.subr.bf16.mxu0 %v1194_v39  ;;  %v1071_v38 = vld [vmem:[%s2420_s9 + $0x710] sm:$0xff]  ;;  %v1216_v39 = vpack.c.bf16 %v1076_v32, %v1072_v31  ;;  %v1213_v45 = vpack.c.bf16 %v1073_v37, %v1069_v36 }
  0xfb   : > { %1402 = vmatprep.subr.bf16.mxu1 %v1196_v43  ;;  %v1080_v43 = vld [vmem:[%s2420_s9 + $0x758] sm:$0xff]  ;;  %v1215_v46 = vpack.c.bf16 %v1075_v40, %v1071_v38  ;;  %v1496_v26 = vsub.s32 0, %v1495_v25  ;;  %v1504_v28 = vsub.s32 2, %v1495_v25  ;;  %v1500_v29 = vsub.s32 1, %v1495_v25 }
  0xfc   : > { %v1508_v30 = vsub.s32 3, %v1495_v25 }
  0xfd   : > { %1297 = vmatpush1.bf16.msra.mxu0 %v1193_v49  ;;  %v1081_v49 = vld [vmem:[%s2420_s9 + $0x760] sm:$0xff] }
  0xfe   : > { %1403 = vmatpush1.bf16.msra.mxu1 %v1195_v50  ;;  %1298 = vmatprep.subr.bf16.mxu0 %v1198_v51  ;;  %v1079_v50 = vld [vmem:[%s2420_s9 + $0x750] sm:$0xff]  ;;  %v1220_v51 = vpack.c.bf16 %v1084_v44, %v1080_v43  ;;  %v1217_v57 = vpack.c.bf16 %v1081_v49, %v1077_v48 }
  0xff   : > { %1404 = vmatprep.subr.bf16.mxu1 %v1200_v55  ;;  %v1088_v55 = vld [vmem:[%s2420_s9 + $0x798] sm:$0xff]  ;;  %v1219_v58 = vpack.c.bf16 %v1083_v52, %v1079_v50 }
 0x101   : > { %1299 = vmatpush1.bf16.msra.mxu0 %v1197_v61  ;;  %v1089_v61 = vld [vmem:[%s2420_s9 + $0x7a0] sm:$0xff] }
 0x102   : > { %1405 = vmatpush1.bf16.msra.mxu1 %v1199_v62  ;;  %1300 = vmatprep.subr.bf16.mxu0 %v1202_v63  ;;  %v1087_v62 = vld [vmem:[%s2420_s9 + $0x790] sm:$0xff]  ;;  %v1224_v63 = vpack.c.bf16 %v1092_v56, %v1088_v55  ;;  %v1221_v5 = vpack.c.bf16 %v1089_v61, %v1085_v60 }
 0x103   : > { %1406 = vmatprep.subr.bf16.mxu1 %v1204_v3  ;;  %v1096_v3 = vld [vmem:[%s2420_s9 + $0x7d8] sm:$0xff]  ;;  %v1223_v6 = vpack.c.bf16 %v1091_v0, %v1087_v62 }
 0x105   : > { %1301 = vmatpush1.bf16.msra.mxu0 %v1201_v9  ;;  %v1097_v9 = vld [vmem:[%s2420_s9 + $0x7e0] sm:$0xff] }
 0x106   : > { %1407 = vmatpush1.bf16.msra.mxu1 %v1203_v10  ;;  %1302 = vmatprep.subr.bf16.mxu0 %v1206_v11  ;;  %v1228_v10 = vpack.c.bf16 %v1100_v4, %v1096_v3  ;;  %v1095_v11 = vld [vmem:[%s2420_s9 + $0x7d0] sm:$0xff]  ;;  %v1225_v13 = vpack.c.bf16 %v1097_v9, %v1093_v8 }
 0x107   : > { %1408 = vmatprep.subr.bf16.mxu1 %v1208_v15  ;;  %v827_v15 = vld [vmem:[%s2781_s0 + $0x30] sm:$0xff]  ;;  %v1227_v16 = vpack.c.bf16 %v1099_v12, %v1095_v11 }
 0x108   : > { %v839_v19 = vpack.c.bf16 %v827_v15, %v823_v14 }
 0x109   : > { %1303 = vmatpush1.bf16.msra.mxu0 %v1205_v21  ;;  %v831_v21 = vld [vmem:[%s2781_s0 + $0x50] sm:$0xff] }
 0x10a   : > { %1409 = vmatpush1.bf16.msra.mxu1 %v1207_v22  ;;  %1304 = vmatprep.subr.bf16.mxu0 %v1210_v23  ;;  %v835_v22 = vld [vmem:[%s2781_s0 + $0x70] sm:$0xff] }
 0x10b   : > { %1410 = vmatprep.subr.bf16.mxu1 %v1212_v27  ;;  %v843_v23 = vpack.c.bf16 %v835_v22, %v831_v21  ;;  %v1492_v27 = vld [vmem:[%s781_s5] sm:$0xf] }
 0x10c   : > { %v1497_v31 = vrot.slane %v1492_v27, %v1496_v26  ;;  %v1505_v32 = vrot.slane %v1492_v27, %v1504_v28 }
 0x10d   : > { %1305 = vmatpush1.bf16.msra.mxu0 %v1209_v33  ;;  %v1501_v33 = vrot.slane %v1492_v27, %v1500_v29 }
 0x10e   : > { %1411 = vmatpush1.bf16.msra.mxu1 %v1211_v34  ;;  %1306 = vmatprep.subr.bf16.mxu0 %v1214_v35  ;;  %v1509_v34 = vrot.slane %v1492_v27, %v1508_v30 }
 0x10f   : > { %1412 = vmatprep.subr.bf16.mxu1 %v1216_v39 }
 0x111   : > { %1307 = vmatpush1.bf16.msra.mxu0 %v1213_v45 }
 0x112   : > { %1413 = vmatpush1.bf16.msra.mxu1 %v1215_v46  ;;  %1308 = vmatprep.subr.bf16.mxu0 %v1218_v47 }
 0x113   : > { %1414 = vmatprep.subr.bf16.mxu1 %v1220_v51 }
 0x115   : > { %1309 = vmatpush1.bf16.msra.mxu0 %v1217_v57 }
 0x116   : > { %1415 = vmatpush1.bf16.msra.mxu1 %v1219_v58  ;;  %1310 = vmatprep.subr.bf16.mxu0 %v1222_v59 }
 0x117   : > { %1416 = vmatprep.subr.bf16.mxu1 %v1224_v63 }
 0x119   : > { %1311 = vmatpush1.bf16.msra.mxu0 %v1221_v5 }
 0x11a   : > { %1417 = vmatpush1.bf16.msra.mxu1 %v1223_v6  ;;  %1312 = vmatprep.subr.bf16.mxu0 %v1226_v7 }
 0x11b   : > { %1418 = vmatprep.subr.bf16.mxu1 %v1228_v10 }
 0x11d   : > { %1313 = vmatpush1.bf16.msra.mxu0 %v1225_v13 }
 0x11e   : > { %1419 = vmatpush1.bf16.msra.mxu1 %v1227_v16 }
 0x120   : > { %1315 = vmatmul.mubr.bf16.vlgmr.msra.gmra.mrb[0].mxu0 %v839_v19 }
 0x121   : > { %1421 = vmatmul.mubr.bf16.vlgmr.msra.gmra.mrb[0].mxu1 %v839_v19  ;;  %1324 = vmatprep.mubr.bf16.mxu0 %v844_v20 }
 0x122   : > { %1430 = vmatprep.mubr.bf16.mxu1 %v844_v20 }
 0x128   : > { %1325 = vmatmul.mubr.bf16.gmra.mrb[4].mxu0 %v843_v23 }
 0x129   : > { %1431 = vmatmul.mubr.bf16.gmra.mrb[4].mxu1 %v843_v23 }
 0x1f3   : > { %v1316_v35 = vpop.f32.mrb[0].mxu0 }
 0x1f4   : > { %v1514_v36 = vadd.f32 %v1497_v31, %v1316_v35  ;;  %v1422_v37 = vpop.f32.mrb[0].mxu1  ;;  %v1318_v38 = vpop.f32.mrb[1].mxu0 }
 0x1f5   : > { %v1516_v39 = vadd.f32 %v1505_v32, %v1422_v37  ;;  %v1515_v40 = vadd.f32 %v1501_v33, %v1318_v38  ;;  %v1424_v41 = vpop.f32.mrb[1].mxu1  ;;  %v1320_v42 = vpop.f32.mrb[2].mxu0 }
 0x1f6   : > { %1530 = vst [vmem:[%s2726_s7] sm:$0xff] %v1514_v36  ;;  %v1517_v43 = vadd.f32 %v1509_v34, %v1424_v41  ;;  %v1518_v44 = vadd.f32 %v1497_v31, %v1320_v42  ;;  %v1426_v45 = vpop.f32.mrb[2].mxu1  ;;  %v1322_v46 = vpop.f32.mrb[3].mxu0 }
 0x1f7   : > { %1532 = vst [vmem:[%s2726_s7 + $0x10] sm:$0xff] %v1516_v39  ;;  %1531 = vst [vmem:[%s2726_s7 + $0x8] sm:$0xff] %v1515_v40  ;;  %v1520_v47 = vadd.f32 %v1505_v32, %v1426_v45  ;;  %v1519_v48 = vadd.f32 %v1501_v33, %v1322_v46  ;;  %v1428_v49 = vpop.f32.mrb[3].mxu1 }
 0x1f8   : > { %1533 = vst [vmem:[%s2726_s7 + $0x18] sm:$0xff] %v1517_v43  ;;  %1534 = vst [vmem:[%s2726_s7 + $0x20] sm:$0xff] %v1518_v44  ;;  %v1521_v50 = vadd.f32 %v1509_v34, %v1428_v49 }
 0x1f9   : > { %1536 = vst [vmem:[%s2726_s7 + $0x30] sm:$0xff] %v1520_v47  ;;  %1535 = vst [vmem:[%s2726_s7 + $0x28] sm:$0xff] %v1519_v48 }
 0x1fa   : > { %1537 = vst [vmem:[%s2726_s7 + $0x38] sm:$0xff] %v1521_v50 }
 0x1fb   : > { %v1326_v51 = vpop.f32.mrb[4].mxu0 }
 0x1fc   : > { %v1522_v52 = vadd.f32 %v1497_v31, %v1326_v51  ;;  %v1432_v53 = vpop.f32.mrb[4].mxu1  ;;  %v1328_v54 = vpop.f32.mrb[5].mxu0  ;;  %1552 = sbr.rel (!%p1880_p6) target bundleno = 523 (0x20b), region = 67 }
 0x1fd   : > { %v1524_v55 = vadd.f32 %v1505_v32, %v1432_v53  ;;  %v1523_v56 = vadd.f32 %v1501_v33, %v1328_v54  ;;  %v1434_v57 = vpop.f32.mrb[5].mxu1  ;;  %v1330_v58 = vpop.f32.mrb[6].mxu0  ;;  %v1571_v3 = vld [vmem:[%s2726_s7] sm:$0xff] (%p1880_p6) }
 0x1fe   : > { %1538 = vst [vmem:[%s2726_s7 + $0x40] sm:$0xff] %v1522_v52  ;;  %v1525_v59 = vadd.f32 %v1509_v34, %v1434_v57  ;;  %v1526_v60 = vadd.f32 %v1497_v31, %v1330_v58  ;;  %v1436_v61 = vpop.f32.mrb[6].mxu1  ;;  %v1332_v62 = vpop.f32.mrb[7].mxu0  ;;  %v1573_v4 = vld [vmem:[%s2726_s7 + $0x8] sm:$0xff] (%p1880_p6)  ;;  %v1575_v5 = vld [vmem:[%s2726_s7 + $0x10] sm:$0xff] (%p1880_p6)  ;;  %1572 = vst [vmem:[%s1558_s10] sm:$0xff] (%p1880_p6), %v1571_v3 }
 0x1ff   : > { %1540 = vst [vmem:[%s2726_s7 + $0x50] sm:$0xff] %v1524_v55  ;;  %1539 = vst [vmem:[%s2726_s7 + $0x48] sm:$0xff] %v1523_v56  ;;  %v1528_v63 = vadd.f32 %v1505_v32, %v1436_v61  ;;  %v1527_v0 = vadd.f32 %v1501_v33, %v1332_v62  ;;  %v1438_v1 = vpop.f32.mrb[7].mxu1  ;;  %v1577_v6 = vld [vmem:[%s2726_s7 + $0x18] sm:$0xff] (%p1880_p6)  ;;  %v1579_v7 = vld [vmem:[%s2726_s7 + $0x20] sm:$0xff] (%p1880_p6) }
 0x200   : > { %1541 = vst [vmem:[%s2726_s7 + $0x58] sm:$0xff] %v1525_v59  ;;  %1542 = vst [vmem:[%s2726_s7 + $0x60] sm:$0xff] %v1526_v60  ;;  %v1529_v2 = vadd.f32 %v1509_v34, %v1438_v1  ;;  %v1581_v8 = vld [vmem:[%s2726_s7 + $0x28] sm:$0xff] (%p1880_p6)  ;;  %v1583_v9 = vld [vmem:[%s2726_s7 + $0x30] sm:$0xff] (%p1880_p6) }
 0x201   : > { %1544 = vst [vmem:[%s2726_s7 + $0x70] sm:$0xff] %v1528_v63  ;;  %1543 = vst [vmem:[%s2726_s7 + $0x68] sm:$0xff] %v1527_v0  ;;  %v1585_v10 = vld [vmem:[%s2726_s7 + $0x38] sm:$0xff] (%p1880_p6) }
 0x202   : > { %1545 = vst [vmem:[%s2726_s7 + $0x78] sm:$0xff] %v1529_v2  ;;  %1574 = vst [vmem:[%s1558_s10 + $0x8] sm:$0xff] (%p1880_p6), %v1573_v4 }
 0x203   : > { %1576 = vst [vmem:[%s1558_s10 + $0x10] sm:$0xff] %v1575_v5  ;;  %1578 = vst [vmem:[%s1558_s10 + $0x18] sm:$0xff] %v1577_v6 }
 0x204   : > { %1580 = vst [vmem:[%s1558_s10 + $0x40] sm:$0xff] %v1579_v7  ;;  %1582 = vst [vmem:[%s1558_s10 + $0x48] sm:$0xff] %v1581_v8 }
 0x205   : > { %v1587_v11 = vld [vmem:[%s2726_s7 + $0x40] sm:$0xff]  ;;  %1584 = vst [vmem:[%s1558_s10 + $0x50] sm:$0xff] %v1583_v9  ;;  %1586 = vst [vmem:[%s1558_s10 + $0x58] sm:$0xff] %v1585_v10 }
 0x206   : > { %1588 = vst [vmem:[%s1558_s10 + $0x80] sm:$0xff] %v1587_v11  ;;  %v1589_v12 = vld [vmem:[%s2726_s7 + $0x48] sm:$0xff]  ;;  %v1591_v13 = vld [vmem:[%s2726_s7 + $0x50] sm:$0xff] }
 0x207   : > { %v1593_v14 = vld [vmem:[%s2726_s7 + $0x58] sm:$0xff]  ;;  %1590 = vst [vmem:[%s1558_s10 + $0x88] sm:$0xff] %v1589_v12  ;;  %1592 = vst [vmem:[%s1558_s10 + $0x90] sm:$0xff] %v1591_v13  ;;  %v1595_v15 = vld [vmem:[%s2726_s7 + $0x60] sm:$0xff] }
 0x208   : > { %1594 = vst [vmem:[%s1558_s10 + $0x98] sm:$0xff] %v1593_v14  ;;  %v1597_v16 = vld [vmem:[%s2726_s7 + $0x68] sm:$0xff]  ;;  %v1599_v17 = vld [vmem:[%s2726_s7 + $0x70] sm:$0xff]  ;;  %1596 = vst [vmem:[%s1558_s10 + $0xc0] sm:$0xff] %v1595_v15 }
 0x209   : > { %1598 = vst [vmem:[%s1558_s10 + $0xc8] sm:$0xff] %v1597_v16  ;;  %1600 = vst [vmem:[%s1558_s10 + $0xd0] sm:$0xff] %v1599_v17  ;;  %v1601_v18 = vld [vmem:[%s2726_s7 + $0x78] sm:$0xff] }
 0x20a   : > { %1602 = vst [vmem:[%s1558_s10 + $0xd8] sm:$0xff] %v1601_v18 }
 0x20b PF: > { %s13_s16 = sadd.s32 1, %s1823_s16   ;;  %s2786_s12 = smov %s1811_s13 }
 0x20c   : > { %p10_p12 = scmp.ge.s32.totalorder %s13_s16, 4   ;;  %s2787_s13 = smov %s1885_s22 }
 0x20d   : > { %s2788_s14 = smov %s1819_s15  ;;  %s2789_s15 = smov %s2791_s17 }
 0x20e   :  { %12 = sbr.rel (!%p10_p12) target bundleno = 3 (0x3), region = 127 }

// kernel: gqa_forward.5
= control target key start
LH: loop header
LB: loop body
LE: loop exit
PB: predicated region body
PF: predicated region fallthrough
CT: control target
= control target key end

     0   :  { %s1689_s0 = inlined_call_operand.vmem [shape: f32[32,512], index: 0, kind: input, shape index: {}]   ;;  %s1690_s1 = inlined_call_operand.vmem [shape: f32[512,512], index: 1, kind: input, shape index: {}]   ;;  %s1691_s2 = inlined_call_operand.vmem [shape: f32[1,512], index: 2, kind: input, shape index: {}]   ;;  %s1692_s3 = inlined_call_operand.hbm [shape: f32[32,512], index: 3, kind: output, shape index: {}]  }
   0x1   :  { %v76_v0 = vld [vmem:[%s1690_s1 + $0x8] sm:$0xff]  ;;  %v78_v2 = vld [vmem:[%s1690_s1 + $0x18] sm:$0xff]  ;;  %v75_v5 = vld [vmem:[%s1690_s1] sm:$0xff] }
   0x2   :  { %v80_v1 = vld [vmem:[%s1690_s1 + $0x28] sm:$0xff]  ;;  %v82_v4 = vld [vmem:[%s1690_s1 + $0x38] sm:$0xff]  ;;  %v79_v6 = vld [vmem:[%s1690_s1 + $0x20] sm:$0xff] }
   0x3   :  { %v332_v3 = vpack.c.bf16 %v80_v1, %v76_v0  ;;  %v334_v7 = vpack.c.bf16 %v82_v4, %v78_v2  ;;  %v331_v8 = vpack.c.bf16 %v79_v6, %v75_v5  ;;  %v77_v9 = vld [vmem:[%s1690_s1 + $0x10] sm:$0xff]  ;;  %v84_v11 = vld [vmem:[%s1690_s1 + $0x48] sm:$0xff]  ;;  %v86_v14 = vld [vmem:[%s1690_s1 + $0x58] sm:$0xff] }
   0x4   :  { %v81_v10 = vld [vmem:[%s1690_s1 + $0x30] sm:$0xff]  ;;  %v88_v13 = vld [vmem:[%s1690_s1 + $0x68] sm:$0xff]  ;;  %v90_v15 = vld [vmem:[%s1690_s1 + $0x78] sm:$0xff] }
   0x5   :  { %459 = vmatprep.subr.bf16.mxu0 %v332_v3  ;;  %v333_v12 = vpack.c.bf16 %v81_v10, %v77_v9  ;;  %565 = vmatprep.subr.bf16.mxu1 %v334_v7  ;;  %v336_v16 = vpack.c.bf16 %v88_v13, %v84_v11  ;;  %v338_v17 = vpack.c.bf16 %v90_v15, %v86_v14  ;;  %v83_v18 = vld [vmem:[%s1690_s1 + $0x40] sm:$0xff]  ;;  %v85_v20 = vld [vmem:[%s1690_s1 + $0x50] sm:$0xff]  ;;  %v92_v23 = vld [vmem:[%s1690_s1 + $0x88] sm:$0xff] }
   0x6   :  { %460 = vmatpush1.bf16.msra.mxu0 %v331_v8  ;;  %v87_v19 = vld [vmem:[%s1690_s1 + $0x60] sm:$0xff]  ;;  %v89_v22 = vld [vmem:[%s1690_s1 + $0x70] sm:$0xff]  ;;  %v96_v24 = vld [vmem:[%s1690_s1 + $0xa8] sm:$0xff] }
   0x7   :  { %566 = vmatpush1.bf16.msra.mxu1 %v333_v12  ;;  %v335_v21 = vpack.c.bf16 %v87_v19, %v83_v18  ;;  %461 = vmatprep.subr.bf16.mxu0 %v336_v16  ;;  %v337_v25 = vpack.c.bf16 %v89_v22, %v85_v20  ;;  %v340_v26 = vpack.c.bf16 %v96_v24, %v92_v23  ;;  %v94_v27 = vld [vmem:[%s1690_s1 + $0x98] sm:$0xff]  ;;  %v91_v29 = vld [vmem:[%s1690_s1 + $0x80] sm:$0xff]  ;;  %v93_v32 = vld [vmem:[%s1690_s1 + $0x90] sm:$0xff] }
   0x8   :  { %567 = vmatprep.subr.bf16.mxu1 %v338_v17  ;;  %v98_v28 = vld [vmem:[%s1690_s1 + $0xb8] sm:$0xff]  ;;  %v95_v31 = vld [vmem:[%s1690_s1 + $0xa0] sm:$0xff]  ;;  %v97_v33 = vld [vmem:[%s1690_s1 + $0xb0] sm:$0xff] }
   0x9   :  { %v342_v30 = vpack.c.bf16 %v98_v28, %v94_v27  ;;  %v339_v34 = vpack.c.bf16 %v95_v31, %v91_v29  ;;  %v100_v35 = vld [vmem:[%s1690_s1 + $0xc8] sm:$0xff]  ;;  %v102_v37 = vld [vmem:[%s1690_s1 + $0xd8] sm:$0xff]  ;;  %v341_v38 = vpack.c.bf16 %v97_v33, %v93_v32  ;;  %v99_v41 = vld [vmem:[%s1690_s1 + $0xc0] sm:$0xff] }
   0xa   :  { %462 = vmatpush1.bf16.msra.mxu0 %v335_v21  ;;  %v104_v36 = vld [vmem:[%s1690_s1 + $0xe8] sm:$0xff]  ;;  %v106_v40 = vld [vmem:[%s1690_s1 + $0xf8] sm:$0xff]  ;;  %v103_v42 = vld [vmem:[%s1690_s1 + $0xe0] sm:$0xff] }
   0xb   :  { %568 = vmatpush1.bf16.msra.mxu1 %v337_v25  ;;  %463 = vmatprep.subr.bf16.mxu0 %v340_v26  ;;  %v344_v39 = vpack.c.bf16 %v104_v36, %v100_v35  ;;  %v346_v43 = vpack.c.bf16 %v106_v40, %v102_v37  ;;  %v101_v44 = vld [vmem:[%s1690_s1 + $0xd0] sm:$0xff]  ;;  %v108_v46 = vld [vmem:[%s1690_s1 + $0x108] sm:$0xff]  ;;  %v110_v48 = vld [vmem:[%s1690_s1 + $0x118] sm:$0xff]  ;;  %v343_v50 = vpack.c.bf16 %v103_v42, %v99_v41 }
   0xc   :  { %569 = vmatprep.subr.bf16.mxu1 %v342_v30  ;;  %v105_v45 = vld [vmem:[%s1690_s1 + $0xf0] sm:$0xff]  ;;  %v112_v47 = vld [vmem:[%s1690_s1 + $0x128] sm:$0xff]  ;;  %v114_v49 = vld [vmem:[%s1690_s1 + $0x138] sm:$0xff] }
   0xd   :  { %v345_v51 = vpack.c.bf16 %v105_v45, %v101_v44  ;;  %v348_v52 = vpack.c.bf16 %v112_v47, %v108_v46  ;;  %v107_v53 = vld [vmem:[%s1690_s1 + $0x100] sm:$0xff]  ;;  %v109_v55 = vld [vmem:[%s1690_s1 + $0x110] sm:$0xff]  ;;  %v350_v56 = vpack.c.bf16 %v114_v49, %v110_v48  ;;  %v116_v58 = vld [vmem:[%s1690_s1 + $0x148] sm:$0xff] }
   0xe   :  { %464 = vmatpush1.bf16.msra.mxu0 %v339_v34  ;;  %v111_v54 = vld [vmem:[%s1690_s1 + $0x120] sm:$0xff]  ;;  %v113_v57 = vld [vmem:[%s1690_s1 + $0x130] sm:$0xff]  ;;  %v120_v59 = vld [vmem:[%s1690_s1 + $0x168] sm:$0xff] }
   0xf   :  { %570 = vmatpush1.bf16.msra.mxu1 %v341_v38  ;;  %465 = vmatprep.subr.bf16.mxu0 %v344_v39  ;;  %v118_v60 = vld [vmem:[%s1690_s1 + $0x158] sm:$0xff]  ;;  %v347_v62 = vpack.c.bf16 %v111_v54, %v107_v53  ;;  %v349_v63 = vpack.c.bf16 %v113_v57, %v109_v55  ;;  %v352_v0 = vpack.c.bf16 %v120_v59, %v116_v58  ;;  %v115_v1 = vld [vmem:[%s1690_s1 + $0x140] sm:$0xff]  ;;  %v117_v3 = vld [vmem:[%s1690_s1 + $0x150] sm:$0xff] }
  0x10   :  { %571 = vmatprep.subr.bf16.mxu1 %v346_v43  ;;  %v122_v61 = vld [vmem:[%s1690_s1 + $0x178] sm:$0xff]  ;;  %v119_v2 = vld [vmem:[%s1690_s1 + $0x160] sm:$0xff]  ;;  %v121_v5 = vld [vmem:[%s1690_s1 + $0x170] sm:$0xff] }
  0x11   :  { %v354_v4 = vpack.c.bf16 %v122_v61, %v118_v60  ;;  %v124_v6 = vld [vmem:[%s1690_s1 + $0x188] sm:$0xff]  ;;  %v126_v8 = vld [vmem:[%s1690_s1 + $0x198] sm:$0xff]  ;;  %v351_v10 = vpack.c.bf16 %v119_v2, %v115_v1  ;;  %v353_v11 = vpack.c.bf16 %v121_v5, %v117_v3  ;;  %v123_v13 = vld [vmem:[%s1690_s1 + $0x180] sm:$0xff] }
  0x12   :  { %466 = vmatpush1.bf16.msra.mxu0 %v343_v50  ;;  %v128_v7 = vld [vmem:[%s1690_s1 + $0x1a8] sm:$0xff]  ;;  %v130_v9 = vld [vmem:[%s1690_s1 + $0x1b8] sm:$0xff]  ;;  %v127_v14 = vld [vmem:[%s1690_s1 + $0x1a0] sm:$0xff] }
  0x13   :  { %572 = vmatpush1.bf16.msra.mxu1 %v345_v51  ;;  %467 = vmatprep.subr.bf16.mxu0 %v348_v52  ;;  %v356_v12 = vpack.c.bf16 %v128_v7, %v124_v6  ;;  %v125_v15 = vld [vmem:[%s1690_s1 + $0x190] sm:$0xff]  ;;  %v358_v16 = vpack.c.bf16 %v130_v9, %v126_v8  ;;  %v132_v18 = vld [vmem:[%s1690_s1 + $0x1c8] sm:$0xff]  ;;  %v134_v20 = vld [vmem:[%s1690_s1 + $0x1d8] sm:$0xff]  ;;  %v355_v22 = vpack.c.bf16 %v127_v14, %v123_v13 }
  0x14   :  { %573 = vmatprep.subr.bf16.mxu1 %v350_v56  ;;  %v129_v17 = vld [vmem:[%s1690_s1 + $0x1b0] sm:$0xff]  ;;  %v136_v19 = vld [vmem:[%s1690_s1 + $0x1e8] sm:$0xff]  ;;  %v138_v21 = vld [vmem:[%s1690_s1 + $0x1f8] sm:$0xff] }
  0x15   :  { %v357_v23 = vpack.c.bf16 %v129_v17, %v125_v15  ;;  %v360_v24 = vpack.c.bf16 %v136_v19, %v132_v18  ;;  %v131_v25 = vld [vmem:[%s1690_s1 + $0x1c0] sm:$0xff]  ;;  %v133_v27 = vld [vmem:[%s1690_s1 + $0x1d0] sm:$0xff]  ;;  %v362_v28 = vpack.c.bf16 %v138_v21, %v134_v20  ;;  %v140_v30 = vld [vmem:[%s1690_s1 + $0x208] sm:$0xff] }
  0x16   :  { %468 = vmatpush1.bf16.msra.mxu0 %v347_v62  ;;  %v135_v26 = vld [vmem:[%s1690_s1 + $0x1e0] sm:$0xff]  ;;  %v137_v29 = vld [vmem:[%s1690_s1 + $0x1f0] sm:$0xff]  ;;  %v144_v31 = vld [vmem:[%s1690_s1 + $0x228] sm:$0xff] }
  0x17   :  { %574 = vmatpush1.bf16.msra.mxu1 %v349_v63  ;;  %469 = vmatprep.subr.bf16.mxu0 %v352_v0  ;;  %v142_v32 = vld [vmem:[%s1690_s1 + $0x218] sm:$0xff]  ;;  %v359_v34 = vpack.c.bf16 %v135_v26, %v131_v25  ;;  %v361_v35 = vpack.c.bf16 %v137_v29, %v133_v27  ;;  %v364_v36 = vpack.c.bf16 %v144_v31, %v140_v30  ;;  %v139_v37 = vld [vmem:[%s1690_s1 + $0x200] sm:$0xff]  ;;  %v141_v39 = vld [vmem:[%s1690_s1 + $0x210] sm:$0xff] }
  0x18   :  { %575 = vmatprep.subr.bf16.mxu1 %v354_v4  ;;  %v146_v33 = vld [vmem:[%s1690_s1 + $0x238] sm:$0xff]  ;;  %v143_v38 = vld [vmem:[%s1690_s1 + $0x220] sm:$0xff]  ;;  %v145_v41 = vld [vmem:[%s1690_s1 + $0x230] sm:$0xff] }
  0x19   :  { %v366_v40 = vpack.c.bf16 %v146_v33, %v142_v32  ;;  %v148_v42 = vld [vmem:[%s1690_s1 + $0x248] sm:$0xff]  ;;  %v150_v44 = vld [vmem:[%s1690_s1 + $0x258] sm:$0xff]  ;;  %v363_v46 = vpack.c.bf16 %v143_v38, %v139_v37  ;;  %v365_v47 = vpack.c.bf16 %v145_v41, %v141_v39  ;;  %v147_v49 = vld [vmem:[%s1690_s1 + $0x240] sm:$0xff] }
  0x1a   :  { %470 = vmatpush1.bf16.msra.mxu0 %v351_v10  ;;  %v152_v43 = vld [vmem:[%s1690_s1 + $0x268] sm:$0xff]  ;;  %v154_v45 = vld [vmem:[%s1690_s1 + $0x278] sm:$0xff]  ;;  %v151_v50 = vld [vmem:[%s1690_s1 + $0x260] sm:$0xff] }
  0x1b   :  { %576 = vmatpush1.bf16.msra.mxu1 %v353_v11  ;;  %471 = vmatprep.subr.bf16.mxu0 %v356_v12  ;;  %v368_v48 = vpack.c.bf16 %v152_v43, %v148_v42  ;;  %v149_v51 = vld [vmem:[%s1690_s1 + $0x250] sm:$0xff]  ;;  %v370_v52 = vpack.c.bf16 %v154_v45, %v150_v44  ;;  %v156_v54 = vld [vmem:[%s1690_s1 + $0x288] sm:$0xff]  ;;  %v158_v56 = vld [vmem:[%s1690_s1 + $0x298] sm:$0xff]  ;;  %v367_v58 = vpack.c.bf16 %v151_v50, %v147_v49 }
  0x1c   :  { %577 = vmatprep.subr.bf16.mxu1 %v358_v16  ;;  %v153_v53 = vld [vmem:[%s1690_s1 + $0x270] sm:$0xff]  ;;  %v160_v55 = vld [vmem:[%s1690_s1 + $0x2a8] sm:$0xff]  ;;  %v162_v57 = vld [vmem:[%s1690_s1 + $0x2b8] sm:$0xff] }
  0x1d   :  { %v369_v59 = vpack.c.bf16 %v153_v53, %v149_v51  ;;  %v372_v60 = vpack.c.bf16 %v160_v55, %v156_v54  ;;  %v155_v61 = vld [vmem:[%s1690_s1 + $0x280] sm:$0xff]  ;;  %v157_v63 = vld [vmem:[%s1690_s1 + $0x290] sm:$0xff]  ;;  %v374_v0 = vpack.c.bf16 %v162_v57, %v158_v56  ;;  %v164_v2 = vld [vmem:[%s1690_s1 + $0x2c8] sm:$0xff] }
  0x1e   :  { %472 = vmatpush1.bf16.msra.mxu0 %v355_v22  ;;  %v159_v62 = vld [vmem:[%s1690_s1 + $0x2a0] sm:$0xff]  ;;  %v161_v1 = vld [vmem:[%s1690_s1 + $0x2b0] sm:$0xff]  ;;  %v168_v3 = vld [vmem:[%s1690_s1 + $0x2e8] sm:$0xff] }
  0x1f   :  { %578 = vmatpush1.bf16.msra.mxu1 %v357_v23  ;;  %473 = vmatprep.subr.bf16.mxu0 %v360_v24  ;;  %v166_v4 = vld [vmem:[%s1690_s1 + $0x2d8] sm:$0xff]  ;;  %v371_v6 = vpack.c.bf16 %v159_v62, %v155_v61  ;;  %v163_v7 = vld [vmem:[%s1690_s1 + $0x2c0] sm:$0xff]  ;;  %v373_v8 = vpack.c.bf16 %v161_v1, %v157_v63  ;;  %v376_v9 = vpack.c.bf16 %v168_v3, %v164_v2  ;;  %v165_v11 = vld [vmem:[%s1690_s1 + $0x2d0] sm:$0xff] }
  0x20   :  { %579 = vmatprep.subr.bf16.mxu1 %v362_v28  ;;  %v170_v5 = vld [vmem:[%s1690_s1 + $0x2f8] sm:$0xff]  ;;  %v167_v10 = vld [vmem:[%s1690_s1 + $0x2e0] sm:$0xff]  ;;  %v169_v12 = vld [vmem:[%s1690_s1 + $0x2f0] sm:$0xff] }
  0x21   :  { %v378_v13 = vpack.c.bf16 %v170_v5, %v166_v4  ;;  %v172_v14 = vld [vmem:[%s1690_s1 + $0x308] sm:$0xff]  ;;  %v174_v17 = vld [vmem:[%s1690_s1 + $0x318] sm:$0xff]  ;;  %v375_v20 = vpack.c.bf16 %v167_v10, %v163_v7  ;;  %v377_v22 = vpack.c.bf16 %v169_v12, %v165_v11  ;;  %v171_v24 = vld [vmem:[%s1690_s1 + $0x300] sm:$0xff] }
  0x22   :  { %474 = vmatpush1.bf16.msra.mxu0 %v359_v34  ;;  %v176_v15 = vld [vmem:[%s1690_s1 + $0x328] sm:$0xff]  ;;  %v178_v18 = vld [vmem:[%s1690_s1 + $0x338] sm:$0xff]  ;;  %v175_v25 = vld [vmem:[%s1690_s1 + $0x320] sm:$0xff] }
  0x23   :  { %580 = vmatpush1.bf16.msra.mxu1 %v361_v35  ;;  %475 = vmatprep.subr.bf16.mxu0 %v364_v36  ;;  %v52_v16 = vld [vmem:[%s1689_s0 + $0x8] sm:$0xff]  ;;  %v380_v23 = vpack.c.bf16 %v176_v15, %v172_v14  ;;  %v173_v26 = vld [vmem:[%s1690_s1 + $0x310] sm:$0xff]  ;;  %v382_v27 = vpack.c.bf16 %v178_v18, %v174_v17  ;;  %v182_v31 = vld [vmem:[%s1690_s1 + $0x358] sm:$0xff]  ;;  %v379_v33 = vpack.c.bf16 %v175_v25, %v171_v24 }
  0x24   :  { %581 = vmatprep.subr.bf16.mxu1 %v366_v40  ;;  %v56_v19 = vld [vmem:[%s1689_s0 + $0x28] sm:$0xff]  ;;  %v177_v28 = vld [vmem:[%s1690_s1 + $0x330] sm:$0xff]  ;;  %v186_v32 = vld [vmem:[%s1690_s1 + $0x378] sm:$0xff] }
  0x25   :  { %v68_v21 = vpack.c.bf16 %v56_v19, %v52_v16  ;;  %v180_v29 = vld [vmem:[%s1690_s1 + $0x348] sm:$0xff]  ;;  %v381_v34 = vpack.c.bf16 %v177_v28, %v173_v26  ;;  %v179_v36 = vld [vmem:[%s1690_s1 + $0x340] sm:$0xff]  ;;  %v181_v38 = vld [vmem:[%s1690_s1 + $0x350] sm:$0xff]  ;;  %v386_v39 = vpack.c.bf16 %v186_v32, %v182_v31 }
  0x26   :  { %476 = vmatpush1.bf16.msra.mxu0 %v363_v46  ;;  %v184_v30 = vld [vmem:[%s1690_s1 + $0x368] sm:$0xff]  ;;  %v183_v37 = vld [vmem:[%s1690_s1 + $0x360] sm:$0xff]  ;;  %v185_v40 = vld [vmem:[%s1690_s1 + $0x370] sm:$0xff] }
  0x27   :  { %582 = vmatpush1.bf16.msra.mxu1 %v365_v47  ;;  %477 = vmatprep.subr.bf16.mxu0 %v368_v48  ;;  %v384_v35 = vpack.c.bf16 %v184_v30, %v180_v29  ;;  %v188_v41 = vld [vmem:[%s1690_s1 + $0x388] sm:$0xff]  ;;  %v190_v43 = vld [vmem:[%s1690_s1 + $0x398] sm:$0xff]  ;;  %v383_v45 = vpack.c.bf16 %v183_v37, %v179_v36  ;;  %v385_v46 = vpack.c.bf16 %v185_v40, %v181_v38  ;;  %v187_v48 = vld [vmem:[%s1690_s1 + $0x380] sm:$0xff] }
  0x28   :  { %583 = vmatprep.subr.bf16.mxu1 %v370_v52  ;;  %491 = vmatprep.mubr.bf16.mxu0 %v68_v21  ;;  %v192_v42 = vld [vmem:[%s1690_s1 + $0x3a8] sm:$0xff]  ;;  %v194_v44 = vld [vmem:[%s1690_s1 + $0x3b8] sm:$0xff]  ;;  %v191_v49 = vld [vmem:[%s1690_s1 + $0x3a0] sm:$0xff] }
  0x29   :  { %597 = vmatprep.mubr.bf16.mxu1 %v68_v21  ;;  %v388_v47 = vpack.c.bf16 %v192_v42, %v188_v41  ;;  %v189_v50 = vld [vmem:[%s1690_s1 + $0x390] sm:$0xff]  ;;  %v390_v51 = vpack.c.bf16 %v194_v44, %v190_v43  ;;  %v196_v53 = vld [vmem:[%s1690_s1 + $0x3c8] sm:$0xff]  ;;  %v198_v55 = vld [vmem:[%s1690_s1 + $0x3d8] sm:$0xff]  ;;  %v387_v57 = vpack.c.bf16 %v191_v49, %v187_v48 }
  0x2a   :  { %478 = vmatpush1.bf16.msra.mxu0 %v367_v58  ;;  %v193_v52 = vld [vmem:[%s1690_s1 + $0x3b0] sm:$0xff]  ;;  %v200_v54 = vld [vmem:[%s1690_s1 + $0x3e8] sm:$0xff]  ;;  %v202_v56 = vld [vmem:[%s1690_s1 + $0x3f8] sm:$0xff] }
  0x2b   :  { %584 = vmatpush1.bf16.msra.mxu1 %v369_v59  ;;  %479 = vmatprep.subr.bf16.mxu0 %v372_v60  ;;  %v389_v58 = vpack.c.bf16 %v193_v52, %v189_v50  ;;  %v392_v59 = vpack.c.bf16 %v200_v54, %v196_v53  ;;  %v195_v60 = vld [vmem:[%s1690_s1 + $0x3c0] sm:$0xff]  ;;  %v197_v62 = vld [vmem:[%s1690_s1 + $0x3d0] sm:$0xff]  ;;  %v394_v63 = vpack.c.bf16 %v202_v56, %v198_v55  ;;  %v204_v1 = vld [vmem:[%s1690_s1 + $0x408] sm:$0xff] }
  0x2c   :  { %585 = vmatprep.subr.bf16.mxu1 %v374_v0  ;;  %v199_v61 = vld [vmem:[%s1690_s1 + $0x3e0] sm:$0xff]  ;;  %v201_v0 = vld [vmem:[%s1690_s1 + $0x3f0] sm:$0xff]  ;;  %v208_v2 = vld [vmem:[%s1690_s1 + $0x428] sm:$0xff] }
  0x2d   :  { %v206_v3 = vld [vmem:[%s1690_s1 + $0x418] sm:$0xff]  ;;  %v391_v5 = vpack.c.bf16 %v199_v61, %v195_v60  ;;  %v55_v7 = vld [vmem:[%s1689_s0 + $0x20] sm:$0xff]  ;;  %v205_v12 = vld [vmem:[%s1690_s1 + $0x410] sm:$0xff] }
  0x2e   :  { %480 = vmatpush1.bf16.msra.mxu0 %v371_v6  ;;  %v210_v4 = vld [vmem:[%s1690_s1 + $0x438] sm:$0xff]  ;;  %v51_v6 = vld [vmem:[%s1689_s0] sm:$0xff]  ;;  %v209_v14 = vld [vmem:[%s1690_s1 + $0x430] sm:$0xff] }
  0x2f   :  { %586 = vmatpush1.bf16.msra.mxu1 %v373_v8  ;;  %481 = vmatprep.subr.bf16.mxu0 %v376_v9  ;;  %v393_v8 = vpack.c.bf16 %v201_v0, %v197_v62  ;;  %v396_v9 = vpack.c.bf16 %v208_v2, %v204_v1  ;;  %v203_v10 = vld [vmem:[%s1690_s1 + $0x400] sm:$0xff]  ;;  %v212_v15 = vld [vmem:[%s1690_s1 + $0x448] sm:$0xff]  ;;  %v67_v17 = vpack.c.bf16 %v55_v7, %v51_v6  ;;  %v214_v18 = vld [vmem:[%s1690_s1 + $0x458] sm:$0xff] }
  0x30   :  { %587 = vmatprep.subr.bf16.mxu1 %v378_v13  ;;  %v207_v11 = vld [vmem:[%s1690_s1 + $0x420] sm:$0xff]  ;;  %v398_v13 = vpack.c.bf16 %v210_v4, %v206_v3  ;;  %v216_v16 = vld [vmem:[%s1690_s1 + $0x468] sm:$0xff]  ;;  %v218_v19 = vld [vmem:[%s1690_s1 + $0x478] sm:$0xff]  ;;  %v397_v21 = vpack.c.bf16 %v209_v14, %v205_v12 }
  0x31   :  { %v215_v24 = vld [vmem:[%s1690_s1 + $0x460] sm:$0xff]  ;;  %v213_v25 = vld [vmem:[%s1690_s1 + $0x450] sm:$0xff]  ;;  %v402_v26 = vpack.c.bf16 %v218_v19, %v214_v18  ;;  %v220_v28 = vld [vmem:[%s1690_s1 + $0x488] sm:$0xff] }
  0x32   :  { %482 = vmatpush1.bf16.msra.mxu0 %v375_v20  ;;  %v395_v20 = vpack.c.bf16 %v207_v11, %v203_v10  ;;  %v224_v29 = vld [vmem:[%s1690_s1 + $0x4a8] sm:$0xff]  ;;  %v222_v30 = vld [vmem:[%s1690_s1 + $0x498] sm:$0xff]  ;;  %v223_v36 = vld [vmem:[%s1690_s1 + $0x4a0] sm:$0xff] }
  0x33   :  { %588 = vmatpush1.bf16.msra.mxu1 %v377_v22  ;;  %483 = vmatprep.subr.bf16.mxu0 %v380_v23  ;;  %v400_v22 = vpack.c.bf16 %v216_v16, %v212_v15  ;;  %v211_v23 = vld [vmem:[%s1690_s1 + $0x440] sm:$0xff]  ;;  %v226_v31 = vld [vmem:[%s1690_s1 + $0x4b8] sm:$0xff]  ;;  %v221_v37 = vld [vmem:[%s1690_s1 + $0x490] sm:$0xff] }
  0x34   :  { %589 = vmatprep.subr.bf16.mxu1 %v382_v27  ;;  %v217_v27 = vld [vmem:[%s1690_s1 + $0x470] sm:$0xff]  ;;  %v399_v32 = vpack.c.bf16 %v215_v24, %v211_v23  ;;  %v406_v38 = vpack.c.bf16 %v226_v31, %v222_v30  ;;  %v228_v40 = vld [vmem:[%s1690_s1 + $0x4c8] sm:$0xff]  ;;  %v230_v42 = vld [vmem:[%s1690_s1 + $0x4d8] sm:$0xff] }
  0x35   :  { %v232_v41 = vld [vmem:[%s1690_s1 + $0x4e8] sm:$0xff]  ;;  %v234_v43 = vld [vmem:[%s1690_s1 + $0x4f8] sm:$0xff]  ;;  %v231_v48 = vld [vmem:[%s1690_s1 + $0x4e0] sm:$0xff] }
  0x36   :  { %484 = vmatpush1.bf16.msra.mxu0 %v379_v33  ;;  %v401_v33 = vpack.c.bf16 %v217_v27, %v213_v25  ;;  %v229_v49 = vld [vmem:[%s1690_s1 + $0x4d0] sm:$0xff]  ;;  %v410_v50 = vpack.c.bf16 %v234_v43, %v230_v42  ;;  %v236_v52 = vld [vmem:[%s1690_s1 + $0x508] sm:$0xff]  ;;  %v238_v54 = vld [vmem:[%s1690_s1 + $0x518] sm:$0xff] }
  0x37   :  { %590 = vmatpush1.bf16.msra.mxu1 %v381_v34  ;;  %485 = vmatprep.subr.bf16.mxu0 %v384_v35  ;;  %v404_v34 = vpack.c.bf16 %v224_v29, %v220_v28  ;;  %v219_v35 = vld [vmem:[%s1690_s1 + $0x480] sm:$0xff]  ;;  %v240_v53 = vld [vmem:[%s1690_s1 + $0x528] sm:$0xff]  ;;  %v242_v55 = vld [vmem:[%s1690_s1 + $0x538] sm:$0xff] }
  0x38   :  { %591 = vmatprep.subr.bf16.mxu1 %v386_v39  ;;  %v225_v39 = vld [vmem:[%s1690_s1 + $0x4b0] sm:$0xff]  ;;  %v403_v44 = vpack.c.bf16 %v223_v36, %v219_v35  ;;  %v239_v60 = vld [vmem:[%s1690_s1 + $0x520] sm:$0xff]  ;;  %v414_v62 = vpack.c.bf16 %v242_v55, %v238_v54  ;;  %v244_v0 = vld [vmem:[%s1690_s1 + $0x548] sm:$0xff] }
  0x39   :  { %v237_v61 = vld [vmem:[%s1690_s1 + $0x510] sm:$0xff]  ;;  %v248_v1 = vld [vmem:[%s1690_s1 + $0x568] sm:$0xff]  ;;  %v246_v2 = vld [vmem:[%s1690_s1 + $0x558] sm:$0xff] }
  0x3a   :  { %486 = vmatpush1.bf16.msra.mxu0 %v383_v45  ;;  %v405_v45 = vpack.c.bf16 %v225_v39, %v221_v37  ;;  %v250_v3 = vld [vmem:[%s1690_s1 + $0x578] sm:$0xff]  ;;  %v243_v4 = vld [vmem:[%s1690_s1 + $0x540] sm:$0xff]  ;;  %v245_v7 = vld [vmem:[%s1690_s1 + $0x550] sm:$0xff]  ;;  %v416_v10 = vpack.c.bf16 %v248_v1, %v244_v0 }
  0x3b   :  { %592 = vmatpush1.bf16.msra.mxu1 %v385_v46  ;;  %487 = vmatprep.subr.bf16.mxu0 %v388_v47  ;;  %v408_v46 = vpack.c.bf16 %v232_v41, %v228_v40  ;;  %v227_v47 = vld [vmem:[%s1690_s1 + $0x4c0] sm:$0xff]  ;;  %v252_v11 = vld [vmem:[%s1690_s1 + $0x588] sm:$0xff]  ;;  %v418_v14 = vpack.c.bf16 %v250_v3, %v246_v2  ;;  %v254_v19 = vld [vmem:[%s1690_s1 + $0x598] sm:$0xff] }
  0x3c   :  { %593 = vmatprep.subr.bf16.mxu1 %v390_v51  ;;  %v233_v51 = vld [vmem:[%s1690_s1 + $0x4f0] sm:$0xff]  ;;  %v407_v56 = vpack.c.bf16 %v231_v48, %v227_v47  ;;  %v247_v6 = vld [vmem:[%s1690_s1 + $0x560] sm:$0xff]  ;;  %v60_v12 = vld [vmem:[%s1689_s0 + $0x48] sm:$0xff] }
  0x3d   :  { %v256_v15 = vld [vmem:[%s1690_s1 + $0x5a8] sm:$0xff]  ;;  %v63_v18 = vld [vmem:[%s1689_s0 + $0x60] sm:$0xff]  ;;  %v253_v27 = vld [vmem:[%s1690_s1 + $0x590] sm:$0xff] }
  0x3e   :  { %488 = vmatpush1.bf16.msra.mxu0 %v387_v57  ;;  %v409_v57 = vpack.c.bf16 %v233_v51, %v229_v49  ;;  %v420_v24 = vpack.c.bf16 %v256_v15, %v252_v11  ;;  %v251_v25 = vld [vmem:[%s1690_s1 + $0x580] sm:$0xff]  ;;  %v257_v29 = vld [vmem:[%s1690_s1 + $0x5b0] sm:$0xff]  ;;  %v260_v30 = vld [vmem:[%s1690_s1 + $0x5c8] sm:$0xff] }
  0x3f   :  { %594 = vmatpush1.bf16.msra.mxu1 %v389_v58  ;;  %489 = vmatprep.subr.bf16.mxu0 %v392_v59  ;;  %v412_v58 = vpack.c.bf16 %v240_v53, %v236_v52  ;;  %v235_v59 = vld [vmem:[%s1690_s1 + $0x500] sm:$0xff]  ;;  %v264_v31 = vld [vmem:[%s1690_s1 + $0x5e8] sm:$0xff]  ;;  %v54_v36 = vld [vmem:[%s1689_s0 + $0x18] sm:$0xff] }
  0x40   :  { %595 = vmatprep.subr.bf16.mxu1 %v394_v63  ;;  %v241_v63 = vld [vmem:[%s1690_s1 + $0x530] sm:$0xff]  ;;  %v259_v35 = vld [vmem:[%s1690_s1 + $0x5c0] sm:$0xff]  ;;  %v58_v37 = vld [vmem:[%s1689_s0 + $0x38] sm:$0xff]  ;;  %v424_v39 = vpack.c.bf16 %v264_v31, %v260_v30 }
  0x41   :  { %v263_v40 = vld [vmem:[%s1690_s1 + $0x5e0] sm:$0xff]  ;;  %v261_v41 = vld [vmem:[%s1690_s1 + $0x5d0] sm:$0xff]  ;;  %v70_v43 = vpack.c.bf16 %v58_v37, %v54_v36 }
  0x42   :  { %490 = vmatpush1.bf16.msra.mxu0 %v391_v5  ;;  %v411_v5 = vpack.c.bf16 %v239_v60, %v235_v59  ;;  %v265_v42 = vld [vmem:[%s1690_s1 + $0x5f0] sm:$0xff] }
  0x43   :  { %596 = vmatpush1.bf16.msra.mxu1 %v393_v8  ;;  %512 = vmatprep.subr.bf16.mxu0 %v396_v9  ;;  %v249_v8 = vld [vmem:[%s1690_s1 + $0x570] sm:$0xff]  ;;  %v413_v9 = vpack.c.bf16 %v241_v63, %v237_v61 }
  0x44   :  { %618 = vmatprep.subr.bf16.mxu1 %v398_v13  ;;  %v64_v13 = vld [vmem:[%s1689_s0 + $0x68] sm:$0xff]  ;;  %v417_v23 = vpack.c.bf16 %v249_v8, %v245_v7 }
  0x45   :  { %492 = vmatmul.mubr.bf16.vlgmr.msra.gmra.mrb[0].mxu0 %v67_v17  ;;  %v72_v16 = vpack.c.bf16 %v64_v13, %v60_v12 }
  0x46   :  { %513 = vmatpush1.bf16.msra.mxu0 %v395_v20  ;;  %598 = vmatmul.mubr.bf16.vlgmr.msra.gmra.mrb[0].mxu1 %v67_v17  ;;  %v59_v17 = vld [vmem:[%s1689_s0 + $0x40] sm:$0xff]  ;;  %v258_v20 = vld [vmem:[%s1690_s1 + $0x5b8] sm:$0xff] }
  0x47   :  { %619 = vmatpush1.bf16.msra.mxu1 %v397_v21  ;;  %514 = vmatprep.subr.bf16.mxu0 %v400_v22  ;;  %v71_v21 = vpack.c.bf16 %v63_v18, %v59_v17  ;;  %v415_v22 = vpack.c.bf16 %v247_v6, %v243_v4  ;;  %v422_v28 = vpack.c.bf16 %v258_v20, %v254_v19 }
  0x48   :  { %620 = vmatprep.subr.bf16.mxu1 %v402_v26  ;;  %501 = vmatprep.mubr.bf16.mxu0 %v72_v16  ;;  %v255_v26 = vld [vmem:[%s1690_s1 + $0x5a0] sm:$0xff] }
  0x49   :  { %607 = vmatprep.mubr.bf16.mxu1 %v72_v16 }
  0x4a   :  { %515 = vmatpush1.bf16.msra.mxu0 %v399_v32  ;;  %v262_v32 = vld [vmem:[%s1690_s1 + $0x5d8] sm:$0xff] }
  0x4b   :  { %621 = vmatpush1.bf16.msra.mxu1 %v401_v33  ;;  %516 = vmatprep.subr.bf16.mxu0 %v404_v34  ;;  %v266_v33 = vld [vmem:[%s1690_s1 + $0x5f8] sm:$0xff]  ;;  %v419_v34 = vpack.c.bf16 %v255_v26, %v251_v25 }
  0x4c   :  { %622 = vmatprep.subr.bf16.mxu1 %v406_v38  ;;  %v421_v38 = vpack.c.bf16 %v257_v29, %v253_v27 }
  0x4d   :  { %502 = vmatmul.mubr.bf16.gmra.mrb[4].mxu0 %v71_v21 }
  0x4e   :  { %517 = vmatpush1.bf16.msra.mxu0 %v403_v44  ;;  %608 = vmatmul.mubr.bf16.gmra.mrb[4].mxu1 %v71_v21  ;;  %v426_v44 = vpack.c.bf16 %v266_v33, %v262_v32 }
  0x4f   :  { %623 = vmatpush1.bf16.msra.mxu1 %v405_v45  ;;  %518 = vmatprep.subr.bf16.mxu0 %v408_v46  ;;  %v268_v45 = vld [vmem:[%s1690_s1 + $0x608] sm:$0xff] }
  0x50   :  { %624 = vmatprep.subr.bf16.mxu1 %v410_v50  ;;  %v272_v46 = vld [vmem:[%s1690_s1 + $0x628] sm:$0xff] }
  0x52   :  { %519 = vmatpush1.bf16.msra.mxu0 %v407_v56 }
  0x53   :  { %625 = vmatpush1.bf16.msra.mxu1 %v409_v57  ;;  %520 = vmatprep.subr.bf16.mxu0 %v412_v58 }
  0x54   :  { %626 = vmatprep.subr.bf16.mxu1 %v414_v62 }
  0x56   :  { %521 = vmatpush1.bf16.msra.mxu0 %v411_v5 }
  0x57   :  { %627 = vmatpush1.bf16.msra.mxu1 %v413_v9  ;;  %522 = vmatprep.subr.bf16.mxu0 %v416_v10 }
  0x58   :  { %628 = vmatprep.subr.bf16.mxu1 %v418_v14 }
  0x5a   :  { %523 = vmatpush1.bf16.msra.mxu0 %v415_v22 }
  0x5b   :  { %629 = vmatpush1.bf16.msra.mxu1 %v417_v23  ;;  %524 = vmatprep.subr.bf16.mxu0 %v420_v24 }
  0x5c   :  { %630 = vmatprep.subr.bf16.mxu1 %v422_v28 }
  0x5d   :  { %8 = vsyncpa [#allocation4], 0  ;;  %v270_v47 = vld [vmem:[%s1690_s1 + $0x618] sm:$0xff]  ;;  %544 = vmatprep.mubr.bf16.mxu0 %v70_v43  ;;  %650 = vmatprep.mubr.bf16.mxu1 %v70_v43  ;;  %v423_v49 = vpack.c.bf16 %v263_v40, %v259_v35  ;;  %v425_v50 = vpack.c.bf16 %v265_v42, %v261_v41  ;;  %v428_v51 = vpack.c.bf16 %v272_v46, %v268_v45  ;;  %v267_v52 = vld [vmem:[%s1690_s1 + $0x600] sm:$0xff] }
  0x5e   :  { %v274_v48 = vld [vmem:[%s1690_s1 + $0x638] sm:$0xff]  ;;  %525 = vmatpush1.bf16.msra.mxu0 %v419_v34  ;;  %v271_v53 = vld [vmem:[%s1690_s1 + $0x620] sm:$0xff]  ;;  %v269_v54 = vld [vmem:[%s1690_s1 + $0x610] sm:$0xff] }
  0x5f   :  { %631 = vmatpush1.bf16.msra.mxu1 %v421_v38  ;;  %526 = vmatprep.subr.bf16.mxu0 %v424_v39  ;;  %v430_v55 = vpack.c.bf16 %v274_v48, %v270_v47  ;;  %v273_v56 = vld [vmem:[%s1690_s1 + $0x630] sm:$0xff]  ;;  %v276_v57 = vld [vmem:[%s1690_s1 + $0x648] sm:$0xff]  ;;  %v278_v59 = vld [vmem:[%s1690_s1 + $0x658] sm:$0xff]  ;;  %v427_v61 = vpack.c.bf16 %v271_v53, %v267_v52 }
  0x60   :  { %632 = vmatprep.subr.bf16.mxu1 %v426_v44  ;;  %v280_v58 = vld [vmem:[%s1690_s1 + $0x668] sm:$0xff]  ;;  %v282_v60 = vld [vmem:[%s1690_s1 + $0x678] sm:$0xff]  ;;  %v429_v62 = vpack.c.bf16 %v273_v56, %v269_v54  ;;  %v275_v0 = vld [vmem:[%s1690_s1 + $0x640] sm:$0xff] }
  0x61   :  { %v432_v63 = vpack.c.bf16 %v280_v58, %v276_v57  ;;  %v279_v1 = vld [vmem:[%s1690_s1 + $0x660] sm:$0xff]  ;;  %v277_v2 = vld [vmem:[%s1690_s1 + $0x650] sm:$0xff]  ;;  %v434_v3 = vpack.c.bf16 %v282_v60, %v278_v59  ;;  %v284_v5 = vld [vmem:[%s1690_s1 + $0x688] sm:$0xff] }
  0x62   :  { %527 = vmatpush1.bf16.msra.mxu0 %v423_v49  ;;  %v281_v4 = vld [vmem:[%s1690_s1 + $0x670] sm:$0xff]  ;;  %v288_v6 = vld [vmem:[%s1690_s1 + $0x6a8] sm:$0xff]  ;;  %v286_v7 = vld [vmem:[%s1690_s1 + $0x698] sm:$0xff]  ;;  %v431_v9 = vpack.c.bf16 %v279_v1, %v275_v0 }
  0x63   :  { %633 = vmatpush1.bf16.msra.mxu1 %v425_v50  ;;  %528 = vmatprep.subr.bf16.mxu0 %v428_v51  ;;  %v290_v8 = vld [vmem:[%s1690_s1 + $0x6b8] sm:$0xff]  ;;  %v433_v10 = vpack.c.bf16 %v281_v4, %v277_v2  ;;  %v436_v11 = vpack.c.bf16 %v288_v6, %v284_v5  ;;  %v283_v12 = vld [vmem:[%s1690_s1 + $0x680] sm:$0xff]  ;;  %v285_v14 = vld [vmem:[%s1690_s1 + $0x690] sm:$0xff] }
  0x64   :  { %634 = vmatprep.subr.bf16.mxu1 %v430_v55  ;;  %v287_v13 = vld [vmem:[%s1690_s1 + $0x6a0] sm:$0xff]  ;;  %v438_v15 = vpack.c.bf16 %v290_v8, %v286_v7  ;;  %v289_v16 = vld [vmem:[%s1690_s1 + $0x6b0] sm:$0xff]  ;;  %v292_v17 = vld [vmem:[%s1690_s1 + $0x6c8] sm:$0xff] }
  0x65   :  { %v296_v18 = vld [vmem:[%s1690_s1 + $0x6e8] sm:$0xff]  ;;  %v294_v19 = vld [vmem:[%s1690_s1 + $0x6d8] sm:$0xff]  ;;  %v435_v21 = vpack.c.bf16 %v287_v13, %v283_v12  ;;  %v437_v22 = vpack.c.bf16 %v289_v16, %v285_v14  ;;  %v291_v24 = vld [vmem:[%s1690_s1 + $0x6c0] sm:$0xff] }
  0x66   :  { %529 = vmatpush1.bf16.msra.mxu0 %v427_v61  ;;  %v298_v20 = vld [vmem:[%s1690_s1 + $0x6f8] sm:$0xff]  ;;  %v440_v23 = vpack.c.bf16 %v296_v18, %v292_v17  ;;  %v295_v25 = vld [vmem:[%s1690_s1 + $0x6e0] sm:$0xff]  ;;  %v293_v26 = vld [vmem:[%s1690_s1 + $0x6d0] sm:$0xff] }
  0x67   :  { %635 = vmatpush1.bf16.msra.mxu1 %v429_v62  ;;  %530 = vmatprep.subr.bf16.mxu0 %v432_v63  ;;  %v442_v27 = vpack.c.bf16 %v298_v20, %v294_v19  ;;  %v297_v28 = vld [vmem:[%s1690_s1 + $0x6f0] sm:$0xff]  ;;  %v300_v29 = vld [vmem:[%s1690_s1 + $0x708] sm:$0xff]  ;;  %v302_v31 = vld [vmem:[%s1690_s1 + $0x718] sm:$0xff]  ;;  %v439_v33 = vpack.c.bf16 %v295_v25, %v291_v24  ;;  %v724_v24 = vlaneseq }
  0x68   :  { %636 = vmatprep.subr.bf16.mxu1 %v434_v3  ;;  %v304_v30 = vld [vmem:[%s1690_s1 + $0x728] sm:$0xff]  ;;  %v306_v32 = vld [vmem:[%s1690_s1 + $0x738] sm:$0xff]  ;;  %v441_v34 = vpack.c.bf16 %v297_v28, %v293_v26  ;;  %v299_v36 = vld [vmem:[%s1690_s1 + $0x700] sm:$0xff] }
  0x69   :  { %v444_v35 = vpack.c.bf16 %v304_v30, %v300_v29  ;;  %v303_v37 = vld [vmem:[%s1690_s1 + $0x720] sm:$0xff]  ;;  %v301_v38 = vld [vmem:[%s1690_s1 + $0x710] sm:$0xff]  ;;  %v446_v39 = vpack.c.bf16 %v306_v32, %v302_v31  ;;  %v308_v41 = vld [vmem:[%s1690_s1 + $0x748] sm:$0xff]  ;;  %v725_v25 = vshrl.u32 %v724_v24, 7 }
  0x6a   :  { %531 = vmatpush1.bf16.msra.mxu0 %v431_v9  ;;  %v305_v40 = vld [vmem:[%s1690_s1 + $0x730] sm:$0xff]  ;;  %v312_v42 = vld [vmem:[%s1690_s1 + $0x768] sm:$0xff]  ;;  %v310_v43 = vld [vmem:[%s1690_s1 + $0x758] sm:$0xff]  ;;  %v443_v45 = vpack.c.bf16 %v303_v37, %v299_v36 }
  0x6b   :  { %637 = vmatpush1.bf16.msra.mxu1 %v433_v10  ;;  %532 = vmatprep.subr.bf16.mxu0 %v436_v11  ;;  %v314_v44 = vld [vmem:[%s1690_s1 + $0x778] sm:$0xff]  ;;  %v445_v46 = vpack.c.bf16 %v305_v40, %v301_v38  ;;  %v448_v47 = vpack.c.bf16 %v312_v42, %v308_v41  ;;  %v307_v48 = vld [vmem:[%s1690_s1 + $0x740] sm:$0xff]  ;;  %v309_v50 = vld [vmem:[%s1690_s1 + $0x750] sm:$0xff]  ;;  %v726_v26 = vsub.s32 0, %v725_v25  ;;  %v734_v28 = vsub.s32 2, %v725_v25 }
  0x6c   :  { %638 = vmatprep.subr.bf16.mxu1 %v438_v15  ;;  %v311_v49 = vld [vmem:[%s1690_s1 + $0x760] sm:$0xff]  ;;  %v450_v51 = vpack.c.bf16 %v314_v44, %v310_v43  ;;  %v313_v52 = vld [vmem:[%s1690_s1 + $0x770] sm:$0xff]  ;;  %v316_v53 = vld [vmem:[%s1690_s1 + $0x788] sm:$0xff]  ;;  %v730_v29 = vsub.s32 1, %v725_v25  ;;  %v738_v30 = vsub.s32 3, %v725_v25 }
  0x6d   :  { %v320_v54 = vld [vmem:[%s1690_s1 + $0x7a8] sm:$0xff]  ;;  %v318_v55 = vld [vmem:[%s1690_s1 + $0x798] sm:$0xff]  ;;  %v447_v57 = vpack.c.bf16 %v311_v49, %v307_v48  ;;  %v449_v58 = vpack.c.bf16 %v313_v52, %v309_v50  ;;  %v315_v60 = vld [vmem:[%s1690_s1 + $0x780] sm:$0xff] }
  0x6e   :  { %533 = vmatpush1.bf16.msra.mxu0 %v435_v21  ;;  %v322_v56 = vld [vmem:[%s1690_s1 + $0x7b8] sm:$0xff]  ;;  %v452_v59 = vpack.c.bf16 %v320_v54, %v316_v53  ;;  %v319_v61 = vld [vmem:[%s1690_s1 + $0x7a0] sm:$0xff]  ;;  %v317_v62 = vld [vmem:[%s1690_s1 + $0x790] sm:$0xff] }
  0x6f   :  { %639 = vmatpush1.bf16.msra.mxu1 %v437_v22  ;;  %534 = vmatprep.subr.bf16.mxu0 %v440_v23  ;;  %v454_v63 = vpack.c.bf16 %v322_v56, %v318_v55  ;;  %v321_v0 = vld [vmem:[%s1690_s1 + $0x7b0] sm:$0xff]  ;;  %v324_v1 = vld [vmem:[%s1690_s1 + $0x7c8] sm:$0xff]  ;;  %v326_v3 = vld [vmem:[%s1690_s1 + $0x7d8] sm:$0xff]  ;;  %v451_v5 = vpack.c.bf16 %v319_v61, %v315_v60 }
  0x70   :  { %640 = vmatprep.subr.bf16.mxu1 %v442_v27  ;;  %v328_v2 = vld [vmem:[%s1690_s1 + $0x7e8] sm:$0xff]  ;;  %v330_v4 = vld [vmem:[%s1690_s1 + $0x7f8] sm:$0xff]  ;;  %v453_v6 = vpack.c.bf16 %v321_v0, %v317_v62  ;;  %v323_v8 = vld [vmem:[%s1690_s1 + $0x7c0] sm:$0xff] }
  0x71   :  { %v456_v7 = vpack.c.bf16 %v328_v2, %v324_v1  ;;  %v327_v9 = vld [vmem:[%s1690_s1 + $0x7e0] sm:$0xff]  ;;  %v458_v10 = vpack.c.bf16 %v330_v4, %v326_v3  ;;  %v325_v11 = vld [vmem:[%s1690_s1 + $0x7d0] sm:$0xff]  ;;  %v62_v17 = vld [vmem:[%s1689_s0 + $0x58] sm:$0xff] }
  0x72   :  { %535 = vmatpush1.bf16.msra.mxu0 %v439_v33  ;;  %v329_v12 = vld [vmem:[%s1690_s1 + $0x7f0] sm:$0xff]  ;;  %v455_v13 = vpack.c.bf16 %v327_v9, %v323_v8  ;;  %v66_v18 = vld [vmem:[%s1689_s0 + $0x78] sm:$0xff]  ;;  %v722_v27 = vld [vmem:[%s1691_s2] sm:$0xf] }
  0x73   :  { %641 = vmatpush1.bf16.msra.mxu1 %v441_v34  ;;  %536 = vmatprep.subr.bf16.mxu0 %v444_v35  ;;  %v53_v14 = vld [vmem:[%s1689_s0 + $0x10] sm:$0xff]  ;;  %v457_v16 = vpack.c.bf16 %v329_v12, %v325_v11  ;;  %v74_v20 = vpack.c.bf16 %v66_v18, %v62_v17  ;;  %v727_v31 = vrot.slane %v722_v27, %v726_v26 }
  0x74   :  { %642 = vmatprep.subr.bf16.mxu1 %v446_v39  ;;  %v57_v15 = vld [vmem:[%s1689_s0 + $0x30] sm:$0xff]  ;;  %v735_v32 = vrot.slane %v722_v27, %v734_v28  ;;  %v731_v33 = vrot.slane %v722_v27, %v730_v29  ;;  %v739_v34 = vrot.slane %v722_v27, %v738_v30 }
  0x75   :  { %v69_v19 = vpack.c.bf16 %v57_v15, %v53_v14  ;;  %v61_v21 = vld [vmem:[%s1689_s0 + $0x50] sm:$0xff] }
  0x76   :  { %537 = vmatpush1.bf16.msra.mxu0 %v443_v45  ;;  %v65_v22 = vld [vmem:[%s1689_s0 + $0x70] sm:$0xff]  ;;  %s835_s0 = smov [#allocation3]  }
  0x77   :  { %643 = vmatpush1.bf16.msra.mxu1 %v445_v46  ;;  %538 = vmatprep.subr.bf16.mxu0 %v448_v47  ;;  %v73_v23 = vpack.c.bf16 %v65_v22, %v61_v21  ;;  %s781_s2 = sshll.u32 %s835_s0, 4  ;;  %s782_s2 = int_to_ptr.vmem [resolvable:$true] %s781_s2 }
  0x78   :  { %644 = vmatprep.subr.bf16.mxu1 %v450_v51  ;;  %s811_s17 = scalar_lea.vmem %s782_s2, 2048  ;;  %p816_p1 = scmp.lt.s32.totalorder %s782_s2, %s782_s2 }
  0x79   :  { %p812_p0 = scmp.ne.s32.totalorder %s782_s2, %s811_s17  ;;  %p817_p2 = scmp.lt.s32.totalorder %s811_s17, %s811_s17 }
  0x7a   :  { %539 = vmatpush1.bf16.msra.mxu0 %v447_v57 }
  0x7b   :  { %645 = vmatpush1.bf16.msra.mxu1 %v449_v58  ;;  %540 = vmatprep.subr.bf16.mxu0 %v452_v59  ;;  %p818_p3 = por %p817_p2, %p816_p1 }
  0x7c   :  { %646 = vmatprep.subr.bf16.mxu1 %v454_v63 }
  0x7d   :  { %p819_p4 = pnand %p818_p3, %p812_p0 }
  0x7e   :  { %541 = vmatpush1.bf16.msra.mxu0 %v451_v5 }
  0x7f   :  { %647 = vmatpush1.bf16.msra.mxu1 %v453_v6  ;;  %542 = vmatprep.subr.bf16.mxu0 %v456_v7 }
  0x80   :  { %648 = vmatprep.subr.bf16.mxu1 %v458_v10 }
  0x82   :  { %543 = vmatpush1.bf16.msra.mxu0 %v455_v13 }
  0x83   :  { %649 = vmatpush1.bf16.msra.mxu1 %v457_v16 }
  0x85   :  { %545 = vmatmul.mubr.bf16.vlgmr.msra.gmra.mrb[0].mxu0 %v69_v19 }
  0x86   :  { %651 = vmatmul.mubr.bf16.vlgmr.msra.gmra.mrb[0].mxu1 %v69_v19  ;;  %554 = vmatprep.mubr.bf16.mxu0 %v74_v20 }
  0x87   :  { %660 = vmatprep.mubr.bf16.mxu1 %v74_v20 }
  0x8d   :  { %555 = vmatmul.mubr.bf16.gmra.mrb[4].mxu0 %v73_v23 }
  0x8e   :  { %661 = vmatmul.mubr.bf16.gmra.mrb[4].mxu1 %v73_v23 }
 0x158   :  { %v546_v35 = vpop.f32.mrb[0].mxu0 }
 0x159   :  { %v744_v36 = vadd.f32 %v727_v31, %v546_v35  ;;  %v652_v37 = vpop.f32.mrb[0].mxu1  ;;  %v548_v38 = vpop.f32.mrb[1].mxu0 }
 0x15a   :  { %v746_v39 = vadd.f32 %v735_v32, %v652_v37  ;;  %v745_v40 = vadd.f32 %v731_v33, %v548_v38  ;;  %v654_v41 = vpop.f32.mrb[1].mxu1  ;;  %v550_v42 = vpop.f32.mrb[2].mxu0 }
 0x15b   :  { %760 = vst [vmem:[#allocation3] sm:$0xff] %v744_v36  ;;  %v747_v43 = vadd.f32 %v739_v34, %v654_v41  ;;  %v748_v44 = vadd.f32 %v727_v31, %v550_v42  ;;  %v656_v45 = vpop.f32.mrb[2].mxu1  ;;  %v552_v46 = vpop.f32.mrb[3].mxu0 }
 0x15c   :  { %762 = vst [vmem:[#allocation3 + $0x10] sm:$0xff] %v746_v39  ;;  %761 = vst [vmem:[#allocation3 + $0x8] sm:$0xff] %v745_v40  ;;  %v750_v47 = vadd.f32 %v735_v32, %v656_v45  ;;  %v749_v48 = vadd.f32 %v731_v33, %v552_v46  ;;  %v658_v49 = vpop.f32.mrb[3].mxu1 }
 0x15d   :  { %763 = vst [vmem:[#allocation3 + $0x18] sm:$0xff] %v747_v43  ;;  %764 = vst [vmem:[#allocation3 + $0x20] sm:$0xff] %v748_v44  ;;  %v751_v50 = vadd.f32 %v739_v34, %v658_v49 }
 0x15e   :  { %766 = vst [vmem:[#allocation3 + $0x30] sm:$0xff] %v750_v47  ;;  %765 = vst [vmem:[#allocation3 + $0x28] sm:$0xff] %v749_v48 }
 0x15f   :  { %767 = vst [vmem:[#allocation3 + $0x38] sm:$0xff] %v751_v50 }
 0x160   :  { %v556_v51 = vpop.f32.mrb[4].mxu0 }
 0x161   :  { %v752_v52 = vadd.f32 %v727_v31, %v556_v51  ;;  %v662_v53 = vpop.f32.mrb[4].mxu1  ;;  %v558_v54 = vpop.f32.mrb[5].mxu0 }
 0x162   :  { %v754_v55 = vadd.f32 %v735_v32, %v662_v53  ;;  %v753_v56 = vadd.f32 %v731_v33, %v558_v54  ;;  %v664_v57 = vpop.f32.mrb[5].mxu1  ;;  %v560_v58 = vpop.f32.mrb[6].mxu0 }
 0x163   :  { %768 = vst [vmem:[#allocation3 + $0x40] sm:$0xff] %v752_v52  ;;  %v755_v59 = vadd.f32 %v739_v34, %v664_v57  ;;  %v756_v60 = vadd.f32 %v727_v31, %v560_v58  ;;  %v666_v61 = vpop.f32.mrb[6].mxu1  ;;  %v562_v62 = vpop.f32.mrb[7].mxu0 }
 0x164   :  { %770 = vst [vmem:[#allocation3 + $0x50] sm:$0xff] %v754_v55  ;;  %769 = vst [vmem:[#allocation3 + $0x48] sm:$0xff] %v753_v56  ;;  %v758_v63 = vadd.f32 %v735_v32, %v666_v61  ;;  %v757_v0 = vadd.f32 %v731_v33, %v562_v62  ;;  %v668_v1 = vpop.f32.mrb[7].mxu1 }
 0x165   :  { %771 = vst [vmem:[#allocation3 + $0x58] sm:$0xff] %v755_v59  ;;  %772 = vst [vmem:[#allocation3 + $0x60] sm:$0xff] %v756_v60  ;;  %v759_v2 = vadd.f32 %v739_v34, %v668_v1 }
 0x166   :  { %774 = vst [vmem:[#allocation3 + $0x70] sm:$0xff] %v758_v63  ;;  %773 = vst [vmem:[#allocation3 + $0x68] sm:$0xff] %v757_v0 }
 0x167   :  { %775 = vst [vmem:[#allocation3 + $0x78] sm:$0xff] %v759_v2 }
 0x168   :  { %822 = shalt.err (!%p819_p4)
}
 0x169   :  { %s823_s20 = scalar_lea.hbm %s1692_s3, 2048 }
 0x16a   :  { %p824_p5 = scmp.ne.s32.totalorder %s1692_s3, %s823_s20  ;;  %p827_p6 = scmp.lt.u32.totalorder %s823_s20, %s1692_s3 }
 0x16c   :  { %p829_p7 = pnand %p827_p6, %p824_p5 }
 0x16e   :  { %832 = shalt.err (!%p829_p7)
}
 0x16f   :  { %s836_s25 = smov 512   ;;  %s837_s26 = smov 32  }
 0x170   :  { %787 = dma.vmem_to_hbm [thread:$0]  %s782_s2, 2048, %s1692_s3, [#allocation4], %s836_s25, %s836_s25, %s837_s26  }
 0x171   :  { %833 = dma.done.wait [#allocation4], 2048  }
 0x172   :  { %834 = vsyncadd [#allocation4], 4294965248 }
 0x173   :  { %791 = vsyncpa [#allocation4], 1 }

</bundles_post_ra>
